<compile_context>
chip_gen: v7x
topology: tpu7x:2x2x1
jax: 0.10.0
libtpu: 0.0.40
codegen_flags: <defaults>
</compile_context>

<pallas_src>
import functools

import jax
import jax.numpy as jnp
from jax import lax
from jax.experimental import pallas as pl
from jax.experimental.pallas import tpu as pltpu

_TILE_B = 32                    # samples per grid step (multiple of 8)
_COMPUTE_DTYPE = jnp.bfloat16   # MXU operand dtype (accumulation is always f32)


def _round_up(n, m):
    return ((n + m - 1) // m) * m


def _cnn_kernel(x1_ref, a1c_ref, a2c_ref, w3_ref, b1_ref, b2_ref, b3_ref, o_ref, *, tb):
    """One grid step = tb samples, rows ordered h-major: sublane = h * tb + sample."""
    f32 = jnp.float32
    cdt = x1_ref.dtype

    # ---- conv1 + 2x2 max-pool: ONE matmul, all 4 pool parities in 256-lane quarters ----
    y1 = jnp.dot(x1_ref[...], a1c_ref[...], preferred_element_type=f32)     # (14*tb, 1024)
    mw1 = jnp.maximum(jnp.maximum(y1[:, 0:256], y1[:, 256:512]),
                      jnp.maximum(y1[:, 512:768], y1[:, 768:1024]))         # (14*tb, 256)
    a1 = jnp.maximum(mw1 + b1_ref[...], 0.0).astype(cdt)                    # bias+ReLU post-pool

    # ---- conv2: 5 banded matmuls; row taps = zero-filled shifts by whole tb-row blocks ----
    def shift(x, k):                       # y[m] = x[m + k*tb], zero-filled (aligned blocks)
        if k == 0:
            return x
        z = jnp.zeros((abs(k) * tb, x.shape[1]), x.dtype)
        if k > 0:
            return jnp.concatenate([x[k * tb:, :], z], axis=0)
        return jnp.concatenate([z, x[:k * tb, :]], axis=0)

    lhs = [shift(a1, kh - 2) for kh in range(5)]
    acc2 = jnp.dot(lhs[0], a2c_ref[0], preferred_element_type=f32)          # (14*tb, 512)
    for kh in range(1, 5):                 # back-to-back chain, no elementwise in between
        acc2 = acc2 + jnp.dot(lhs[kh], a2c_ref[kh], preferred_element_type=f32)

    # 2x2 max-pool: W parity = 256-lane halves, H parity = adjacent tb-row blocks
    t2 = jnp.maximum(acc2[:, 0:256], acc2[:, 256:512])                      # (14*tb, 256)
    t2 = jnp.maximum(t2 + b2_ref[...], 0.0)                                 # bias+ReLU (monotone)
    t2 = t2.reshape(7, 2 * tb, 256)
    a2 = jnp.maximum(t2[:, :tb, :], t2[:, tb:, :]).astype(cdt)              # (7, tb, 256)

    # ---- Linear(32*7*7, 10): 7 contiguous (tb,256) x (256,10) matmuls ----
    out = jnp.zeros((tb, 10), f32) + b3_ref[...]
    for h in range(7):
        out = out + jnp.dot(a2[h], w3_ref[h], preferred_element_type=f32)
    o_ref[...] = out.astype(o_ref.dtype)


def _build_constants(params, dtype):
    """Fold conv taps, pool parities, padding and layout permutations into constants."""
    f32 = jnp.float32
    w1, b1 = params["w1"].astype(f32), params["b1"].astype(f32)   # (5,5,1,16), (16,)
    w2, b2 = params["w2"].astype(f32), params["b2"].astype(f32)   # (5,5,16,32), (32,)
    w3, b3 = params["w3"].astype(f32), params["b3"].astype(f32)   # (1568,10), (10,)

    # conv1: A1c[32*d + wp, 256*q + 16*j + c] = w1[d-eh, wp-(2j+ew), 0, c]  (q = 2*eh+ew)
    w1s = w1[:, :, 0, :]                                          # (5,5,16)
    d = jnp.arange(6)
    wp = jnp.arange(32)
    j1 = jnp.arange(14)
    quarters = []
    for eh in (0, 1):
        for ew in (0, 1):
            kh = d - eh                                           # (6,)
            kw = wp[:, None] - (2 * j1[None, :] + ew)             # (32,14)
            okh = (kh >= 0) & (kh <= 4)
            okw = (kw >= 0) & (kw <= 4)
            g = w1s[jnp.clip(kh, 0, 4)][:, jnp.clip(kw, 0, 4), :]         # (6,32,14,16)
            g = jnp.where(okh[:, None, None, None] & okw[None, :, :, None], g, 0.0)
            quarters.append(jnp.pad(g.reshape(192, 224), ((0, 0), (0, 32))))
    A1c = jnp.concatenate(quarters, axis=1).astype(dtype)         # (192, 1024)

    # conv2: A2c[kh][16*ji + ci, 256*ew + 32*j2 + co] = w2[kh, ji+2-(2*j2+ew), ci, co]
    ji = jnp.arange(14)
    j2 = jnp.arange(7)
    halves = []
    for ew in (0, 1):
        kw = ji[:, None] + 2 - (2 * j2[None, :] + ew)             # (14,7)
        ok = (kw >= 0) & (kw <= 4)
        g = w2[:, jnp.clip(kw, 0, 4), :, :]                       # (5,14,7,16,32)
        g = jnp.where(ok[None, :, :, None, None], g, 0.0)
        g = g.transpose(0, 1, 3, 2, 4).reshape(5, 224, 224)       # rows 16*ji+ci, cols 32*j2+co
        halves.append(jnp.pad(g, ((0, 0), (0, 32), (0, 32))))
    A2c = jnp.concatenate(halves, axis=2).astype(dtype)           # (5, 256, 512)

    # Linear: permute w3's input rows from torch CHW flatten order to (h2, 32*j2 + co)
    W3r = w3.reshape(32, 7, 7, 10).transpose(1, 2, 0, 3).reshape(7, 224, 10)
    W3r = jnp.pad(W3r, ((0, 0), (0, 32), (0, 0))).astype(dtype)   # (7, 256, 10)

    b1t = jnp.pad(jnp.tile(b1, 14), (0, 32)).reshape(1, 256)      # lane = 16*j + c
    b2t = jnp.pad(jnp.tile(b2, 7), (0, 32)).reshape(1, 256)       # lane = 32*j2 + co
    b3r = b3.reshape(1, 10)
    return A1c, A2c, W3r, b1t, b2t, b3r


@jax.jit
def cnn_forward(x_nchw, params):
    B = x_nchw.shape[0]
    tb = min(_TILE_B, _round_up(B, 8))
    Bp = _round_up(B, tb)
    nsteps = Bp // tb
    dtype = _COMPUTE_DTYPE

    consts = _build_constants(params, dtype)

    # conv1 LHS slab (pure XLA, tiny): for each pooled row h1 the 6 padded input rows
    # 2*h1 .. 2*h1+5 laid side by side in lanes (K = 192); rows h1-major within a tile.
    x_pad = jnp.pad(x_nchw[:, 0, :, :], ((0, Bp - B), (2, 2), (2, 2)))      # (Bp, 32, 32)
    rowsel = 2 * jnp.arange(14)[:, None] + jnp.arange(6)[None, :]           # (14, 6)
    X1 = x_pad[:, rowsel, :]                                                # (Bp, 14, 6, 32)
    X1 = X1.reshape(nsteps, tb, 14, 192).transpose(0, 2, 1, 3)
    X1 = X1.reshape(nsteps * 14 * tb, 192).astype(dtype)

    def _const_spec(arr):
        zeros = (0,) * arr.ndim
        return pl.BlockSpec(arr.shape, lambda b, _z=zeros: _z)

    out = pl.pallas_call(
        functools.partial(_cnn_kernel, tb=tb),
        out_shape=jax.ShapeDtypeStruct((Bp, 10), jnp.float32),
        grid_spec=pltpu.PrefetchScalarGridSpec(
            num_scalar_prefetch=0,
            grid=(nsteps,),
            in_specs=[pl.BlockSpec((14 * tb, 192), lambda b: (b, 0))]
                     + [_const_spec(c) for c in consts],
            out_specs=pl.BlockSpec((tb, 10), lambda b: (b, 0))),
        compiler_params=pltpu.CompilerParams(
            dimension_semantics=("parallel",),
            vmem_limit_bytes=32 * 1024 * 1024),
    )(X1, *consts)
    return out[:B]


def init_params(key):
    k1, k2, k3 = jax.random.split(key, 3)
    # conv1: nn.Conv2d(1, 16, 5, 1, 2)  -> HWIO (5, 5, 1, 16)
    w1 = jax.random.normal(k1, (5, 5, 1, 16), jnp.float32) * 0.1
    b1 = jnp.linspace(-0.1, 0.1, 16).astype(jnp.float32)
    # conv2: nn.Conv2d(16, 32, 5, 1, 2) -> HWIO (5, 5, 16, 32)
    w2 = jax.random.normal(k2, (5, 5, 16, 32), jnp.float32) * 0.05
    b2 = jnp.linspace(-0.1, 0.1, 32).astype(jnp.float32)
    # output: nn.Linear(32*7*7, 10); stored as (in, out) = (1568, 10)
    w3 = jax.random.normal(k3, (32 * 7 * 7, 10), jnp.float32) * 0.02
    b3 = jnp.linspace(-0.1, 0.1, 10).astype(jnp.float32)
    return dict(w1=w1, b1=b1, w2=w2, b2=b2, w3=w3, b3=b3)


def cnn_forward_ref(x_nchw, params):
    """Pure-JAX f32 reference (no Pallas) for correctness checking."""
    x = jnp.transpose(x_nchw, (0, 2, 3, 1))

    def layer(x, w, b):
        y = lax.conv_general_dilated(
            x, w, window_strides=(1, 1), padding=[(2, 2), (2, 2)],
            dimension_numbers=("NHWC", "HWIO", "NHWC")) + b
        y = jnp.maximum(y, 0.0)
        return lax.reduce_window(y, -jnp.inf, lax.max,
                                 (1, 2, 2, 1), (1, 2, 2, 1), "VALID")

    x = layer(x, params["w1"], params["b1"])
    x = layer(x, params["w2"], params["b2"])
    x = jnp.transpose(x, (0, 3, 1, 2)).reshape(x.shape[0], -1)   # torch NCHW flatten
    return x @ params["w3"] + params["b3"]


if __name__ == "__main__":
    key = jax.random.PRNGKey(0)
    k_in, k_par = jax.random.split(key)
    # Input shape is pinned by nn.Linear(32*7*7, 10): (B, 1, 28, 28), NCHW.
    x = jax.random.normal(k_in, (2, 1, 28, 28), jnp.float32)
    params = init_params(k_par)

    out = jax.block_until_ready(cnn_forward(x, params))
    assert out.shape == (2, 10), out.shape

    ref = jax.block_until_ready(cnn_forward_ref(x, params))
    # bf16 matmul operands (f32 accumulation) -> looser tolerance than pure-f32 parity.
    err = float(jnp.max(jnp.abs(out - ref)))
    assert jnp.allclose(out, ref, atol=2e-2, rtol=2e-2), err

    print("KERNEL_OK")
</pallas_src>

<mosaic_0001>
module attributes {stable_mosaic.version = 11 : i64} {
  func.func @_cnn_kernel(%arg0: i32, %arg1: memref<112x192xbf16, #tpu.memory_space<vmem>>, %arg2: memref<192x1024xbf16, #tpu.memory_space<vmem>>, %arg3: memref<5x256x512xbf16, #tpu.memory_space<vmem>>, %arg4: memref<7x256x10xbf16, #tpu.memory_space<vmem>>, %arg5: memref<1x256xf32, #tpu.memory_space<vmem>>, %arg6: memref<1x256xf32, #tpu.memory_space<vmem>>, %arg7: memref<1x10xf32, #tpu.memory_space<vmem>>, %arg8: memref<8x10xf32, #tpu.memory_space<vmem>>) attributes {dimension_semantics = [#tpu.dimension_semantics<parallel>], iteration_bounds = array<i64: 1>, scalar_prefetch = 0 : i64, scratch_operands = 0 : i64, tpu.core_type = #tpu.core_type<tc>, window_params = [{transform_indices = @transform_0, window_bounds = array<i64: 112, 192>}, {pipeline_mode = #tpu.pipeline_mode<synchronous>, transform_indices = @transform_1, window_bounds = array<i64: 192, 1024>}, {pipeline_mode = #tpu.pipeline_mode<synchronous>, transform_indices = @transform_2, window_bounds = array<i64: 5, 256, 512>}, {pipeline_mode = #tpu.pipeline_mode<synchronous>, transform_indices = @transform_3, window_bounds = array<i64: 7, 256, 10>}, {pipeline_mode = #tpu.pipeline_mode<synchronous>, transform_indices = @transform_4, window_bounds = array<i64: 1, 256>}, {pipeline_mode = #tpu.pipeline_mode<synchronous>, transform_indices = @transform_5, window_bounds = array<i64: 1, 256>}, {pipeline_mode = #tpu.pipeline_mode<synchronous>, transform_indices = @transform_6, window_bounds = array<i64: 1, 10>}, {transform_indices = @transform_7, window_bounds = array<i64: 8, 10>}]} {
    %c0 = arith.constant 0 : index
    %c0_0 = arith.constant 0 : index
    %0 = vector.load %arg1[%c0, %c0_0] : memref<112x192xbf16, #tpu.memory_space<vmem>>, vector<112x192xbf16>
    %c0_1 = arith.constant 0 : index
    %c0_2 = arith.constant 0 : index
    %1 = vector.load %arg2[%c0_1, %c0_2] : memref<192x1024xbf16, #tpu.memory_space<vmem>>, vector<192x1024xbf16>
    %cst = arith.constant dense<0.000000e+00> : vector<112x1024xf32>
    %2 = tpu.matmul %0, %1, %cst {dimension_numbers = #tpu.dot_dimension_numbers<[1], [0], [0], [1], [0, 0, 1, 1], [], []>} : vector<112x192xbf16>, vector<192x1024xbf16>, vector<112x1024xf32> -> vector<112x1024xf32>
    %3 = vector.extract_strided_slice %2 {offsets = [0, 0], sizes = [112, 256], strides = [1, 1]} : vector<112x1024xf32> to vector<112x256xf32>
    %4 = vector.extract_strided_slice %2 {offsets = [0, 256], sizes = [112, 256], strides = [1, 1]} : vector<112x1024xf32> to vector<112x256xf32>
    %5 = arith.maximumf %3, %4 : vector<112x256xf32>
    %6 = vector.extract_strided_slice %2 {offsets = [0, 512], sizes = [112, 256], strides = [1, 1]} : vector<112x1024xf32> to vector<112x256xf32>
    %7 = vector.extract_strided_slice %2 {offsets = [0, 768], sizes = [112, 256], strides = [1, 1]} : vector<112x1024xf32> to vector<112x256xf32>
    %8 = arith.maximumf %6, %7 : vector<112x256xf32>
    %9 = arith.maximumf %5, %8 : vector<112x256xf32>
    %c0_3 = arith.constant 0 : index
    %c0_4 = arith.constant 0 : index
    %10 = vector.load %arg5[%c0_3, %c0_4] : memref<1x256xf32, #tpu.memory_space<vmem>>, vector<1x256xf32>
    %11 = vector.broadcast %10 : vector<1x256xf32> to vector<112x256xf32>
    %12 = arith.addf %9, %11 : vector<112x256xf32>
    %cst_5 = arith.constant 0.000000e+00 : f32
    %13 = vector.broadcast %cst_5 : f32 to vector<112x256xf32>
    %14 = arith.maximumf %12, %13 : vector<112x256xf32>
    %15 = arith.truncf %14 : vector<112x256xf32> to vector<112x256xbf16>
    %cst_6 = arith.constant 0.000000e+00 : bf16
    %16 = vector.broadcast %cst_6 : bf16 to vector<16x256xbf16>
    %17 = vector.extract_strided_slice %15 {offsets = [0, 0], sizes = [96, 256], strides = [1, 1]} : vector<112x256xbf16> to vector<96x256xbf16>
    %18 = tpu.concatenate %16, %17 in 0 : vector<16x256xbf16>, vector<96x256xbf16> -> vector<112x256xbf16>
    %cst_7 = arith.constant 0.000000e+00 : bf16
    %19 = vector.broadcast %cst_7 : bf16 to vector<8x256xbf16>
    %20 = vector.extract_strided_slice %15 {offsets = [0, 0], sizes = [104, 256], strides = [1, 1]} : vector<112x256xbf16> to vector<104x256xbf16>
    %21 = tpu.concatenate %19, %20 in 0 : vector<8x256xbf16>, vector<104x256xbf16> -> vector<112x256xbf16>
    %cst_8 = arith.constant 0.000000e+00 : bf16
    %22 = vector.broadcast %cst_8 : bf16 to vector<8x256xbf16>
    %23 = vector.extract_strided_slice %15 {offsets = [8, 0], sizes = [104, 256], strides = [1, 1]} : vector<112x256xbf16> to vector<104x256xbf16>
    %24 = tpu.concatenate %23, %22 in 0 : vector<104x256xbf16>, vector<8x256xbf16> -> vector<112x256xbf16>
    %cst_9 = arith.constant 0.000000e+00 : bf16
    %25 = vector.broadcast %cst_9 : bf16 to vector<16x256xbf16>
    %26 = vector.extract_strided_slice %15 {offsets = [16, 0], sizes = [96, 256], strides = [1, 1]} : vector<112x256xbf16> to vector<96x256xbf16>
    %27 = tpu.concatenate %26, %25 in 0 : vector<96x256xbf16>, vector<16x256xbf16> -> vector<112x256xbf16>
    %c0_10 = arith.constant 0 : index
    %c0_11 = arith.constant 0 : index
    %c0_12 = arith.constant 0 : index
    %28 = vector.load %arg3[%c0_10, %c0_11, %c0_12] : memref<5x256x512xbf16, #tpu.memory_space<vmem>>, vector<1x256x512xbf16>
    %29 = vector.shape_cast %28 : vector<1x256x512xbf16> to vector<256x512xbf16>
    %cst_13 = arith.constant dense<0.000000e+00> : vector<112x512xf32>
    %30 = tpu.matmul %18, %29, %cst_13 {dimension_numbers = #tpu.dot_dimension_numbers<[1], [0], [0], [1], [0, 0, 1, 1], [], []>} : vector<112x256xbf16>, vector<256x512xbf16>, vector<112x512xf32> -> vector<112x512xf32>
    %c1 = arith.constant 1 : index
    %c0_14 = arith.constant 0 : index
    %c0_15 = arith.constant 0 : index
    %31 = vector.load %arg3[%c1, %c0_14, %c0_15] : memref<5x256x512xbf16, #tpu.memory_space<vmem>>, vector<1x256x512xbf16>
    %32 = vector.shape_cast %31 : vector<1x256x512xbf16> to vector<256x512xbf16>
    %cst_16 = arith.constant dense<0.000000e+00> : vector<112x512xf32>
    %33 = tpu.matmul %21, %32, %cst_16 {dimension_numbers = #tpu.dot_dimension_numbers<[1], [0], [0], [1], [0, 0, 1, 1], [], []>} : vector<112x256xbf16>, vector<256x512xbf16>, vector<112x512xf32> -> vector<112x512xf32>
    %34 = arith.addf %30, %33 : vector<112x512xf32>
    %c2 = arith.constant 2 : index
    %c0_17 = arith.constant 0 : index
    %c0_18 = arith.constant 0 : index
    %35 = vector.load %arg3[%c2, %c0_17, %c0_18] : memref<5x256x512xbf16, #tpu.memory_space<vmem>>, vector<1x256x512xbf16>
    %36 = vector.shape_cast %35 : vector<1x256x512xbf16> to vector<256x512xbf16>
    %cst_19 = arith.constant dense<0.000000e+00> : vector<112x512xf32>
    %37 = tpu.matmul %15, %36, %cst_19 {dimension_numbers = #tpu.dot_dimension_numbers<[1], [0], [0], [1], [0, 0, 1, 1], [], []>} : vector<112x256xbf16>, vector<256x512xbf16>, vector<112x512xf32> -> vector<112x512xf32>
    %38 = arith.addf %34, %37 : vector<112x512xf32>
    %c3 = arith.constant 3 : index
    %c0_20 = arith.constant 0 : index
    %c0_21 = arith.constant 0 : index
    %39 = vector.load %arg3[%c3, %c0_20, %c0_21] : memref<5x256x512xbf16, #tpu.memory_space<vmem>>, vector<1x256x512xbf16>
    %40 = vector.shape_cast %39 : vector<1x256x512xbf16> to vector<256x512xbf16>
    %cst_22 = arith.constant dense<0.000000e+00> : vector<112x512xf32>
    %41 = tpu.matmul %24, %40, %cst_22 {dimension_numbers = #tpu.dot_dimension_numbers<[1], [0], [0], [1], [0, 0, 1, 1], [], []>} : vector<112x256xbf16>, vector<256x512xbf16>, vector<112x512xf32> -> vector<112x512xf32>
    %42 = arith.addf %38, %41 : vector<112x512xf32>
    %c4 = arith.constant 4 : index
    %c0_23 = arith.constant 0 : index
    %c0_24 = arith.constant 0 : index
    %43 = vector.load %arg3[%c4, %c0_23, %c0_24] : memref<5x256x512xbf16, #tpu.memory_space<vmem>>, vector<1x256x512xbf16>
    %44 = vector.shape_cast %43 : vector<1x256x512xbf16> to vector<256x512xbf16>
    %cst_25 = arith.constant dense<0.000000e+00> : vector<112x512xf32>
    %45 = tpu.matmul %27, %44, %cst_25 {dimension_numbers = #tpu.dot_dimension_numbers<[1], [0], [0], [1], [0, 0, 1, 1], [], []>} : vector<112x256xbf16>, vector<256x512xbf16>, vector<112x512xf32> -> vector<112x512xf32>
    %46 = arith.addf %42, %45 : vector<112x512xf32>
    %47 = vector.extract_strided_slice %46 {offsets = [0, 0], sizes = [112, 256], strides = [1, 1]} : vector<112x512xf32> to vector<112x256xf32>
    %48 = vector.extract_strided_slice %46 {offsets = [0, 256], sizes = [112, 256], strides = [1, 1]} : vector<112x512xf32> to vector<112x256xf32>
    %49 = arith.maximumf %47, %48 : vector<112x256xf32>
    %c0_26 = arith.constant 0 : index
    %c0_27 = arith.constant 0 : index
    %50 = vector.load %arg6[%c0_26, %c0_27] : memref<1x256xf32, #tpu.memory_space<vmem>>, vector<1x256xf32>
    %51 = vector.broadcast %50 : vector<1x256xf32> to vector<112x256xf32>
    %52 = arith.addf %49, %51 : vector<112x256xf32>
    %cst_28 = arith.constant 0.000000e+00 : f32
    %53 = vector.broadcast %cst_28 : f32 to vector<112x256xf32>
    %54 = arith.maximumf %52, %53 : vector<112x256xf32>
    %55 = vector.shape_cast %54 : vector<112x256xf32> to vector<7x16x256xf32>
    %56 = vector.extract_strided_slice %55 {offsets = [0, 0, 0], sizes = [7, 8, 256], strides = [1, 1, 1]} : vector<7x16x256xf32> to vector<7x8x256xf32>
    %57 = vector.extract_strided_slice %55 {offsets = [0, 8, 0], sizes = [7, 8, 256], strides = [1, 1, 1]} : vector<7x16x256xf32> to vector<7x8x256xf32>
    %58 = arith.maximumf %56, %57 : vector<7x8x256xf32>
    %59 = arith.truncf %58 : vector<7x8x256xf32> to vector<7x8x256xbf16>
    %cst_29 = arith.constant 0.000000e+00 : f32
    %60 = vector.broadcast %cst_29 : f32 to vector<8x10xf32>
    %c0_30 = arith.constant 0 : index
    %c0_31 = arith.constant 0 : index
    %61 = vector.load %arg7[%c0_30, %c0_31] : memref<1x10xf32, #tpu.memory_space<vmem>>, vector<1x10xf32>
    %62 = vector.broadcast %61 : vector<1x10xf32> to vector<8x10xf32>
    %63 = arith.addf %60, %62 : vector<8x10xf32>
    %64 = vector.extract_strided_slice %59 {offsets = [0, 0, 0], sizes = [1, 8, 256], strides = [1, 1, 1]} : vector<7x8x256xbf16> to vector<1x8x256xbf16>
    %65 = vector.shape_cast %64 : vector<1x8x256xbf16> to vector<8x256xbf16>
    %c0_32 = arith.constant 0 : index
    %c0_33 = arith.constant 0 : index
    %c0_34 = arith.constant 0 : index
    %66 = vector.load %arg4[%c0_32, %c0_33, %c0_34] : memref<7x256x10xbf16, #tpu.memory_space<vmem>>, vector<1x256x10xbf16>
    %67 = vector.shape_cast %66 : vector<1x256x10xbf16> to vector<256x10xbf16>
    %cst_35 = arith.constant dense<0.000000e+00> : vector<8x10xf32>
    %68 = tpu.matmul %65, %67, %cst_35 {dimension_numbers = #tpu.dot_dimension_numbers<[1], [0], [0], [1], [0, 0, 1, 1], [], []>} : vector<8x256xbf16>, vector<256x10xbf16>, vector<8x10xf32> -> vector<8x10xf32>
    %69 = arith.addf %63, %68 : vector<8x10xf32>
    %70 = vector.extract_strided_slice %59 {offsets = [1, 0, 0], sizes = [1, 8, 256], strides = [1, 1, 1]} : vector<7x8x256xbf16> to vector<1x8x256xbf16>
    %71 = vector.shape_cast %70 : vector<1x8x256xbf16> to vector<8x256xbf16>
    %c1_36 = arith.constant 1 : index
    %c0_37 = arith.constant 0 : index
    %c0_38 = arith.constant 0 : index
    %72 = vector.load %arg4[%c1_36, %c0_37, %c0_38] : memref<7x256x10xbf16, #tpu.memory_space<vmem>>, vector<1x256x10xbf16>
    %73 = vector.shape_cast %72 : vector<1x256x10xbf16> to vector<256x10xbf16>
    %cst_39 = arith.constant dense<0.000000e+00> : vector<8x10xf32>
    %74 = tpu.matmul %71, %73, %cst_39 {dimension_numbers = #tpu.dot_dimension_numbers<[1], [0], [0], [1], [0, 0, 1, 1], [], []>} : vector<8x256xbf16>, vector<256x10xbf16>, vector<8x10xf32> -> vector<8x10xf32>
    %75 = arith.addf %69, %74 : vector<8x10xf32>
    %76 = vector.extract_strided_slice %59 {offsets = [2, 0, 0], sizes = [1, 8, 256], strides = [1, 1, 1]} : vector<7x8x256xbf16> to vector<1x8x256xbf16>
    %77 = vector.shape_cast %76 : vector<1x8x256xbf16> to vector<8x256xbf16>
    %c2_40 = arith.constant 2 : index
    %c0_41 = arith.constant 0 : index
    %c0_42 = arith.constant 0 : index
    %78 = vector.load %arg4[%c2_40, %c0_41, %c0_42] : memref<7x256x10xbf16, #tpu.memory_space<vmem>>, vector<1x256x10xbf16>
    %79 = vector.shape_cast %78 : vector<1x256x10xbf16> to vector<256x10xbf16>
    %cst_43 = arith.constant dense<0.000000e+00> : vector<8x10xf32>
    %80 = tpu.matmul %77, %79, %cst_43 {dimension_numbers = #tpu.dot_dimension_numbers<[1], [0], [0], [1], [0, 0, 1, 1], [], []>} : vector<8x256xbf16>, vector<256x10xbf16>, vector<8x10xf32> -> vector<8x10xf32>
    %81 = arith.addf %75, %80 : vector<8x10xf32>
    %82 = vector.extract_strided_slice %59 {offsets = [3, 0, 0], sizes = [1, 8, 256], strides = [1, 1, 1]} : vector<7x8x256xbf16> to vector<1x8x256xbf16>
    %83 = vector.shape_cast %82 : vector<1x8x256xbf16> to vector<8x256xbf16>
    %c3_44 = arith.constant 3 : index
    %c0_45 = arith.constant 0 : index
    %c0_46 = arith.constant 0 : index
    %84 = vector.load %arg4[%c3_44, %c0_45, %c0_46] : memref<7x256x10xbf16, #tpu.memory_space<vmem>>, vector<1x256x10xbf16>
    %85 = vector.shape_cast %84 : vector<1x256x10xbf16> to vector<256x10xbf16>
    %cst_47 = arith.constant dense<0.000000e+00> : vector<8x10xf32>
    %86 = tpu.matmul %83, %85, %cst_47 {dimension_numbers = #tpu.dot_dimension_numbers<[1], [0], [0], [1], [0, 0, 1, 1], [], []>} : vector<8x256xbf16>, vector<256x10xbf16>, vector<8x10xf32> -> vector<8x10xf32>
    %87 = arith.addf %81, %86 : vector<8x10xf32>
    %88 = vector.extract_strided_slice %59 {offsets = [4, 0, 0], sizes = [1, 8, 256], strides = [1, 1, 1]} : vector<7x8x256xbf16> to vector<1x8x256xbf16>
    %89 = vector.shape_cast %88 : vector<1x8x256xbf16> to vector<8x256xbf16>
    %c4_48 = arith.constant 4 : index
    %c0_49 = arith.constant 0 : index
    %c0_50 = arith.constant 0 : index
    %90 = vector.load %arg4[%c4_48, %c0_49, %c0_50] : memref<7x256x10xbf16, #tpu.memory_space<vmem>>, vector<1x256x10xbf16>
    %91 = vector.shape_cast %90 : vector<1x256x10xbf16> to vector<256x10xbf16>
    %cst_51 = arith.constant dense<0.000000e+00> : vector<8x10xf32>
    %92 = tpu.matmul %89, %91, %cst_51 {dimension_numbers = #tpu.dot_dimension_numbers<[1], [0], [0], [1], [0, 0, 1, 1], [], []>} : vector<8x256xbf16>, vector<256x10xbf16>, vector<8x10xf32> -> vector<8x10xf32>
    %93 = arith.addf %87, %92 : vector<8x10xf32>
    %94 = vector.extract_strided_slice %59 {offsets = [5, 0, 0], sizes = [1, 8, 256], strides = [1, 1, 1]} : vector<7x8x256xbf16> to vector<1x8x256xbf16>
    %95 = vector.shape_cast %94 : vector<1x8x256xbf16> to vector<8x256xbf16>
    %c5 = arith.constant 5 : index
    %c0_52 = arith.constant 0 : index
    %c0_53 = arith.constant 0 : index
    %96 = vector.load %arg4[%c5, %c0_52, %c0_53] : memref<7x256x10xbf16, #tpu.memory_space<vmem>>, vector<1x256x10xbf16>
    %97 = vector.shape_cast %96 : vector<1x256x10xbf16> to vector<256x10xbf16>
    %cst_54 = arith.constant dense<0.000000e+00> : vector<8x10xf32>
    %98 = tpu.matmul %95, %97, %cst_54 {dimension_numbers = #tpu.dot_dimension_numbers<[1], [0], [0], [1], [0, 0, 1, 1], [], []>} : vector<8x256xbf16>, vector<256x10xbf16>, vector<8x10xf32> -> vector<8x10xf32>
    %99 = arith.addf %93, %98 : vector<8x10xf32>
    %100 = vector.extract_strided_slice %59 {offsets = [6, 0, 0], sizes = [1, 8, 256], strides = [1, 1, 1]} : vector<7x8x256xbf16> to vector<1x8x256xbf16>
    %101 = vector.shape_cast %100 : vector<1x8x256xbf16> to vector<8x256xbf16>
    %c6 = arith.constant 6 : index
    %c0_55 = arith.constant 0 : index
    %c0_56 = arith.constant 0 : index
    %102 = vector.load %arg4[%c6, %c0_55, %c0_56] : memref<7x256x10xbf16, #tpu.memory_space<vmem>>, vector<1x256x10xbf16>
    %103 = vector.shape_cast %102 : vector<1x256x10xbf16> to vector<256x10xbf16>
    %cst_57 = arith.constant dense<0.000000e+00> : vector<8x10xf32>
    %104 = tpu.matmul %101, %103, %cst_57 {dimension_numbers = #tpu.dot_dimension_numbers<[1], [0], [0], [1], [0, 0, 1, 1], [], []>} : vector<8x256xbf16>, vector<256x10xbf16>, vector<8x10xf32> -> vector<8x10xf32>
    %105 = arith.addf %99, %104 : vector<8x10xf32>
    %c0_58 = arith.constant 0 : index
    %c0_59 = arith.constant 0 : index
    %106 = vector.load %arg8[%c0_58, %c0_59] : memref<8x10xf32, #tpu.memory_space<vmem>>, vector<8x10xf32>
    tpu.vector_store %arg8[%c0_58, %c0_59], %105 {strides = array<i32>} : memref<8x10xf32, #tpu.memory_space<vmem>>, vector<8x10xf32>,
    return
  }
  func.func @transform_0(%arg0: i32) -> (i32, i32) {
    %c0_i32 = arith.constant 0 : i32
    %c0_i32_0 = arith.constant 0 : i32
    return %arg0, %c0_i32 : i32, i32
  }
  func.func @transform_1(%arg0: i32) -> (i32, i32) {
    %c0_i32 = arith.constant 0 : i32
    %c0_i32_0 = arith.constant 0 : i32
    %c0_i32_1 = arith.constant 0 : i32
    return %c0_i32, %c0_i32_0 : i32, i32
  }
  func.func @transform_2(%arg0: i32) -> (i32, i32, i32) {
    %c0_i32 = arith.constant 0 : i32
    %c0_i32_0 = arith.constant 0 : i32
    %c0_i32_1 = arith.constant 0 : i32
    %c0_i32_2 = arith.constant 0 : i32
    return %c0_i32, %c0_i32_0, %c0_i32_1 : i32, i32, i32
  }
  func.func @transform_3(%arg0: i32) -> (i32, i32, i32) {
    %c0_i32 = arith.constant 0 : i32
    %c0_i32_0 = arith.constant 0 : i32
    %c0_i32_1 = arith.constant 0 : i32
    %c0_i32_2 = arith.constant 0 : i32
    return %c0_i32, %c0_i32_0, %c0_i32_1 : i32, i32, i32
  }
  func.func @transform_4(%arg0: i32) -> (i32, i32) {
    %c0_i32 = arith.constant 0 : i32
    %c0_i32_0 = arith.constant 0 : i32
    %c0_i32_1 = arith.constant 0 : i32
    return %c0_i32, %c0_i32_0 : i32, i32
  }
  func.func @transform_5(%arg0: i32) -> (i32, i32) {
    %c0_i32 = arith.constant 0 : i32
    %c0_i32_0 = arith.constant 0 : i32
    %c0_i32_1 = arith.constant 0 : i32
    return %c0_i32, %c0_i32_0 : i32, i32
  }
  func.func @transform_6(%arg0: i32) -> (i32, i32) {
    %c0_i32 = arith.constant 0 : i32
    %c0_i32_0 = arith.constant 0 : i32
    %c0_i32_1 = arith.constant 0 : i32
    return %c0_i32, %c0_i32_0 : i32, i32
  }
  func.func @transform_7(%arg0: i32) -> (i32, i32) {
    %c0_i32 = arith.constant 0 : i32
    %c0_i32_0 = arith.constant 0 : i32
    return %arg0, %c0_i32 : i32, i32
  }
}

</mosaic_0001>

<bundles_post_ra>
// kernel: tile.13
= control target key start
LH: loop header
LB: loop body
LE: loop exit
PB: predicated region body
PF: predicated region fallthrough
CT: control target
= control target key end

     0   :  { %s28_s0 = inlined_call_operand.vmem [shape: f32[16], index: 0, kind: input, shape index: {}]   ;;  %s29_s1 = inlined_call_operand.vmem [shape: f32[14,16], index: 1, kind: output, shape index: {}]  }
   0x1   :  { %v4_v0 = vld [vmem:[%s28_s0] ss:$0 sm:$0xff] }
   0x2   :  { %5 = vst [vmem:[%s29_s1] sm:$0xff] %v4_v0  ;;  %8 = vst [vmem:[%s29_s1 + $0x8] sm:$0xff] %v4_v0 }

// kernel: tile.14
= control target key start
LH: loop header
LB: loop body
LE: loop exit
PB: predicated region body
PF: predicated region fallthrough
CT: control target
= control target key end

     0   :  { %s19_s8 = smov 3  ;;  %s73_s9 = smov 112   ;;  %vm4_vm0 = vcmask 130048   ;;  %vm10_vm1 = vcmask 1048448   ;;  %vm16_vm2 = vcmask 917248   ;;  %vm23_vm3 = vcmask 786048   ;;  %s117_s0 = inlined_call_operand.vmem [shape: f32[14,16], index: 0, kind: input, shape index: {}]   ;;  %s118_s1 = inlined_call_operand.vmem [shape: f32[224], index: 1, kind: output, shape index: {}]  }
   0x1   :  { %v59_v0 = vld [vmem:[%s117_s0 + $0x7] sm:$0x1]   ;;  %v61_v1 = vld [vmem:[%s117_s0 + $0x5] ss:$8 sm:%s19_s8]   ;;  %s74_s12 = smov 80   ;;  %s26_s15 = smov 3 }
   0x2   :  { %8 = vrot.lane.b32.xlu0 %v59_v0, %s73_s9  ;;  %21 = vrot.lane.b32.xlu1 %v61_v1, %s74_s12  ;;  %v60_v2 = vld [vmem:[%s117_s0 + $0x6] sm:$0x1]   ;;  %s33_s18 = smov 3  ;;  %s40_s19 = smov 3  ;;  %vm30_vm4 = vcmask 654848   ;;  %vm37_vm5 = vcmask 523648  }
   0x3   :  { %v62_v3 = vld [vmem:[%s117_s0 + $0x4] ss:$8 sm:%s26_s15]   ;;  %s75_s20 = smov 96   ;;  %s76_s21 = smov 64   ;;  %v63_v4 = vld [vmem:[%s117_s0 + $0x3] ss:$8 sm:%s33_s18]  }
   0x4   :  { %s2_s24 = smov 3  ;;  %v64_v5 = vld [vmem:[%s117_s0 + $0x2] ss:$8 sm:%s40_s19]   ;;  %s47_s27 = smov 3  ;;  %vm44_vm6 = vcmask 392448   ;;  %vm51_vm7 = vcmask 261248  }
   0x5   :  { %v3_v6 = vld [vmem:[%s117_s0] ss:$8 sm:%s2_s24]   ;;  %s77_s30 = smov 48   ;;  %s78_s2 = smov 32   ;;  %v65_v7 = vld [vmem:[%s117_s0 + $0x1] ss:$8 sm:%s47_s27]  }
   0x6   :  { %14 = vrot.lane.b32.xlu0 %v60_v2, %s75_s20  ;;  %28 = vrot.lane.b32.xlu1 %v62_v3, %s76_s21  ;;  %5 = vst.msk [vmem:[#allocation0] sm:$0x3] %vm4_vm0, %v3_v6   ;;  %s79_s0 = smov 16  }
   0xa   :  { %35 = vrot.lane.b32.xlu0 %v63_v4, %s77_s30  ;;  %42 = vrot.lane.b32.xlu1 %v64_v5, %s78_s2 }
   0xe   :  { %49 = vrot.lane.b32.xlu0 %v65_v7, %s79_s0 }
  0x74   :  { %v9_v8 = vpop.permute.xlu0 %8   ;;  %v22_v9 = vpop.permute.xlu1 %21  }
  0x75   :  { %11 = vst.msk [vmem:[#allocation0] sm:$0x1] %vm10_vm1, %v9_v8  }
  0x78   :  { %v15_v10 = vpop.permute.xlu0 %14   ;;  %v29_v11 = vpop.permute.xlu1 %28  }
  0x79   :  { %17 = vst.msk [vmem:[#allocation0] sm:$0x1] %vm16_vm2, %v15_v10  }
  0x7a   :  { %24 = vst.msk [vmem:[#allocation0] sm:$0x3] %vm23_vm3, %v22_v9  }
  0x7b   :  { %31 = vst.msk [vmem:[#allocation0] sm:$0x3] %vm30_vm4, %v29_v11  }
  0x7c   :  { %v36_v12 = vpop.permute.xlu0 %35   ;;  %v43_v13 = vpop.permute.xlu1 %42  }
  0x7d   :  { %38 = vst.msk [vmem:[#allocation0] sm:$0x3] %vm37_vm5, %v36_v12  }
  0x7e   :  { %45 = vst.msk [vmem:[#allocation0] sm:$0x3] %vm44_vm6, %v43_v13  }
  0x80   :  { %v50_v14 = vpop.permute.xlu0 %49  }
  0x81   :  { %52 = vst.msk [vmem:[#allocation0] sm:$0x3] %vm51_vm7, %v50_v14  }
  0x88   :  { %v56_v15 = vld [vmem:[#allocation0] sm:$0x3] }
  0x89   :  { %58 = vst [vmem:[%s118_s1] sm:$0x3] %v56_v15 }

// kernel: tile.18
= control target key start
LH: loop header
LB: loop body
LE: loop exit
PB: predicated region body
PF: predicated region fallthrough
CT: control target
= control target key end

     0   :  { %s22_s0 = inlined_call_operand.vmem [shape: f32[32], index: 0, kind: input, shape index: {}]   ;;  %s23_s1 = inlined_call_operand.vmem [shape: f32[7,32], index: 1, kind: output, shape index: {}]  }
   0x1   :  { %v4_v0 = vld [vmem:[%s22_s0] ss:$0 sm:$0xff] }
   0x2   :  { %5 = vst [vmem:[%s23_s1] sm:$0xff] %v4_v0 }

// kernel: tile.19
= control target key start
LH: loop header
LB: loop body
LE: loop exit
PB: predicated region body
PF: predicated region fallthrough
CT: control target
= control target key end

     0   :  { %s13_s8 = smov 3  ;;  %s38_s9 = smov 96   ;;  %vm4_vm0 = vcmask 261120   ;;  %vm10_vm1 = vcmask 1048320   ;;  %vm17_vm2 = vcmask 785920   ;;  %vm24_vm3 = vcmask 523520   ;;  %s66_s0 = inlined_call_operand.vmem [shape: f32[7,32], index: 0, kind: input, shape index: {}]   ;;  %s67_s1 = inlined_call_operand.vmem [shape: f32[224], index: 1, kind: output, shape index: {}]  }
   0x1   :  { %v32_v0 = vld [vmem:[%s66_s0 + $0x3] sm:$0x1]   ;;  %s20_s10 = smov 3  ;;  %v33_v1 = vld [vmem:[%s66_s0 + $0x2] ss:$4 sm:%s13_s8]   ;;  %s2_s15 = smov 3 }
   0x2   :  { %8 = vrot.lane.b32.xlu0 %v32_v0, %s38_s9  ;;  %v34_v2 = vld [vmem:[%s66_s0 + $0x1] ss:$4 sm:%s20_s10]   ;;  %s39_s16 = smov 32  }
   0x3   :  { %22 = vrot.lane.b32.xlu1 %v34_v2, %s39_s16  ;;  %v3_v3 = vld [vmem:[%s66_s0] ss:$4 sm:%s2_s15]   ;;  %s40_s0 = smov 64  }
   0x4   :  { %5 = vst.msk [vmem:[#allocation0] sm:$0x3] %vm4_vm0, %v3_v3  }
   0x6   :  { %15 = vrot.lane.b32.xlu0 %v33_v1, %s40_s0 }
  0x74   :  { %v9_v4 = vpop.permute.xlu0 %8  }
  0x75   :  { %11 = vst.msk [vmem:[#allocation0] sm:$0x1] %vm10_vm1, %v9_v4   ;;  %v23_v5 = vpop.permute.xlu1 %22  }
  0x78   :  { %v16_v6 = vpop.permute.xlu0 %15  }
  0x79   :  { %18 = vst.msk [vmem:[#allocation0] sm:$0x3] %vm17_vm2, %v16_v6  }
  0x7a   :  { %25 = vst.msk [vmem:[#allocation0] sm:$0x3] %vm24_vm3, %v23_v5  }
  0x81   :  { %v29_v7 = vld [vmem:[#allocation0] sm:$0x3] }
  0x82   :  { %31 = vst [vmem:[%s67_s1] sm:$0x3] %v29_v7 }

// kernel: cnn_forward.1
= control target key start
LH: loop header
LB: loop body
LE: loop exit
PB: predicated region body
PF: predicated region fallthrough
CT: control target
= control target key end

     0   :  { %vm680_vm0 = vcmask 523264   ;;  %vm1294_vm1 = vcmask 1043456   ;;  %vm5790_vm3 = vcmask 80896   ;;  %s10210_s1 = inlined_call_operand.vmem [shape: bf16[192,1024], index: 1, kind: input, shape index: {}]   ;;  %s10211_s0 = inlined_call_operand.vmem [shape: bf16[112,192], index: 0, kind: input, shape index: {}]   ;;  %s10212_s2 = inlined_call_operand.vmem [shape: bf16[5,256,512], index: 2, kind: input, shape index: {}]   ;;  %s10213_s4 = inlined_call_operand.vmem [shape: f32[1,256], index: 4, kind: input, shape index: {}]   ;;  %s10214_s3 = inlined_call_operand.vmem [shape: bf16[7,256,10], index: 3, kind: input, shape index: {}]   ;;  %s10215_s5 = inlined_call_operand.vmem [shape: f32[1,256], index: 5, kind: input, shape index: {}]   ;;  %s10216_s6 = inlined_call_operand.vmem [shape: f32[1,10], index: 6, kind: input, shape index: {}]   ;;  %s10217_s7 = inlined_call_operand.vmem [shape: f32[8,10], index: 7, kind: output, shape index: {}]  }
   0x1   :  { %v41_v0 = vld [vmem:[%s10210_s1] sm:$0xff]  ;;  %v42_v2 = vld [vmem:[%s10210_s1 + $0x8] sm:$0xff]  ;;  %vm8708_vm2 = vmneg %vm1294_vm1 }
   0x2   :  { %v45_v1 = vld [vmem:[%s10210_s1 + $0x20] sm:$0xff]  ;;  %v46_v4 = vld [vmem:[%s10210_s1 + $0x28] sm:$0xff] }
   0x3   :  { %v5811_v3 = vcombine.high %v41_v0, %v45_v1  ;;  %v5810_v5 = vcombine.low %v41_v0, %v45_v1  ;;  %v49_v6 = vld [vmem:[%s10210_s1 + $0x40] sm:$0xff]  ;;  %v5813_v8 = vcombine.high %v42_v2, %v46_v4  ;;  %v5812_v9 = vcombine.low %v42_v2, %v46_v4  ;;  %v50_v11 = vld [vmem:[%s10210_s1 + $0x48] sm:$0xff] }
   0x4   :  { %v53_v7 = vld [vmem:[%s10210_s1 + $0x60] sm:$0xff]  ;;  %v54_v12 = vld [vmem:[%s10210_s1 + $0x68] sm:$0xff] }
   0x5   :  { %v5819_v10 = vcombine.high %v49_v6, %v53_v7  ;;  %v57_v13 = vld [vmem:[%s10210_s1 + $0x80] sm:$0xff]  ;;  %702 = vmatprep.subr.bf16.mxu0 %v5811_v3  ;;  %v5821_v14 = vcombine.high %v50_v11, %v54_v12  ;;  %v58_v16 = vld [vmem:[%s10210_s1 + $0x88] sm:$0xff]  ;;  %805 = vmatprep.subr.bf16.mxu1 %v5813_v8  ;;  %v5818_v18 = vcombine.low %v49_v6, %v53_v7 }
   0x6   :  { %v61_v15 = vld [vmem:[%s10210_s1 + $0xa0] sm:$0xff]  ;;  %v62_v17 = vld [vmem:[%s10210_s1 + $0xa8] sm:$0xff]  ;;  %703 = vmatpush1.bf16.msra.mxu0 %v5810_v5  ;;  %806 = vmatpush1.bf16.msra.mxu1 %v5812_v9  ;;  %v5820_v19 = vcombine.low %v50_v11, %v54_v12 }
   0x7   :  { %704 = vmatprep.subr.bf16.mxu0 %v5819_v10  ;;  %v5827_v20 = vcombine.high %v57_v13, %v61_v15  ;;  %807 = vmatprep.subr.bf16.mxu1 %v5821_v14  ;;  %v5829_v21 = vcombine.high %v58_v16, %v62_v17  ;;  %v65_v22 = vld [vmem:[%s10210_s1 + $0xc0] sm:$0xff]  ;;  %v66_v24 = vld [vmem:[%s10210_s1 + $0xc8] sm:$0xff]  ;;  %v5826_v26 = vcombine.low %v57_v13, %v61_v15 }
   0x8   :  { %v69_v23 = vld [vmem:[%s10210_s1 + $0xe0] sm:$0xff]  ;;  %v70_v25 = vld [vmem:[%s10210_s1 + $0xe8] sm:$0xff]  ;;  %v5828_v27 = vcombine.low %v58_v16, %v62_v17 }
   0x9   :  { %v5835_v28 = vcombine.high %v65_v22, %v69_v23  ;;  %v5837_v29 = vcombine.high %v66_v24, %v70_v25  ;;  %v73_v30 = vld [vmem:[%s10210_s1 + $0x100] sm:$0xff]  ;;  %v74_v32 = vld [vmem:[%s10210_s1 + $0x108] sm:$0xff]  ;;  %v5834_v34 = vcombine.low %v65_v22, %v69_v23  ;;  %v5836_v35 = vcombine.low %v66_v24, %v70_v25 }
   0xa   :  { %705 = vmatpush1.bf16.msra.mxu0 %v5818_v18  ;;  %808 = vmatpush1.bf16.msra.mxu1 %v5820_v19  ;;  %v77_v31 = vld [vmem:[%s10210_s1 + $0x120] sm:$0xff]  ;;  %v78_v33 = vld [vmem:[%s10210_s1 + $0x128] sm:$0xff] }
   0xb   :  { %706 = vmatprep.subr.bf16.mxu0 %v5827_v20  ;;  %809 = vmatprep.subr.bf16.mxu1 %v5829_v21  ;;  %v5843_v36 = vcombine.high %v73_v30, %v77_v31  ;;  %v5845_v37 = vcombine.high %v74_v32, %v78_v33  ;;  %v81_v38 = vld [vmem:[%s10210_s1 + $0x140] sm:$0xff]  ;;  %v82_v40 = vld [vmem:[%s10210_s1 + $0x148] sm:$0xff]  ;;  %v5842_v42 = vcombine.low %v73_v30, %v77_v31  ;;  %v43_v31 = vld [vmem:[%s10210_s1 + $0x10] sm:$0xff] }
   0xc   :  { %v85_v39 = vld [vmem:[%s10210_s1 + $0x160] sm:$0xff]  ;;  %v86_v41 = vld [vmem:[%s10210_s1 + $0x168] sm:$0xff]  ;;  %v5844_v44 = vcombine.low %v74_v32, %v78_v33  ;;  %v47_v32 = vld [vmem:[%s10210_s1 + $0x30] sm:$0xff] }
   0xd   :  { %v7935_v43 = vld [vmem:[%s10211_s0 + $0x4] ss:$8 sps:$4 sm:$0xff]   ;;  %v5851_v45 = vcombine.high %v81_v38, %v85_v39  ;;  %v5853_v46 = vcombine.high %v82_v40, %v86_v41  ;;  %v5850_v51 = vcombine.low %v81_v38, %v85_v39  ;;  %v5852_v52 = vcombine.low %v82_v40, %v86_v41  ;;  %v44_v33 = vld [vmem:[%s10210_s1 + $0x18] sm:$0xff]  ;;  %v51_v39 = vld [vmem:[%s10210_s1 + $0x50] sm:$0xff] }
   0xe   :  { %707 = vmatpush1.bf16.msra.mxu0 %v5826_v26  ;;  %810 = vmatpush1.bf16.msra.mxu1 %v5828_v27  ;;  %v89_v47 = vld [vmem:[%s10210_s1 + $0x180] sm:$0xff]  ;;  %v90_v49 = vld [vmem:[%s10210_s1 + $0x188] sm:$0xff]  ;;  %v55_v40 = vld [vmem:[%s10210_s1 + $0x70] sm:$0xff] }
   0xf   :  { %708 = vmatprep.subr.bf16.mxu0 %v5835_v28  ;;  %811 = vmatprep.subr.bf16.mxu1 %v5837_v29  ;;  %v93_v48 = vld [vmem:[%s10210_s1 + $0x1a0] sm:$0xff]  ;;  %v94_v50 = vld [vmem:[%s10210_s1 + $0x1a8] sm:$0xff] }
  0x10   :  { %5906 = vmatprep.mubr.msk.bf16.mxu0 %vm680_vm0, %v7935_v43  ;;  %5913 = vmatprep.mubr.msk.bf16.mxu1 %vm680_vm0, %v7935_v43  ;;  %v5859_v53 = vcombine.high %v89_v47, %v93_v48  ;;  %v5861_v54 = vcombine.high %v90_v49, %v94_v50  ;;  %v97_v55 = vld [vmem:[%s10210_s1 + $0x1c0] sm:$0xff]  ;;  %v98_v57 = vld [vmem:[%s10210_s1 + $0x1c8] sm:$0xff]  ;;  %v5858_v59 = vcombine.low %v89_v47, %v93_v48 }
  0x11   :  { %v101_v56 = vld [vmem:[%s10210_s1 + $0x1e0] sm:$0xff]  ;;  %v102_v58 = vld [vmem:[%s10210_s1 + $0x1e8] sm:$0xff]  ;;  %v5860_v60 = vcombine.low %v90_v49, %v94_v50  ;;  %v5823_v47 = vcombine.high %v51_v39, %v55_v40  ;;  %v8045_v49 = vld [vmem:[%s10211_s0 + $0x14] ss:$8 sps:$4 sm:$0xff]  }
  0x12   :  { %709 = vmatpush1.bf16.msra.mxu0 %v5834_v34  ;;  %812 = vmatpush1.bf16.msra.mxu1 %v5836_v35  ;;  %v5867_v61 = vcombine.high %v97_v55, %v101_v56  ;;  %v5869_v62 = vcombine.high %v98_v57, %v102_v58  ;;  %v105_v63 = vld [vmem:[%s10210_s1 + $0x200] sm:$0xff]  ;;  %v106_v1 = vld [vmem:[%s10210_s1 + $0x208] sm:$0xff]  ;;  %v5866_v3 = vcombine.low %v97_v55, %v101_v56  ;;  %v48_v34 = vld [vmem:[%s10210_s1 + $0x38] sm:$0xff] }
  0x13   :  { %710 = vmatprep.subr.bf16.mxu0 %v5843_v36  ;;  %813 = vmatprep.subr.bf16.mxu1 %v5845_v37  ;;  %v109_v0 = vld [vmem:[%s10210_s1 + $0x220] sm:$0xff]  ;;  %v110_v2 = vld [vmem:[%s10210_s1 + $0x228] sm:$0xff]  ;;  %v5868_v4 = vcombine.low %v98_v57, %v102_v58  ;;  %v5815_v37 = vcombine.high %v43_v31, %v47_v32  ;;  %v5817_v38 = vcombine.high %v44_v33, %v48_v34  ;;  %v59_v50 = vld [vmem:[%s10210_s1 + $0x90] sm:$0xff] }
  0x14   :  { %v5875_v5 = vcombine.high %v105_v63, %v109_v0  ;;  %v5877_v6 = vcombine.high %v106_v1, %v110_v2  ;;  %v113_v7 = vld [vmem:[%s10210_s1 + $0x240] sm:$0xff]  ;;  %v114_v9 = vld [vmem:[%s10210_s1 + $0x248] sm:$0xff]  ;;  %v5874_v11 = vcombine.low %v105_v63, %v109_v0  ;;  %v5876_v12 = vcombine.low %v106_v1, %v110_v2  ;;  %v67_v58 = vld [vmem:[%s10210_s1 + $0xd0] sm:$0xff] }
  0x15   :  { %v117_v8 = vld [vmem:[%s10210_s1 + $0x260] sm:$0xff]  ;;  %v118_v10 = vld [vmem:[%s10210_s1 + $0x268] sm:$0xff] }
  0x16   :  { %711 = vmatpush1.bf16.msra.mxu0 %v5842_v42  ;;  %814 = vmatpush1.bf16.msra.mxu1 %v5844_v44  ;;  %v5883_v13 = vcombine.high %v113_v7, %v117_v8  ;;  %v5885_v14 = vcombine.high %v114_v9, %v118_v10  ;;  %v121_v15 = vld [vmem:[%s10210_s1 + $0x280] sm:$0xff]  ;;  %v122_v17 = vld [vmem:[%s10210_s1 + $0x288] sm:$0xff]  ;;  %v5882_v19 = vcombine.low %v113_v7, %v117_v8  ;;  %v52_v42 = vld [vmem:[%s10210_s1 + $0x58] sm:$0xff] }
  0x17   :  { %712 = vmatprep.subr.bf16.mxu0 %v5851_v45  ;;  %815 = vmatprep.subr.bf16.mxu1 %v5853_v46  ;;  %v125_v16 = vld [vmem:[%s10210_s1 + $0x2a0] sm:$0xff]  ;;  %v126_v18 = vld [vmem:[%s10210_s1 + $0x2a8] sm:$0xff]  ;;  %v5884_v20 = vcombine.low %v114_v9, %v118_v10  ;;  %v56_v44 = vld [vmem:[%s10210_s1 + $0x78] sm:$0xff]  ;;  %v5814_v45 = vcombine.low %v43_v31, %v47_v32  ;;  %v5816_v46 = vcombine.low %v44_v33, %v48_v34 }
  0x18   :  { %v5891_v21 = vcombine.high %v121_v15, %v125_v16  ;;  %v5893_v22 = vcombine.high %v122_v17, %v126_v18  ;;  %v129_v23 = vld [vmem:[%s10210_s1 + $0x2c0] sm:$0xff]  ;;  %v130_v25 = vld [vmem:[%s10210_s1 + $0x2c8] sm:$0xff]  ;;  %v5890_v27 = vcombine.low %v121_v15, %v125_v16  ;;  %v5892_v28 = vcombine.low %v122_v17, %v126_v18  ;;  %v80_v7 = vld [vmem:[%s10210_s1 + $0x138] sm:$0xff] }
  0x19   :  { %v133_v24 = vld [vmem:[%s10210_s1 + $0x2e0] sm:$0xff]  ;;  %v134_v26 = vld [vmem:[%s10210_s1 + $0x2e8] sm:$0xff]  ;;  %v5825_v48 = vcombine.high %v52_v42, %v56_v44  ;;  %v5824_v55 = vcombine.low %v52_v42, %v56_v44  ;;  %v84_v16 = vld [vmem:[%s10210_s1 + $0x158] sm:$0xff] }
  0x1a   :  { %713 = vmatpush1.bf16.msra.mxu0 %v5850_v51  ;;  %816 = vmatpush1.bf16.msra.mxu1 %v5852_v52  ;;  %v5899_v29 = vcombine.high %v129_v23, %v133_v24  ;;  %v5901_v30 = vcombine.high %v130_v25, %v134_v26  ;;  %v5898_v35 = vcombine.low %v129_v23, %v133_v24  ;;  %v8034_v41 = vld [vmem:[%s10211_s0] ss:$8 sps:$4 sm:$0xff]   ;;  %v63_v51 = vld [vmem:[%s10210_s1 + $0xb0] sm:$0xff]  ;;  %v60_v52 = vld [vmem:[%s10210_s1 + $0x98] sm:$0xff] }
  0x1b   :  { %714 = vmatprep.subr.bf16.mxu0 %v5859_v53  ;;  %817 = vmatprep.subr.bf16.mxu1 %v5861_v54  ;;  %v5900_v36 = vcombine.low %v130_v25, %v134_v26  ;;  %v64_v53 = vld [vmem:[%s10210_s1 + $0xb8] sm:$0xff]  ;;  %v5822_v54 = vcombine.low %v51_v39, %v55_v40  ;;  %v5831_v56 = vcombine.high %v59_v50, %v63_v51  ;;  %v99_v31 = vld [vmem:[%s10210_s1 + $0x1d0] sm:$0xff] }
  0x1c   :  { %v5833_v57 = vcombine.high %v60_v52, %v64_v53  ;;  %v5830_v63 = vcombine.low %v59_v50, %v63_v51  ;;  %v5832_v0 = vcombine.low %v60_v52, %v64_v53  ;;  %v88_v17 = vld [vmem:[%s10210_s1 + $0x178] sm:$0xff]  ;;  %v103_v32 = vld [vmem:[%s10210_s1 + $0x1f0] sm:$0xff]  ;;  %v8188_v51 = vld [vmem:[%s10211_s0 + $0x40] ss:$8 sps:$4 sm:$0xff]  }
  0x1d   :  { %v5857_v23 = vcombine.high %v84_v16, %v88_v17  ;;  %v92_v24 = vld [vmem:[%s10210_s1 + $0x198] sm:$0xff]  ;;  %v107_v39 = vld [vmem:[%s10210_s1 + $0x210] sm:$0xff] }
  0x1e   :  { %715 = vmatpush1.bf16.msra.mxu0 %v5858_v59  ;;  %818 = vmatpush1.bf16.msra.mxu1 %v5860_v60  ;;  %v71_v59 = vld [vmem:[%s10210_s1 + $0xf0] sm:$0xff]  ;;  %v96_v25 = vld [vmem:[%s10210_s1 + $0x1b8] sm:$0xff] }
  0x1f   :  { %716 = vmatprep.subr.bf16.mxu0 %v5867_v61  ;;  %819 = vmatprep.subr.bf16.mxu1 %v5869_v62  ;;  %v8074_v60 = vld [vmem:[%s10211_s0 + $0x10] ss:$8 sps:$4 sm:$0xff]   ;;  %v5839_v1 = vcombine.high %v67_v58, %v71_v59  ;;  %v5838_v8 = vcombine.low %v67_v58, %v71_v59 }
  0x20   :  { %v68_v61 = vld [vmem:[%s10210_s1 + $0xd8] sm:$0xff]  ;;  %v111_v40 = vld [vmem:[%s10210_s1 + $0x230] sm:$0xff] }
  0x21   :  { %v72_v62 = vld [vmem:[%s10210_s1 + $0xf8] sm:$0xff]  ;;  %v115_v52 = vld [vmem:[%s10210_s1 + $0x250] sm:$0xff] }
  0x22   :  { %717 = vmatpush1.bf16.msra.mxu0 %v5866_v3  ;;  %820 = vmatpush1.bf16.msra.mxu1 %v5868_v4  ;;  %v5841_v2 = vcombine.high %v68_v61, %v72_v62  ;;  %v8085_v3 = vld [vmem:[%s10211_s0 + $0x24] ss:$8 sps:$4 sm:$0xff]   ;;  %v75_v4 = vld [vmem:[%s10210_s1 + $0x110] sm:$0xff]  ;;  %v5840_v9 = vcombine.low %v68_v61, %v72_v62  ;;  %v100_v34 = vld [vmem:[%s10210_s1 + $0x1d8] sm:$0xff] }
  0x23   :  { %718 = vmatprep.subr.bf16.mxu0 %v5875_v5  ;;  %821 = vmatprep.subr.bf16.mxu1 %v5877_v6  ;;  %v79_v5 = vld [vmem:[%s10210_s1 + $0x130] sm:$0xff]  ;;  %v76_v6 = vld [vmem:[%s10210_s1 + $0x118] sm:$0xff] }
  0x24   :  { %v5847_v10 = vcombine.high %v75_v4, %v79_v5  ;;  %v5846_v15 = vcombine.low %v75_v4, %v79_v5  ;;  %v5848_v18 = vcombine.low %v76_v6, %v80_v7  ;;  %v108_v44 = vld [vmem:[%s10210_s1 + $0x218] sm:$0xff]  ;;  %v119_v53 = vld [vmem:[%s10210_s1 + $0x270] sm:$0xff] }
  0x25   :  { %v5887_v59 = vcombine.high %v115_v52, %v119_v53  ;;  %v123_v62 = vld [vmem:[%s10210_s1 + $0x290] sm:$0xff] }
  0x26   :  { %719 = vmatpush1.bf16.msra.mxu0 %v5874_v11  ;;  %822 = vmatpush1.bf16.msra.mxu1 %v5876_v12  ;;  %v5849_v11 = vcombine.high %v76_v6, %v80_v7  ;;  %v8108_v12 = vld [vmem:[%s10211_s0 + $0x20] ss:$8 sps:$4 sm:$0xff]   ;;  %v8228_v6 = vld [vmem:[%s10211_s0 + $0x50] ss:$8 sps:$4 sm:$0xff]  }
  0x27   :  { %720 = vmatprep.subr.bf16.mxu0 %v5883_v13  ;;  %823 = vmatprep.subr.bf16.mxu1 %v5885_v14  ;;  %v83_v13 = vld [vmem:[%s10210_s1 + $0x150] sm:$0xff] }
  0x28   :  { %v87_v14 = vld [vmem:[%s10210_s1 + $0x170] sm:$0xff] }
  0x29   :  { %v5854_v26 = vcombine.low %v83_v13, %v87_v14 }
  0x2a   :  { %721 = vmatpush1.bf16.msra.mxu0 %v5882_v19  ;;  %824 = vmatpush1.bf16.msra.mxu1 %v5884_v20  ;;  %v8125_v19 = vld [vmem:[%s10211_s0 + $0x34] ss:$8 sps:$4 sm:$0xff]   ;;  %v5855_v20 = vcombine.high %v83_v13, %v87_v14 }
  0x2b   :  { %722 = vmatprep.subr.bf16.mxu0 %v5891_v21  ;;  %825 = vmatprep.subr.bf16.mxu1 %v5893_v22  ;;  %v91_v21 = vld [vmem:[%s10210_s1 + $0x190] sm:$0xff]  ;;  %v136_v13 = vld [vmem:[%s10210_s1 + $0x2f8] sm:$0xff] }
  0x2c   :  { %v95_v22 = vld [vmem:[%s10210_s1 + $0x1b0] sm:$0xff] }
  0x2d   :  { %v5862_v33 = vcombine.low %v91_v21, %v95_v22 }
  0x2e   :  { %723 = vmatpush1.bf16.msra.mxu0 %v5890_v27  ;;  %826 = vmatpush1.bf16.msra.mxu1 %v5892_v28  ;;  %v5856_v27 = vcombine.low %v84_v16, %v88_v17  ;;  %v5863_v28 = vcombine.high %v91_v21, %v95_v22  ;;  %v7226_v21 = vld [vmem:[%s10211_s0 + $0x60] ss:$8 sps:$4 sm:$0xff]  }
  0x2f   :  { %724 = vmatprep.subr.bf16.mxu0 %v5899_v29  ;;  %827 = vmatprep.subr.bf16.mxu1 %v5901_v30  ;;  %v5865_v29 = vcombine.high %v92_v24, %v96_v25  ;;  %v8148_v30 = vld [vmem:[%s10211_s0 + $0x30] ss:$8 sps:$4 sm:$0xff]  }
  0x30   :  { %v7236_v22 = vld [vmem:[%s10212_s2 + $0x228] ss:$16 sps:$4 sm:$0xff]  }
  0x32   :  { %725 = vmatpush1.bf16.msra.mxu0 %v5898_v35  ;;  %828 = vmatpush1.bf16.msra.mxu1 %v5900_v36  ;;  %v104_v35 = vld [vmem:[%s10210_s1 + $0x1f8] sm:$0xff]  ;;  %v5864_v36 = vcombine.low %v92_v24, %v96_v25  ;;  %v7239_v25 = vld [vmem:[%s10212_s2 + $0x240] ss:$16 sps:$4 sm:$0xff]  }
  0x33   :  { %908 = vmatprep.subr.bf16.mxu0 %v5815_v37  ;;  %1011 = vmatprep.subr.bf16.mxu1 %v5817_v38  ;;  %v8165_v37 = vld [vmem:[%s10211_s0 + $0x44] ss:$8 sps:$4 sm:$0xff]   ;;  %v5871_v38 = vcombine.high %v99_v31, %v103_v32  ;;  %v5873_v42 = vcombine.high %v100_v34, %v104_v35 }
  0x34   :  { %v7244_v24 = vld [vmem:[%s10212_s2 + $0x24c] ss:$16 sps:$4 sm:$0xff]  }
  0x35   :  { %735 = vmatmul.mubr.bf16.vlgmr.msra.gmra.mrb[0].mxu0 %v8034_v41  ;;  %838 = vmatmul.mubr.bf16.vlgmr.msra.gmra.mrb[0].mxu1 %v8034_v41 }
  0x36   :  { %909 = vmatpush1.bf16.msra.mxu0 %v5814_v45  ;;  %1012 = vmatpush1.bf16.msra.mxu1 %v5816_v46  ;;  %v112_v45 = vld [vmem:[%s10210_s1 + $0x238] sm:$0xff]  ;;  %v5870_v46 = vcombine.low %v99_v31, %v103_v32  ;;  %v7253_v31 = vld [vmem:[%s10212_s2 + $0x284] ss:$16 sps:$4 sm:$0xff]  }
  0x37   :  { %910 = vmatprep.subr.bf16.mxu0 %v5823_v47  ;;  %1013 = vmatprep.subr.bf16.mxu1 %v5825_v48  ;;  %v5872_v47 = vcombine.low %v100_v34, %v104_v35  ;;  %v5879_v48 = vcombine.high %v107_v39, %v111_v40  ;;  %v5881_v50 = vcombine.high %v108_v44, %v112_v45  ;;  %v7256_v32 = vld [vmem:[%s10212_s2 + $0x28c] ss:$16 sps:$4 sm:$0xff]   ;;  %v7254_v34 = vld [vmem:[%s10212_s2 + $0x288] ss:$16 sps:$4 sm:$0xff]   ;;  %v7259_v35 = vld [vmem:[%s10212_s2 + $0x2a4] ss:$16 sps:$4 sm:$0xff]  }
  0x38   :  { %5907 = vmatprep.mubr.msk.bf16.mxu0 %vm680_vm0, %v8045_v49  ;;  %5914 = vmatprep.mubr.msk.bf16.mxu1 %vm680_vm0, %v8045_v49  ;;  %v5880_v58 = vcombine.low %v108_v44, %v112_v45  ;;  %v7266_v44 = vld [vmem:[%s10212_s2 + $0x2c8] ss:$16 sps:$4 sm:$0xff]   ;;  %v7271_v45 = vld [vmem:[%s10212_s2 + $0x2e4] ss:$16 sps:$4 sm:$0xff]  }
  0x3a   :  { %911 = vmatpush1.bf16.msra.mxu0 %v5822_v54  ;;  %1014 = vmatpush1.bf16.msra.mxu1 %v5824_v55  ;;  %v8199_v54 = vld [vmem:[%s10211_s0 + $0x54] ss:$8 sps:$4 sm:$0xff]  }
  0x3b   :  { %912 = vmatprep.subr.bf16.mxu0 %v5831_v56  ;;  %1015 = vmatprep.subr.bf16.mxu1 %v5833_v57  ;;  %v116_v55 = vld [vmem:[%s10210_s1 + $0x258] sm:$0xff]  ;;  %v5878_v57 = vcombine.low %v107_v39, %v111_v40  ;;  %v7265_v39 = vld [vmem:[%s10212_s2 + $0x2c4] ss:$16 sps:$4 sm:$0xff]  }
  0x3c   :  { %v120_v56 = vld [vmem:[%s10210_s1 + $0x278] sm:$0xff] }
  0x3d   :  { %745 = vmatmul.mubr.bf16.gmra.mrb[4].mxu0 %v8074_v60  ;;  %848 = vmatmul.mubr.bf16.gmra.mrb[4].mxu1 %v8074_v60  ;;  %v5889_v61 = vcombine.high %v116_v55, %v120_v56  ;;  %v5888_v4 = vcombine.low %v116_v55, %v120_v56  ;;  %v7268_v40 = vld [vmem:[%s10212_s2 + $0x2cc] ss:$16 sps:$4 sm:$0xff]   ;;  %v7281_v56 = vld [vmem:[%s10212_s2 + $0x320] ss:$16 sps:$4 sm:$0xff]  }
  0x3e   :  { %913 = vmatpush1.bf16.msra.mxu0 %v5830_v63  ;;  %1016 = vmatpush1.bf16.msra.mxu1 %v5832_v0  ;;  %v127_v63 = vld [vmem:[%s10210_s1 + $0x2b0] sm:$0xff]  ;;  %v124_v0 = vld [vmem:[%s10210_s1 + $0x298] sm:$0xff] }
  0x3f   :  { %914 = vmatprep.subr.bf16.mxu0 %v5839_v1  ;;  %1017 = vmatprep.subr.bf16.mxu1 %v5841_v2  ;;  %v128_v1 = vld [vmem:[%s10210_s1 + $0x2b8] sm:$0xff]  ;;  %v5886_v2 = vcombine.low %v115_v52, %v119_v53  ;;  %v5895_v5 = vcombine.high %v123_v62, %v127_v63  ;;  %v5894_v14 = vcombine.low %v123_v62, %v127_v63  ;;  %v7275_v52 = vld [vmem:[%s10212_s2 + $0x300] ss:$16 sps:$4 sm:$0xff]   ;;  %v7295_v63 = vld [vmem:[%s10212_s2 + $0x364] ss:$16 sps:$4 sm:$0xff]  }
  0x40   :  { %5908 = vmatprep.mubr.msk.bf16.mxu0 %vm680_vm0, %v8085_v3  ;;  %5915 = vmatprep.mubr.msk.bf16.mxu1 %vm680_vm0, %v8085_v3  ;;  %v5897_v7 = vcombine.high %v124_v0, %v128_v1  ;;  %v7278_v53 = vld [vmem:[%s10212_s2 + $0x308] ss:$16 sps:$4 sm:$0xff]   ;;  %v7286_v55 = vld [vmem:[%s10212_s2 + $0x32c] ss:$16 sps:$4 sm:$0xff]  }
  0x41   :  { %v7290_v62 = vld [vmem:[%s10212_s2 + $0x348] ss:$16 sps:$4 sm:$0xff]  }
  0x42   :  { %915 = vmatpush1.bf16.msra.mxu0 %v5838_v8  ;;  %1018 = vmatpush1.bf16.msra.mxu1 %v5840_v9  ;;  %v131_v8 = vld [vmem:[%s10210_s1 + $0x2d0] sm:$0xff] }
  0x43   :  { %916 = vmatprep.subr.bf16.mxu0 %v5847_v10  ;;  %1019 = vmatprep.subr.bf16.mxu1 %v5849_v11  ;;  %v135_v9 = vld [vmem:[%s10210_s1 + $0x2f0] sm:$0xff]  ;;  %v8239_v10 = vld [vmem:[%s10211_s0 + $0x64] ss:$8 sps:$4 sm:$0xff]   ;;  %v132_v11 = vld [vmem:[%s10210_s1 + $0x2d8] sm:$0xff] }
  0x44   :  { %v5903_v16 = vcombine.high %v131_v8, %v135_v9  ;;  %v5905_v17 = vcombine.high %v132_v11, %v136_v13 }
  0x45   :  { %755 = vmatmul.mubr.bf16.gmra.mrb[8].mxu0 %v8108_v12  ;;  %858 = vmatmul.mubr.bf16.gmra.mrb[8].mxu1 %v8108_v12 }
  0x46   :  { %917 = vmatpush1.bf16.msra.mxu0 %v5846_v15  ;;  %1020 = vmatpush1.bf16.msra.mxu1 %v5848_v18  ;;  %v5896_v15 = vcombine.low %v124_v0, %v128_v1  ;;  %v5902_v18 = vcombine.low %v131_v8, %v135_v9  ;;  %v7298_v0 = vld [vmem:[%s10212_s2 + $0x36c] ss:$16 sps:$4 sm:$0xff]   ;;  %v7293_v1 = vld [vmem:[%s10212_s2 + $0x360] ss:$16 sps:$4 sm:$0xff]   ;;  %v7307_v8 = vld [vmem:[%s10212_s2 + $0x3a4] ss:$16 sps:$4 sm:$0xff]  }
  0x47   :  { %5909 = vmatprep.mubr.msk.bf16.mxu0 %vm680_vm0, %v8125_v19  ;;  %5916 = vmatprep.mubr.msk.bf16.mxu1 %vm680_vm0, %v8125_v19  ;;  %v7305_v9 = vld [vmem:[%s10212_s2 + $0x3a0] ss:$16 sps:$4 sm:$0xff]  }
  0x48   :  { %918 = vmatprep.subr.bf16.mxu0 %v5855_v20  ;;  %1021 = vmatprep.subr.bf16.mxu1 %v5857_v23  ;;  %v5904_v20 = vcombine.low %v132_v11, %v136_v13  ;;  %v7241_v23 = vld [vmem:[%s10212_s2 + $0x244] ss:$16 sps:$4 sm:$0xff]   ;;  %v7310_v11 = vld [vmem:[%s10212_s2 + $0x3ac] ss:$16 sps:$4 sm:$0xff]  }
  0x49   :  { %v7313_v13 = vld [vmem:[%s10212_s2 + $0x3c4] ss:$16 sps:$4 sm:$0xff]  }
  0x4a   :  { %919 = vmatpush1.bf16.msra.mxu0 %v5854_v26  ;;  %1022 = vmatpush1.bf16.msra.mxu1 %v5856_v27  ;;  %v7242_v26 = vld [vmem:[%s10212_s2 + $0x248] ss:$16 sps:$4 sm:$0xff]   ;;  %v7247_v27 = vld [vmem:[%s10212_s2 + $0x264] ss:$16 sps:$4 sm:$0xff]  }
  0x4b   :  { %920 = vmatprep.subr.bf16.mxu0 %v5863_v28  ;;  %1023 = vmatprep.subr.bf16.mxu1 %v5865_v29  ;;  %v7250_v28 = vld [vmem:[%s10212_s2 + $0x26c] ss:$16 sps:$4 sm:$0xff]   ;;  %v7245_v29 = vld [vmem:[%s10212_s2 + $0x260] ss:$16 sps:$4 sm:$0xff]  }
  0x4d   :  { %765 = vmatmul.mubr.bf16.gmra.mrb[12].mxu0 %v8148_v30  ;;  %868 = vmatmul.mubr.bf16.gmra.mrb[12].mxu1 %v8148_v30 }
  0x4e   :  { %921 = vmatpush1.bf16.msra.mxu0 %v5862_v33  ;;  %1024 = vmatpush1.bf16.msra.mxu1 %v5864_v36  ;;  %v7251_v33 = vld [vmem:[%s10212_s2 + $0x280] ss:$16 sps:$4 sm:$0xff]   ;;  %v7262_v36 = vld [vmem:[%s10212_s2 + $0x2ac] ss:$16 sps:$4 sm:$0xff]  }
  0x4f   :  { %5910 = vmatprep.mubr.msk.bf16.mxu0 %vm680_vm0, %v8165_v37  ;;  %5917 = vmatprep.mubr.msk.bf16.mxu1 %vm680_vm0, %v8165_v37 }
  0x50   :  { %922 = vmatprep.subr.bf16.mxu0 %v5871_v38  ;;  %1025 = vmatprep.subr.bf16.mxu1 %v5873_v42  ;;  %v7260_v38 = vld [vmem:[%s10212_s2 + $0x2a8] ss:$16 sps:$4 sm:$0xff]   ;;  %v7263_v42 = vld [vmem:[%s10212_s2 + $0x2c0] ss:$16 sps:$4 sm:$0xff]  }
  0x52   :  { %923 = vmatpush1.bf16.msra.mxu0 %v5870_v46  ;;  %1026 = vmatpush1.bf16.msra.mxu1 %v5872_v47  ;;  %v7274_v46 = vld [vmem:[%s10212_s2 + $0x2ec] ss:$16 sps:$4 sm:$0xff]   ;;  %v7269_v47 = vld [vmem:[%s10212_s2 + $0x2e0] ss:$16 sps:$4 sm:$0xff]  }
  0x53   :  { %924 = vmatprep.subr.bf16.mxu0 %v5879_v48  ;;  %1027 = vmatprep.subr.bf16.mxu1 %v5881_v50  ;;  %v7272_v48 = vld [vmem:[%s10212_s2 + $0x2e8] ss:$16 sps:$4 sm:$0xff]   ;;  %v7277_v50 = vld [vmem:[%s10212_s2 + $0x304] ss:$16 sps:$4 sm:$0xff]  }
  0x55   :  { %775 = vmatmul.mubr.bf16.gmra.mrb[16].mxu0 %v8188_v51  ;;  %878 = vmatmul.mubr.bf16.gmra.mrb[16].mxu1 %v8188_v51 }
  0x56   :  { %5911 = vmatprep.mubr.msk.bf16.mxu0 %vm680_vm0, %v8199_v54  ;;  %5918 = vmatprep.mubr.msk.bf16.mxu1 %vm680_vm0, %v8199_v54 }
  0x57   :  { %925 = vmatpush1.bf16.msra.mxu0 %v5878_v57  ;;  %1028 = vmatpush1.bf16.msra.mxu1 %v5880_v58  ;;  %v7284_v57 = vld [vmem:[%s10212_s2 + $0x328] ss:$16 sps:$4 sm:$0xff]   ;;  %v7289_v58 = vld [vmem:[%s10212_s2 + $0x344] ss:$16 sps:$4 sm:$0xff]  }
  0x58   :  { %926 = vmatprep.subr.bf16.mxu0 %v5887_v59  ;;  %1029 = vmatprep.subr.bf16.mxu1 %v5889_v61  ;;  %v7292_v59 = vld [vmem:[%s10212_s2 + $0x34c] ss:$16 sps:$4 sm:$0xff]   ;;  %v7287_v61 = vld [vmem:[%s10212_s2 + $0x340] ss:$16 sps:$4 sm:$0xff]  }
  0x5b   :  { %927 = vmatpush1.bf16.msra.mxu0 %v5886_v2  ;;  %1030 = vmatpush1.bf16.msra.mxu1 %v5888_v4  ;;  %v7296_v2 = vld [vmem:[%s10212_s2 + $0x368] ss:$16 sps:$4 sm:$0xff]   ;;  %v7301_v4 = vld [vmem:[%s10212_s2 + $0x384] ss:$16 sps:$4 sm:$0xff]  }
  0x5c   :  { %928 = vmatprep.subr.bf16.mxu0 %v5895_v5  ;;  %1031 = vmatprep.subr.bf16.mxu1 %v5897_v7  ;;  %v7304_v5 = vld [vmem:[%s10212_s2 + $0x38c] ss:$16 sps:$4 sm:$0xff]   ;;  %v7302_v7 = vld [vmem:[%s10212_s2 + $0x388] ss:$16 sps:$4 sm:$0xff]  }
  0x5d   :  { %785 = vmatmul.mubr.bf16.gmra.mrb[20].mxu0 %v8228_v6  ;;  %888 = vmatmul.mubr.bf16.gmra.mrb[20].mxu1 %v8228_v6 }
  0x5e   :  { %5912 = vmatprep.mubr.msk.bf16.mxu0 %vm680_vm0, %v8239_v10  ;;  %5919 = vmatprep.mubr.msk.bf16.mxu1 %vm680_vm0, %v8239_v10 }
  0x5f   :  { %929 = vmatpush1.bf16.msra.mxu0 %v5894_v14  ;;  %1032 = vmatpush1.bf16.msra.mxu1 %v5896_v15  ;;  %v7316_v14 = vld [vmem:[%s10212_s2 + $0x3cc] ss:$16 sps:$4 sm:$0xff]   ;;  %v7311_v15 = vld [vmem:[%s10212_s2 + $0x3c0] ss:$16 sps:$4 sm:$0xff]  }
  0x60   :  { %930 = vmatprep.subr.bf16.mxu0 %v5903_v16  ;;  %1033 = vmatprep.subr.bf16.mxu1 %v5905_v17  ;;  %v7314_v16 = vld [vmem:[%s10212_s2 + $0x3c8] ss:$16 sps:$4 sm:$0xff]   ;;  %v7319_v17 = vld [vmem:[%s10212_s2 + $0x3e4] ss:$16 sps:$4 sm:$0xff]  }
  0x63   :  { %931 = vmatpush1.bf16.msra.mxu0 %v5902_v18  ;;  %1034 = vmatpush1.bf16.msra.mxu1 %v5904_v20  ;;  %v7322_v18 = vld [vmem:[%s10212_s2 + $0x3ec] ss:$16 sps:$4 sm:$0xff]   ;;  %v7317_v20 = vld [vmem:[%s10212_s2 + $0x3e0] ss:$16 sps:$4 sm:$0xff]  }
  0x65   :  { %795 = vmatmul.mubr.bf16.gmra.mrb[24].mxu0 %v7226_v21  ;;  %898 = vmatmul.mubr.bf16.gmra.mrb[24].mxu1 %v7226_v21 }
  0x66   :  { %5920 = vmatprep.mubr.msk.bf16.mxu0 %vm680_vm0, %v7935_v43  ;;  %5927 = vmatprep.mubr.msk.bf16.mxu1 %vm680_vm0, %v7935_v43  ;;  %v7229_v43 = vld [vmem:[%s10212_s2 + $0x204] ss:$16 sps:$4 sm:$0xff]  }
  0x67   :  { %1796 = vmatprep.subr.bf16.mxu0 %v7229_v43  ;;  %v7325_v43 = vld [vmem:[%s10212_s2 + $0x4] ss:$16 sps:$4 sm:$0xff]  }
  0x6d   :  { %941 = vmatmul.mubr.bf16.vlgmr.msra.gmra.mrb[28].mxu0 %v8034_v41  ;;  %1044 = vmatmul.mubr.bf16.vlgmr.msra.gmra.mrb[28].mxu1 %v8034_v41  ;;  %v7227_v41 = vld [vmem:[%s10212_s2 + $0x200] ss:$16 sps:$4 sm:$0xff]  }
  0x6e   :  { %5921 = vmatprep.mubr.msk.bf16.mxu0 %vm680_vm0, %v8045_v49  ;;  %5928 = vmatprep.mubr.msk.bf16.mxu1 %vm680_vm0, %v8045_v49  ;;  %v7230_v49 = vld [vmem:[%s10212_s2 + $0x208] ss:$16 sps:$4 sm:$0xff]  }
  0x6f   :  { %1797 = vmatpush1.bf16.msra.mxu0 %v7227_v41  ;;  %v7328_v41 = vld [vmem:[%s10212_s2 + $0xc] ss:$16 sps:$4 sm:$0xff]  }
  0x75   :  { %951 = vmatmul.mubr.bf16.gmra.mrb[32].mxu0 %v8074_v60  ;;  %1054 = vmatmul.mubr.bf16.gmra.mrb[32].mxu1 %v8074_v60  ;;  %v7232_v60 = vld [vmem:[%s10212_s2 + $0x20c] ss:$16 sps:$4 sm:$0xff]  }
  0x76   :  { %5922 = vmatprep.mubr.msk.bf16.mxu0 %vm680_vm0, %v8085_v3  ;;  %5929 = vmatprep.mubr.msk.bf16.mxu1 %vm680_vm0, %v8085_v3  ;;  %v7235_v3 = vld [vmem:[%s10212_s2 + $0x224] ss:$16 sps:$4 sm:$0xff]  }
  0x77   :  { %1899 = vmatprep.subr.bf16.mxu1 %v7232_v60  ;;  %1798 = vmatprep.subr.bf16.mxu0 %v7235_v3 }
  0x78   :  { %1900 = vmatpush1.bf16.msra.mxu1 %v7230_v49 }
  0x7d   :  { %961 = vmatmul.mubr.bf16.gmra.mrb[36].mxu0 %v8108_v12  ;;  %1064 = vmatmul.mubr.bf16.gmra.mrb[36].mxu1 %v8108_v12  ;;  %v7238_v12 = vld [vmem:[%s10212_s2 + $0x22c] ss:$16 sps:$4 sm:$0xff]  }
  0x7e   :  { %5923 = vmatprep.mubr.msk.bf16.mxu0 %vm680_vm0, %v8125_v19  ;;  %5930 = vmatprep.mubr.msk.bf16.mxu1 %vm680_vm0, %v8125_v19  ;;  %v7233_v19 = vld [vmem:[%s10212_s2 + $0x220] ss:$16 sps:$4 sm:$0xff]  }
  0x7f   :  { %1901 = vmatprep.subr.bf16.mxu1 %v7238_v12  ;;  %1799 = vmatpush1.bf16.msra.mxu0 %v7233_v19 }
  0x80   :  { %1902 = vmatpush1.bf16.msra.mxu1 %v7236_v22  ;;  %1800 = vmatprep.subr.bf16.mxu0 %v7241_v23 }
  0x81   :  { %1903 = vmatprep.subr.bf16.mxu1 %v7244_v24 }
  0x83   :  { %1801 = vmatpush1.bf16.msra.mxu0 %v7239_v25 }
  0x84   :  { %1904 = vmatpush1.bf16.msra.mxu1 %v7242_v26  ;;  %1802 = vmatprep.subr.bf16.mxu0 %v7247_v27 }
  0x85   :  { %971 = vmatmul.mubr.bf16.gmra.mrb[40].mxu0 %v8148_v30  ;;  %1074 = vmatmul.mubr.bf16.gmra.mrb[40].mxu1 %v8148_v30  ;;  %v7248_v30 = vld [vmem:[%s10212_s2 + $0x268] ss:$16 sps:$4 sm:$0xff]  }
  0x86   :  { %5924 = vmatprep.mubr.msk.bf16.mxu0 %vm680_vm0, %v8165_v37  ;;  %5931 = vmatprep.mubr.msk.bf16.mxu1 %vm680_vm0, %v8165_v37  ;;  %v7257_v37 = vld [vmem:[%s10212_s2 + $0x2a0] ss:$16 sps:$4 sm:$0xff]  }
  0x87   :  { %1905 = vmatprep.subr.bf16.mxu1 %v7250_v28  ;;  %1803 = vmatpush1.bf16.msra.mxu0 %v7245_v29 }
  0x88   :  { %1906 = vmatpush1.bf16.msra.mxu1 %v7248_v30  ;;  %1804 = vmatprep.subr.bf16.mxu0 %v7253_v31 }
  0x89   :  { %1907 = vmatprep.subr.bf16.mxu1 %v7256_v32 }
  0x8b   :  { %1805 = vmatpush1.bf16.msra.mxu0 %v7251_v33 }
  0x8c   :  { %1908 = vmatpush1.bf16.msra.mxu1 %v7254_v34  ;;  %1806 = vmatprep.subr.bf16.mxu0 %v7259_v35 }
  0x8d   :  { %981 = vmatmul.mubr.bf16.gmra.mrb[44].mxu0 %v8188_v51  ;;  %1084 = vmatmul.mubr.bf16.gmra.mrb[44].mxu1 %v8188_v51  ;;  %v7280_v51 = vld [vmem:[%s10212_s2 + $0x30c] ss:$16 sps:$4 sm:$0xff]  }
  0x8e   :  { %5925 = vmatprep.mubr.msk.bf16.mxu0 %vm680_vm0, %v8199_v54  ;;  %5932 = vmatprep.mubr.msk.bf16.mxu1 %vm680_vm0, %v8199_v54  ;;  %v7283_v54 = vld [vmem:[%s10212_s2 + $0x324] ss:$16 sps:$4 sm:$0xff]  }
  0x8f   :  { %1909 = vmatprep.subr.bf16.mxu1 %v7262_v36  ;;  %1807 = vmatpush1.bf16.msra.mxu0 %v7257_v37 }
  0x90   :  { %1910 = vmatpush1.bf16.msra.mxu1 %v7260_v38  ;;  %1808 = vmatprep.subr.bf16.mxu0 %v7265_v39 }
  0x91   :  { %1911 = vmatprep.subr.bf16.mxu1 %v7268_v40 }
  0x93   :  { %1809 = vmatpush1.bf16.msra.mxu0 %v7263_v42 }
  0x94   :  { %1912 = vmatpush1.bf16.msra.mxu1 %v7266_v44  ;;  %1810 = vmatprep.subr.bf16.mxu0 %v7271_v45 }
  0x95   :  { %991 = vmatmul.mubr.bf16.gmra.mrb[48].mxu0 %v8228_v6  ;;  %1094 = vmatmul.mubr.bf16.gmra.mrb[48].mxu1 %v8228_v6  ;;  %v7299_v6 = vld [vmem:[%s10212_s2 + $0x380] ss:$16 sps:$4 sm:$0xff]  }
  0x96   :  { %5926 = vmatprep.mubr.msk.bf16.mxu0 %vm680_vm0, %v8239_v10  ;;  %5933 = vmatprep.mubr.msk.bf16.mxu1 %vm680_vm0, %v8239_v10  ;;  %v7308_v10 = vld [vmem:[%s10212_s2 + $0x3a8] ss:$16 sps:$4 sm:$0xff]  }
  0x97   :  { %1913 = vmatprep.subr.bf16.mxu1 %v7274_v46  ;;  %1811 = vmatpush1.bf16.msra.mxu0 %v7269_v47 }
  0x98   :  { %1914 = vmatpush1.bf16.msra.mxu1 %v7272_v48  ;;  %1812 = vmatprep.subr.bf16.mxu0 %v7277_v50 }
  0x99   :  { %1915 = vmatprep.subr.bf16.mxu1 %v7280_v51 }
  0x9b   :  { %1813 = vmatpush1.bf16.msra.mxu0 %v7275_v52 }
  0x9c   :  { %1916 = vmatpush1.bf16.msra.mxu1 %v7278_v53  ;;  %1814 = vmatprep.subr.bf16.mxu0 %v7283_v54 }
  0x9d   :  { %1001 = vmatmul.mubr.bf16.gmra.mrb[52].mxu0 %v7226_v21  ;;  %1104 = vmatmul.mubr.bf16.gmra.mrb[52].mxu1 %v7226_v21  ;;  %v7320_v21 = vld [vmem:[%s10212_s2 + $0x3e8] ss:$16 sps:$4 sm:$0xff]  }
  0x9e   :  { %1917 = vmatprep.subr.bf16.mxu1 %v7286_v55 }
  0x9f   :  { %1815 = vmatpush1.bf16.msra.mxu0 %v7281_v56 }
  0xa0   :  { %1918 = vmatpush1.bf16.msra.mxu1 %v7284_v57  ;;  %1816 = vmatprep.subr.bf16.mxu0 %v7289_v58 }
  0xa1   :  { %1919 = vmatprep.subr.bf16.mxu1 %v7292_v59 }
  0xa3   :  { %1817 = vmatpush1.bf16.msra.mxu0 %v7287_v61 }
  0xa4   :  { %1920 = vmatpush1.bf16.msra.mxu1 %v7290_v62  ;;  %1818 = vmatprep.subr.bf16.mxu0 %v7295_v63 }
  0xa5   :  { %1921 = vmatprep.subr.bf16.mxu1 %v7298_v0 }
  0xa7   :  { %1819 = vmatpush1.bf16.msra.mxu0 %v7293_v1 }
  0xa8   :  { %1922 = vmatpush1.bf16.msra.mxu1 %v7296_v2  ;;  %1820 = vmatprep.subr.bf16.mxu0 %v7301_v4 }
  0xa9   :  { %1923 = vmatprep.subr.bf16.mxu1 %v7304_v5 }
  0xab   :  { %1821 = vmatpush1.bf16.msra.mxu0 %v7299_v6 }
  0xac   :  { %1924 = vmatpush1.bf16.msra.mxu1 %v7302_v7  ;;  %1822 = vmatprep.subr.bf16.mxu0 %v7307_v8 }
  0xad   :  { %1925 = vmatprep.subr.bf16.mxu1 %v7310_v11 }
  0xaf   :  { %1823 = vmatpush1.bf16.msra.mxu0 %v7305_v9 }
  0xb0   :  { %1926 = vmatpush1.bf16.msra.mxu1 %v7308_v10  ;;  %1824 = vmatprep.subr.bf16.mxu0 %v7313_v13 }
  0xb1   :  { %1927 = vmatprep.subr.bf16.mxu1 %v7316_v14 }
  0xb3   :  { %1825 = vmatpush1.bf16.msra.mxu0 %v7311_v15 }
  0xb4   :  { %1928 = vmatpush1.bf16.msra.mxu1 %v7314_v16  ;;  %1826 = vmatprep.subr.bf16.mxu0 %v7319_v17 }
  0xb5   :  { %1929 = vmatprep.subr.bf16.mxu1 %v7322_v18 }
  0xb7   :  { %1827 = vmatpush1.bf16.msra.mxu0 %v7317_v20 }
  0xb8   :  { %1930 = vmatpush1.bf16.msra.mxu1 %v7320_v21  ;;  %2322 = vmatprep.subr.bf16.mxu0 %v7325_v43 }
  0xb9   :  { %2425 = vmatprep.subr.bf16.mxu1 %v7328_v41  ;;  %v1200_v41 = vlaneseq }
  0xbb   :  { %v8650_v18 = vshrl.u32 %v1200_v41, 7  ;;  %v1198_v41 = vld [vmem:[%s10213_s4] sm:$0x3] }
  0xbd   :  { %v10229_v26 = vsub.s32 0, %v8650_v18  ;;  %v10231_v38 = vsub.s32 1, %v8650_v18 }
  0xbf   :  { %v8671_v32 = vrot.slane %v1198_v41, %v10229_v26  ;;  %v8675_v16 = vrot.slane %v1198_v41, %v10231_v38 }
 0x108   :  { %v8494_v49 = vpop.f32.mrb[0].mxu0  ;;  %v8496_v60 = vpop.f32.mrb[0].mxu1 }
 0x109   :  { %v8498_v3 = vpop.f32.mrb[1].mxu0  ;;  %v8502_v19 = vpop.f32.mrb[1].mxu1 }
 0x10a   :  { %v8504_v22 = vpop.f32.mrb[2].mxu0  ;;  %v8508_v24 = vpop.f32.mrb[2].mxu1 }
 0x10b   :  { %v8510_v25 = vpop.f32.mrb[3].mxu0  ;;  %v8514_v27 = vpop.f32.mrb[3].mxu1 }
 0x10c   :  { %v10247_v38 = vmax.f32 %v8510_v25, %v8514_v27 }
 0x110   :  { %v8518_v29 = vpop.f32.mrb[4].mxu0  ;;  %v8520_v30 = vpop.f32.mrb[4].mxu1 }
 0x111   :  { %v8522_v31 = vpop.f32.mrb[5].mxu0  ;;  %v8526_v33 = vpop.f32.mrb[5].mxu1 }
 0x112   :  { %v8528_v34 = vpop.f32.mrb[6].mxu0  ;;  %v8532_v36 = vpop.f32.mrb[6].mxu1 }
 0x113   :  { %v8534_v37 = vpop.f32.mrb[7].mxu0  ;;  %v8538_v39 = vpop.f32.mrb[7].mxu1 }
 0x118   :  { %v8542_v42 = vpop.f32.mrb[8].mxu0  ;;  %v8544_v44 = vpop.f32.mrb[8].mxu1 }
 0x119   :  { %v8546_v45 = vpop.f32.mrb[9].mxu0  ;;  %v8550_v47 = vpop.f32.mrb[9].mxu1 }
 0x11a   :  { %v8552_v48 = vpop.f32.mrb[10].mxu0  ;;  %v8556_v51 = vpop.f32.mrb[10].mxu1 }
 0x11b   :  { %v8558_v52 = vpop.f32.mrb[11].mxu0  ;;  %v8562_v54 = vpop.f32.mrb[11].mxu1 }
 0x120   :  { %v8566_v56 = vpop.f32.mrb[12].mxu0  ;;  %v8568_v57 = vpop.f32.mrb[12].mxu1 }
 0x121   :  { %v8570_v58 = vpop.f32.mrb[13].mxu0  ;;  %v8574_v61 = vpop.f32.mrb[13].mxu1 }
 0x122   :  { %v8576_v62 = vpop.f32.mrb[14].mxu0  ;;  %v8580_v0 = vpop.f32.mrb[14].mxu1 }
 0x123   :  { %v8582_v1 = vpop.f32.mrb[15].mxu0  ;;  %v8586_v4 = vpop.f32.mrb[15].mxu1 }
 0x128   :  { %v8590_v6 = vpop.f32.mrb[16].mxu0  ;;  %v8592_v7 = vpop.f32.mrb[16].mxu1 }
 0x129   :  { %v8594_v8 = vpop.f32.mrb[17].mxu0  ;;  %v8598_v10 = vpop.f32.mrb[17].mxu1 }
 0x12a   :  { %v8600_v11 = vpop.f32.mrb[18].mxu0  ;;  %v8604_v14 = vpop.f32.mrb[18].mxu1 }
 0x12b   :  { %v8606_v15 = vpop.f32.mrb[19].mxu0  ;;  %v8610_v17 = vpop.f32.mrb[19].mxu1 }
 0x130   :  { %v8614_v20 = vpop.f32.mrb[20].mxu0  ;;  %v8616_v21 = vpop.f32.mrb[20].mxu1 }
 0x131   :  { %v8618_v43 = vpop.f32.mrb[21].mxu0  ;;  %v8622_v13 = vpop.f32.mrb[21].mxu1 }
 0x132   :  { %v8624_v9 = vpop.f32.mrb[22].mxu0  ;;  %v8628_v5 = vpop.f32.mrb[22].mxu1 }
 0x133   :  { %10232 = vst [vmem:[#allocation2_spill] sm:$0xff] %v8624_v9  ;;  %10233 = vst [vmem:[#allocation3_spill] sm:$0xff] %v8628_v5  ;;  %v8630_v2 = vpop.f32.mrb[23].mxu0  ;;  %v8634_v63 = vpop.f32.mrb[23].mxu1 }
 0x134   :  { %10234 = vst [vmem:[#allocation4_spill] sm:$0xff] %v8630_v2  ;;  %10235 = vst [vmem:[#allocation5_spill] sm:$0xff] %v8634_v63 }
 0x138   :  { %v8638_v55 = vpop.f32.mrb[24].mxu0  ;;  %v8640_v53 = vpop.f32.mrb[24].mxu1 }
 0x139   :  { %10236 = vst [vmem:[#allocation6_spill] sm:$0xff] %v8638_v55  ;;  %10237 = vst [vmem:[#allocation7_spill] sm:$0xff] %v8640_v53  ;;  %v8642_v50 = vpop.f32.mrb[25].mxu0  ;;  %v8646_v46 = vpop.f32.mrb[25].mxu1  ;;  %v10244_v55 = vmax.f32 %v8494_v49, %v8496_v60 }
 0x13a   :  { %10238 = vst [vmem:[#allocation8_spill] sm:$0xff] %v8642_v50  ;;  %10239 = vst [vmem:[#allocation9_spill] sm:$0xff] %v8646_v46  ;;  %v8648_v40 = vpop.f32.mrb[26].mxu0  ;;  %v8654_v59 = vpop.f32.mrb[26].mxu1 }
 0x13b   :  { %10240 = vst [vmem:[#allocation10_spill] sm:$0xff] %v8648_v40  ;;  %10241 = vst [vmem:[#allocation11_spill] sm:$0xff] %v8654_v59  ;;  %v8656_v35 = vpop.f32.mrb[27].mxu0  ;;  %v8660_v28 = vpop.f32.mrb[27].mxu1 }
 0x13c   :  { %10242 = vst [vmem:[#allocation12_spill] sm:$0xff] %v8656_v35  ;;  %10243 = vst [vmem:[#allocation13_spill] sm:$0xff] %v8660_v28 }
 0x140   :  { %v942_v23 = vpop.f32.mrb[28].mxu0  ;;  %v1045_v12 = vpop.f32.mrb[28].mxu1 }
 0x141   :  { %v944_v46 = vpop.f32.mrb[29].mxu0  ;;  %v1142_v50 = vmax.f32 %v942_v23, %v1045_v12  ;;  %v1047_v59 = vpop.f32.mrb[29].mxu1  ;;  %v10245_v12 = vmax.f32 %v8498_v3, %v8502_v19 }
 0x142   :  { %v946_v40 = vpop.f32.mrb[30].mxu0  ;;  %v1143_v53 = vmax.f32 %v944_v46, %v1047_v59  ;;  %v1049_v28 = vpop.f32.mrb[30].mxu1  ;;  %v10246_v46 = vmax.f32 %v8504_v22, %v8508_v24 }
 0x143   :  { %v948_v35 = vpop.f32.mrb[31].mxu0  ;;  %v1170_v63 = vmax.f32 %v10244_v55, %v1142_v50  ;;  %v1144_v2 = vmax.f32 %v946_v40, %v1049_v28  ;;  %v1051_v5 = vpop.f32.mrb[31].mxu1 }
 0x144   :  { %v1171_v23 = vmax.f32 %v10245_v12, %v1143_v53  ;;  %v1145_v26 = vmax.f32 %v948_v35, %v1051_v5 }
 0x145   :  { %v1210_v9 = vadd.f32 %v8671_v32, %v1170_v63  ;;  %v1172_v59 = vmax.f32 %v10246_v46, %v1144_v2 }
 0x146   :  { %v1211_v41 = vadd.f32 %v8675_v16, %v1171_v23  ;;  %v1173_v49 = vmax.f32 %v10247_v38, %v1145_v26  ;;  %v10248_v26 = vmax.f32 %v8518_v29, %v8520_v30  ;;  %v10253_v30 = vmax.f32 %v8534_v37, %v8538_v39  ;;  %v7331_v37 = vld [vmem:[%s10212_s2 + $0x24] ss:$16 sps:$4 sm:$0xff]   ;;  %v7334_v39 = vld [vmem:[%s10212_s2 + $0x2c] ss:$16 sps:$4 sm:$0xff]  }
 0x147   :  { %v1212_v60 = vadd.f32 %v8671_v32, %v1172_v59  ;;  %v1238_v35 = vmax.f32 %v1210_v9, 0.0  ;;  %v10249_v9 = vmax.f32 %v8522_v31, %v8526_v33  ;;  %v7323_v33 = vld [vmem:[%s10212_s2] ss:$16 sps:$4 sm:$0xff]  }
 0x148   :  { %v952_v28 = vpop.f32.mrb[32].mxu0  ;;  %v1213_v40 = vadd.f32 %v8675_v16, %v1173_v49  ;;  %v1055_v3 = vpop.f32.mrb[32].mxu1  ;;  %v1239_v22 = vmax.f32 %v1211_v41, 0.0 }
 0x149   :  { %v954_v19 = vpop.f32.mrb[33].mxu0  ;;  %v1240_v50 = vmax.f32 %v1212_v60, 0.0  ;;  %v1146_v53 = vmax.f32 %v952_v28, %v1055_v3  ;;  %v1057_v55 = vpop.f32.mrb[33].mxu1  ;;  %v10250_v60 = vmax.f32 %v8528_v34, %v8532_v36  ;;  %v7326_v34 = vld [vmem:[%s10212_s2 + $0x8] ss:$16 sps:$4 sm:$0xff]  }
 0x14a   :  { %v956_v63 = vpop.f32.mrb[34].mxu0  ;;  %v1241_v24 = vmax.f32 %v1213_v40, 0.0  ;;  %v1147_v2 = vmax.f32 %v954_v19, %v1057_v55  ;;  %v1059_v5 = vpop.f32.mrb[34].mxu1 }
 0x14b   :  { %v958_v12 = vpop.f32.mrb[35].mxu0  ;;  %v8693_v25 = vpack.c.bf16 %v1240_v50, %v1238_v35  ;;  %v1174_v27 = vmax.f32 %v10248_v26, %v1146_v53  ;;  %v1148_v38 = vmax.f32 %v956_v63, %v1059_v5  ;;  %v1061_v23 = vpop.f32.mrb[35].mxu1 }
 0x14c   :  { %v8698_v46 = vpack.c.bf16 %v1241_v24, %v1239_v22  ;;  %v1175_v59 = vmax.f32 %v10249_v9, %v1147_v2  ;;  %v1149_v41 = vmax.f32 %v958_v12, %v1061_v23  ;;  %v7329_v12 = vld [vmem:[%s10212_s2 + $0x20] ss:$16 sps:$4 sm:$0xff]  }
 0x14d   :  { %v1214_v49 = vadd.f32 %v8671_v32, %v1174_v27  ;;  %v1176_v28 = vmax.f32 %v10250_v60, %v1148_v38  ;;  %v8725_v35 = vrot.slane %v8693_v25, 4 }
 0x14e   :  { %v1215_v29 = vadd.f32 %v8675_v16, %v1175_v59  ;;  %v1177_v3 = vmax.f32 %v10253_v30, %v1149_v41  ;;  %v1296_v31 = vrot.slane %v8698_v46, 4  ;;  %v7332_v59 = vld [vmem:[%s10212_s2 + $0x28] ss:$16 sps:$4 sm:$0xff]   ;;  %v7340_v30 = vld [vmem:[%s10212_s2 + $0x4c] ss:$16 sps:$4 sm:$0xff]  }
 0x14f   :  { %v1216_v36 = vadd.f32 %v8671_v32, %v1176_v28  ;;  %v1242_v63 = vmax.f32 %v1214_v49, 0.0  ;;  %v10254_v49 = vmax.f32 %v8542_v42, %v8544_v44 }
 0x150   :  { %v962_v19 = vpop.f32.mrb[36].mxu0  ;;  %v1217_v50 = vadd.f32 %v8675_v16, %v1177_v3  ;;  %v1065_v53 = vpop.f32.mrb[36].mxu1  ;;  %6063 = vmatprep.mubr.msk.bf16.mxu0 %vm8708_vm2, %v1296_v31  ;;  %6067 = vmatprep.mubr.msk.bf16.mxu1 %vm8708_vm2, %v1296_v31  ;;  %v1243_v26 = vmax.f32 %v1215_v29, 0.0  ;;  %v7337_v29 = vld [vmem:[%s10212_s2 + $0x44] ss:$16 sps:$4 sm:$0xff]  }
 0x151   :  { %v964_v55 = vpop.f32.mrb[37].mxu0  ;;  %v1244_v22 = vmax.f32 %v1216_v36, 0.0  ;;  %v1150_v24 = vmax.f32 %v962_v19, %v1065_v53  ;;  %v1067_v2 = vpop.f32.mrb[37].mxu1  ;;  %6065 = vmatmul.mubr.msk.bf16.vlgmr.msra.gmra.mrb[56].mxu0 %vm8708_vm2, %v8725_v35  ;;  %6069 = vmatmul.mubr.msk.bf16.vlgmr.msra.gmra.mrb[56].mxu1 %vm8708_vm2, %v8725_v35  ;;  %v10256_v36 = vmax.f32 %v8552_v48, %v8556_v51 }
 0x152   :  { %v966_v5 = vpop.f32.mrb[38].mxu0  ;;  %v1245_v27 = vmax.f32 %v1217_v50, 0.0  ;;  %v1151_v38 = vmax.f32 %v964_v55, %v1067_v2  ;;  %2323 = vmatpush1.bf16.msra.mxu0 %v7323_v33  ;;  %2426 = vmatpush1.bf16.msra.mxu1 %v7326_v34  ;;  %v1069_v23 = vpop.f32.mrb[38].mxu1  ;;  %v10255_v33 = vmax.f32 %v8546_v45, %v8550_v47  ;;  %v7335_v45 = vld [vmem:[%s10212_s2 + $0x40] ss:$16 sps:$4 sm:$0xff]  }
 0x153   :  { %v968_v9 = vpop.f32.mrb[39].mxu0  ;;  %v8750_v41 = vpack.c.bf16 %v1244_v22, %v1242_v63  ;;  %v1178_v60 = vmax.f32 %v10254_v49, %v1150_v24  ;;  %v1152_v28 = vmax.f32 %v966_v5, %v1069_v23  ;;  %v1071_v40 = vpop.f32.mrb[39].mxu1  ;;  %2324 = vmatprep.subr.bf16.mxu0 %v7331_v37  ;;  %2427 = vmatprep.subr.bf16.mxu1 %v7334_v39  ;;  %v7338_v47 = vld [vmem:[%s10212_s2 + $0x48] ss:$16 sps:$4 sm:$0xff]   ;;  %v7343_v24 = vld [vmem:[%s10212_s2 + $0x64] ss:$16 sps:$4 sm:$0xff]  }
 0x154   :  { %v8761_v3 = vpack.c.bf16 %v1245_v27, %v1243_v26  ;;  %v1179_v34 = vmax.f32 %v10255_v33, %v1151_v38  ;;  %v1153_v42 = vmax.f32 %v968_v9, %v1071_v40  ;;  %v10257_v39 = vmax.f32 %v8558_v52, %v8562_v54  ;;  %v7346_v2 = vld [vmem:[%s10212_s2 + $0x6c] ss:$16 sps:$4 sm:$0xff]   ;;  %v7344_v40 = vld [vmem:[%s10212_s2 + $0x68] ss:$16 sps:$4 sm:$0xff]  }
 0x155   :  { %v1218_v44 = vadd.f32 %v8671_v32, %v1178_v60  ;;  %v1180_v19 = vmax.f32 %v10256_v36, %v1152_v28  ;;  %v1297_v48 = vrot.slane %v8750_v41, 4 }
 0x156   :  { %v1219_v37 = vadd.f32 %v8675_v16, %v1179_v34  ;;  %v1181_v50 = vmax.f32 %v10257_v39, %v1153_v42  ;;  %2325 = vmatpush1.bf16.msra.mxu0 %v7329_v12  ;;  %2428 = vmatpush1.bf16.msra.mxu1 %v7332_v59  ;;  %v1299_v53 = vrot.slane %v8761_v3, 4  ;;  %v10260_v39 = vmax.f32 %v8576_v62, %v8580_v0 }
 0x157   :  { %v1220_v51 = vadd.f32 %v8671_v32, %v1180_v19  ;;  %2326 = vmatprep.subr.bf16.mxu0 %v7337_v29  ;;  %2429 = vmatprep.subr.bf16.mxu1 %v7340_v30  ;;  %v1246_v5 = vmax.f32 %v1218_v44, 0.0  ;;  %v8802_v60 = vsel %vm1294_vm1, %v8725_v35, %v1297_v48  ;;  %v10258_v30 = vmax.f32 %v8566_v56, %v8568_v57  ;;  %v7349_v35 = vld [vmem:[%s10212_s2 + $0x84] ss:$16 sps:$4 sm:$0xff]   ;;  %v7352_v44 = vld [vmem:[%s10212_s2 + $0x8c] ss:$16 sps:$4 sm:$0xff]  }
 0x158   :  { %v972_v55 = vpop.f32.mrb[40].mxu0  ;;  %v1221_v52 = vadd.f32 %v8675_v16, %v1181_v50  ;;  %v1075_v54 = vpop.f32.mrb[40].mxu1  ;;  %v8785_v22 = vsel %vm1294_vm1, %v1296_v31, %v1299_v53  ;;  %v7341_v31 = vld [vmem:[%s10212_s2 + $0x60] ss:$16 sps:$4 sm:$0xff]   ;;  %v1247_v23 = vmax.f32 %v1219_v37, 0.0  ;;  %v10259_v56 = vmax.f32 %v8570_v58, %v8574_v61 }
 0x159   :  { %v974_v63 = vpop.f32.mrb[41].mxu0  ;;  %v1248_v12 = vmax.f32 %v1220_v51, 0.0  ;;  %v1154_v26 = vmax.f32 %v972_v55, %v1075_v54  ;;  %v1077_v27 = vpop.f32.mrb[41].mxu1  ;;  %1838 = vmatprep.mubr.bf16.mxu0 %v8785_v22  ;;  %1941 = vmatprep.mubr.bf16.mxu1 %v8785_v22  ;;  %v7347_v58 = vld [vmem:[%s10212_s2 + $0x80] ss:$16 sps:$4 sm:$0xff]  }
 0x15a   :  { %v976_v38 = vpop.f32.mrb[42].mxu0  ;;  %v1249_v9 = vmax.f32 %v1221_v52, 0.0  ;;  %v1155_v59 = vmax.f32 %v974_v63, %v1077_v27  ;;  %2327 = vmatpush1.bf16.msra.mxu0 %v7335_v45  ;;  %2430 = vmatpush1.bf16.msra.mxu1 %v7338_v47  ;;  %v1079_v49 = vpop.f32.mrb[42].mxu1  ;;  %v10261_v47 = vmax.f32 %v8582_v1, %v8586_v4  ;;  %v7350_v61 = vld [vmem:[%s10212_s2 + $0x88] ss:$16 sps:$4 sm:$0xff]  }
 0x15b   :  { %v978_v28 = vpop.f32.mrb[43].mxu0  ;;  %v8807_v29 = vpack.c.bf16 %v1248_v12, %v1246_v5  ;;  %v1182_v33 = vmax.f32 %v10258_v30, %v1154_v26  ;;  %v1156_v34 = vmax.f32 %v976_v38, %v1079_v49  ;;  %1839 = vmatmul.mubr.bf16.gmra.mrb[60].mxu0 %v8802_v60  ;;  %1942 = vmatmul.mubr.bf16.gmra.mrb[60].mxu1 %v8802_v60  ;;  %v1081_v42 = vpop.f32.mrb[43].mxu1 }
 0x15c   :  { %v8820_v36 = vpack.c.bf16 %v1249_v9, %v1247_v23  ;;  %v1183_v57 = vmax.f32 %v10259_v56, %v1155_v59  ;;  %v1157_v19 = vmax.f32 %v978_v28, %v1081_v42  ;;  %2328 = vmatprep.subr.bf16.mxu0 %v7343_v24  ;;  %2431 = vmatprep.subr.bf16.mxu1 %v7346_v2  ;;  %v7355_v24 = vld [vmem:[%s10212_s2 + $0xa4] ss:$16 sps:$4 sm:$0xff]   ;;  %v7358_v2 = vld [vmem:[%s10212_s2 + $0xac] ss:$16 sps:$4 sm:$0xff]  }
 0x15d   :  { %v1222_v37 = vadd.f32 %v8671_v32, %v1182_v33  ;;  %v1184_v50 = vmax.f32 %v10260_v39, %v1156_v34  ;;  %v1301_v62 = vrot.slane %v8807_v29, 4  ;;  %v10262_v33 = vmax.f32 %v8590_v6, %v8592_v7 }
 0x15e   :  { %v1223_v45 = vadd.f32 %v8675_v16, %v1183_v57  ;;  %v1185_v51 = vmax.f32 %v10261_v47, %v1157_v19  ;;  %2329 = vmatpush1.bf16.msra.mxu0 %v7341_v31  ;;  %2432 = vmatpush1.bf16.msra.mxu1 %v7344_v40  ;;  %v1303_v55 = vrot.slane %v8820_v36, 4  ;;  %v7356_v40 = vld [vmem:[%s10212_s2 + $0xa8] ss:$16 sps:$4 sm:$0xff]   ;;  %v10263_v6 = vmax.f32 %v8594_v8, %v8598_v10  ;;  %v7359_v8 = vld [vmem:[%s10212_s2 + $0xc0] ss:$16 sps:$4 sm:$0xff]  }
 0x15f   :  { %v1224_v0 = vadd.f32 %v8671_v32, %v1184_v50  ;;  %2330 = vmatprep.subr.bf16.mxu0 %v7349_v35  ;;  %2433 = vmatprep.subr.bf16.mxu1 %v7352_v44  ;;  %v1250_v5 = vmax.f32 %v1222_v37, 0.0  ;;  %v8862_v49 = vsel %vm1294_vm1, %v1297_v48, %v1301_v62  ;;  %v7361_v48 = vld [vmem:[%s10212_s2 + $0xc4] ss:$16 sps:$4 sm:$0xff]   ;;  %v7364_v44 = vld [vmem:[%s10212_s2 + $0xcc] ss:$16 sps:$4 sm:$0xff]   ;;  %v10264_v37 = vmax.f32 %v8600_v11, %v8604_v14 }
 0x160   :  { %v982_v52 = vpop.f32.mrb[44].mxu0  ;;  %v1225_v1 = vadd.f32 %v8675_v16, %v1185_v51  ;;  %v1085_v4 = vpop.f32.mrb[44].mxu1  ;;  %v8844_v63 = vsel %vm1294_vm1, %v1299_v53, %v1303_v55  ;;  %v7353_v53 = vld [vmem:[%s10212_s2 + $0xa0] ss:$16 sps:$4 sm:$0xff]   ;;  %v1251_v31 = vmax.f32 %v1223_v45, 0.0  ;;  %v10265_v45 = vmax.f32 %v8606_v15, %v8610_v17 }
 0x161   :  { %v984_v54 = vpop.f32.mrb[45].mxu0  ;;  %v1252_v12 = vmax.f32 %v1224_v0, 0.0  ;;  %v1158_v26 = vmax.f32 %v982_v52, %v1085_v4  ;;  %v1087_v27 = vpop.f32.mrb[45].mxu1  ;;  %1848 = vmatprep.mubr.bf16.mxu0 %v8844_v63  ;;  %1951 = vmatprep.mubr.bf16.mxu1 %v8844_v63  ;;  %v7362_v10 = vld [vmem:[%s10212_s2 + $0xc8] ss:$16 sps:$4 sm:$0xff]  }
 0x162   :  { %v986_v38 = vpop.f32.mrb[46].mxu0  ;;  %v1253_v23 = vmax.f32 %v1225_v1, 0.0  ;;  %v1159_v9 = vmax.f32 %v984_v54, %v1087_v27  ;;  %2331 = vmatpush1.bf16.msra.mxu0 %v7347_v58  ;;  %2434 = vmatpush1.bf16.msra.mxu1 %v7350_v61  ;;  %v1089_v59 = vpop.f32.mrb[46].mxu1  ;;  %v7367_v52 = vld [vmem:[%s10212_s2 + $0xe4] ss:$16 sps:$4 sm:$0xff]  }
 0x163   :  { %v988_v28 = vpop.f32.mrb[47].mxu0  ;;  %v8867_v30 = vpack.c.bf16 %v1252_v12, %v1250_v5  ;;  %v1186_v34 = vmax.f32 %v10262_v33, %v1158_v26  ;;  %v1160_v42 = vmax.f32 %v986_v38, %v1089_v59  ;;  %1849 = vmatmul.mubr.bf16.gmra.mrb[64].mxu0 %v8862_v49  ;;  %1952 = vmatmul.mubr.bf16.gmra.mrb[64].mxu1 %v8862_v49  ;;  %v1091_v35 = vpop.f32.mrb[47].mxu1  ;;  %v7370_v1 = vld [vmem:[%s10212_s2 + $0xec] ss:$16 sps:$4 sm:$0xff]  }
 0x164   :  { %v8880_v56 = vpack.c.bf16 %v1253_v23, %v1251_v31  ;;  %v1187_v7 = vmax.f32 %v10263_v6, %v1159_v9  ;;  %v1161_v57 = vmax.f32 %v988_v28, %v1091_v35  ;;  %2332 = vmatprep.subr.bf16.mxu0 %v7355_v24  ;;  %2435 = vmatprep.subr.bf16.mxu1 %v7358_v2  ;;  %v7368_v23 = vld [vmem:[%s10212_s2 + $0xe8] ss:$16 sps:$4 sm:$0xff]  }
 0x165   :  { %v1226_v19 = vadd.f32 %v8671_v32, %v1186_v34  ;;  %v1188_v39 = vmax.f32 %v10264_v37, %v1160_v42  ;;  %v1305_v11 = vrot.slane %v8867_v30, 4  ;;  %v10266_v59 = vmax.f32 %v8614_v20, %v8616_v21  ;;  %v7376_v34 = vld [vmem:[%s10212_s2 + $0x10c] ss:$16 sps:$4 sm:$0xff]   ;;  %v10271_v37 = vld [vmem:[#allocation4_spill] sm:$0xff] }
 0x166   :  { %v1227_v50 = vadd.f32 %v8675_v16, %v1187_v7  ;;  %v1189_v47 = vmax.f32 %v10265_v45, %v1161_v57  ;;  %2333 = vmatpush1.bf16.msra.mxu0 %v7353_v53  ;;  %2436 = vmatpush1.bf16.msra.mxu1 %v7356_v40  ;;  %v1307_v51 = vrot.slane %v8880_v56, 4  ;;  %v10267_v20 = vmax.f32 %v8618_v43, %v8622_v13  ;;  %v10269_v6 = vld [vmem:[#allocation3_spill] sm:$0xff]  ;;  %v7371_v13 = vld [vmem:[%s10212_s2 + $0x100] ss:$16 sps:$4 sm:$0xff]  }
 0x167   :  { %v1228_v14 = vadd.f32 %v8671_v32, %v1188_v39  ;;  %2334 = vmatprep.subr.bf16.mxu0 %v7361_v48  ;;  %2437 = vmatprep.subr.bf16.mxu1 %v7364_v44  ;;  %v1254_v4 = vmax.f32 %v1226_v19, 0.0  ;;  %v8922_v53 = vsel %vm1294_vm1, %v1301_v62, %v1305_v11  ;;  %v7373_v62 = vld [vmem:[%s10212_s2 + $0x104] ss:$16 sps:$4 sm:$0xff]   ;;  %v10272_v39 = vld [vmem:[#allocation5_spill] sm:$0xff] }
 0x168   :  { %v992_v58 = vpop.f32.mrb[48].mxu0  ;;  %v1229_v15 = vadd.f32 %v8675_v16, %v1189_v47  ;;  %v1095_v17 = vpop.f32.mrb[48].mxu1  ;;  %v8904_v0 = vsel %vm1294_vm1, %v1303_v55, %v1307_v51  ;;  %v7365_v55 = vld [vmem:[%s10212_s2 + $0xe0] ss:$16 sps:$4 sm:$0xff]   ;;  %v1255_v12 = vmax.f32 %v1227_v50, 0.0  ;;  %v10273_v50 = vmax.f32 %v10271_v37, %v10272_v39  ;;  %v10281_v39 = vld [vmem:[#allocation11_spill] sm:$0xff] }
 0x169   :  { %v994_v61 = vpop.f32.mrb[49].mxu0  ;;  %v1256_v54 = vmax.f32 %v1228_v14, 0.0  ;;  %v1162_v24 = vmax.f32 %v992_v58, %v1095_v17  ;;  %v1097_v2 = vpop.f32.mrb[49].mxu1  ;;  %1858 = vmatprep.mubr.bf16.mxu0 %v8904_v0  ;;  %1961 = vmatprep.mubr.bf16.mxu1 %v8904_v0  ;;  %v10268_v44 = vld [vmem:[#allocation2_spill] sm:$0xff]  ;;  %v7374_v43 = vld [vmem:[%s10212_s2 + $0x108] ss:$16 sps:$4 sm:$0xff]  }
 0x16a   :  { %v996_v5 = vpop.f32.mrb[50].mxu0  ;;  %v1257_v26 = vmax.f32 %v1229_v15, 0.0  ;;  %v1163_v27 = vmax.f32 %v994_v61, %v1097_v2  ;;  %2335 = vmatpush1.bf16.msra.mxu0 %v7359_v8  ;;  %2438 = vmatpush1.bf16.msra.mxu1 %v7362_v10  ;;  %v1099_v38 = vpop.f32.mrb[50].mxu1  ;;  %v10270_v7 = vmax.f32 %v10268_v44, %v10269_v6  ;;  %v10278_v44 = vld [vmem:[#allocation9_spill] sm:$0xff]  ;;  %v10280_v37 = vld [vmem:[#allocation10_spill] sm:$0xff] }
 0x16b   :  { %v998_v31 = vpop.f32.mrb[51].mxu0  ;;  %v8927_v9 = vpack.c.bf16 %v1256_v54, %v1254_v4  ;;  %v1190_v28 = vmax.f32 %v10266_v59, %v1162_v24  ;;  %v1164_v40 = vmax.f32 %v996_v5, %v1099_v38  ;;  %1859 = vmatmul.mubr.bf16.gmra.mrb[68].mxu0 %v8922_v53  ;;  %1962 = vmatmul.mubr.bf16.gmra.mrb[68].mxu1 %v8922_v53  ;;  %v1101_v33 = vpop.f32.mrb[51].mxu1 }
 0x16c   :  { %v8940_v42 = vpack.c.bf16 %v1257_v26, %v1255_v12  ;;  %v1191_v21 = vmax.f32 %v10267_v20, %v1163_v27  ;;  %v1165_v35 = vmax.f32 %v998_v31, %v1101_v33  ;;  %2336 = vmatprep.subr.bf16.mxu0 %v7367_v52  ;;  %2439 = vmatprep.subr.bf16.mxu1 %v7370_v1  ;;  %v7379_v52 = vld [vmem:[%s10212_s2 + $0x124] ss:$16 sps:$4 sm:$0xff]   ;;  %v7382_v1 = vld [vmem:[%s10212_s2 + $0x12c] ss:$16 sps:$4 sm:$0xff]  }
 0x16d   :  { %v1230_v48 = vadd.f32 %v8671_v32, %v1190_v28  ;;  %v1192_v57 = vmax.f32 %v10270_v7, %v1164_v40  ;;  %v1309_v8 = vrot.slane %v8927_v9, 4  ;;  %v10274_v28 = vld [vmem:[#allocation6_spill] sm:$0xff]  ;;  %v10275_v40 = vld [vmem:[#allocation7_spill] sm:$0xff] }
 0x16e   :  { %v1231_v19 = vadd.f32 %v8675_v16, %v1191_v21  ;;  %v1193_v45 = vmax.f32 %v10273_v50, %v1165_v35  ;;  %2337 = vmatpush1.bf16.msra.mxu0 %v7365_v55  ;;  %2440 = vmatpush1.bf16.msra.mxu1 %v7368_v23  ;;  %v1311_v47 = vrot.slane %v8940_v42, 4  ;;  %v7380_v23 = vld [vmem:[%s10212_s2 + $0x128] ss:$16 sps:$4 sm:$0xff]   ;;  %v10276_v33 = vmax.f32 %v10274_v28, %v10275_v40  ;;  %v7388_v21 = vld [vmem:[%s10212_s2 + $0x14c] ss:$16 sps:$4 sm:$0xff]  }
 0x16f   :  { %v1232_v10 = vadd.f32 %v8671_v32, %v1192_v57  ;;  %2338 = vmatprep.subr.bf16.mxu0 %v7373_v62  ;;  %2441 = vmatprep.subr.bf16.mxu1 %v7376_v34  ;;  %v1258_v4 = vmax.f32 %v1230_v48, 0.0  ;;  %v8982_v38 = vsel %vm1294_vm1, %v1305_v11, %v1309_v8  ;;  %v7385_v11 = vld [vmem:[%s10212_s2 + $0x144] ss:$16 sps:$4 sm:$0xff]   ;;  %v10282_v50 = vmax.f32 %v10280_v37, %v10281_v39  ;;  %v7395_v28 = vld [vmem:[%s10212_s2 + $0x180] ss:$16 sps:$4 sm:$0xff]  }
 0x170   :  { %v1002_v14 = vpop.f32.mrb[52].mxu0  ;;  %v1233_v58 = vadd.f32 %v8675_v16, %v1193_v45  ;;  %v1105_v15 = vpop.f32.mrb[52].mxu1  ;;  %v8964_v61 = vsel %vm1294_vm1, %v1307_v51, %v1311_v47  ;;  %v7377_v51 = vld [vmem:[%s10212_s2 + $0x120] ss:$16 sps:$4 sm:$0xff]   ;;  %v1259_v55 = vmax.f32 %v1231_v19, 0.0 }
 0x171   :  { %v1004_v17 = vpop.f32.mrb[53].mxu0  ;;  %v1260_v54 = vmax.f32 %v1232_v10, 0.0  ;;  %v1166_v24 = vmax.f32 %v1002_v14, %v1105_v15  ;;  %v1107_v2 = vpop.f32.mrb[53].mxu1  ;;  %1868 = vmatprep.mubr.bf16.mxu0 %v8964_v61  ;;  %1971 = vmatprep.mubr.bf16.mxu1 %v8964_v61  ;;  %v10277_v48 = vld [vmem:[#allocation8_spill] sm:$0xff]  ;;  %v10284_v10 = vld [vmem:[#allocation13_spill] sm:$0xff] }
 0x172   :  { %v1006_v5 = vpop.f32.mrb[54].mxu0  ;;  %v1261_v12 = vmax.f32 %v1233_v58, 0.0  ;;  %v1167_v26 = vmax.f32 %v1004_v17, %v1107_v2  ;;  %2339 = vmatpush1.bf16.msra.mxu0 %v7371_v13  ;;  %2442 = vmatpush1.bf16.msra.mxu1 %v7374_v43  ;;  %v1109_v27 = vpop.f32.mrb[54].mxu1  ;;  %v10279_v6 = vmax.f32 %v10277_v48, %v10278_v44  ;;  %v10283_v43 = vld [vmem:[#allocation12_spill] sm:$0xff]  ;;  %v7386_v17 = vld [vmem:[%s10212_s2 + $0x148] ss:$16 sps:$4 sm:$0xff]  }
 0x173   :  { %v1008_v31 = vpop.f32.mrb[55].mxu0  ;;  %v8987_v59 = vpack.c.bf16 %v1260_v54, %v1258_v4  ;;  %v1194_v62 = vmax.f32 %v10276_v33, %v1166_v24  ;;  %v1168_v34 = vmax.f32 %v1006_v5, %v1109_v27  ;;  %1869 = vmatmul.mubr.bf16.gmra.mrb[72].mxu0 %v8982_v38  ;;  %1972 = vmatmul.mubr.bf16.gmra.mrb[72].mxu1 %v8982_v38  ;;  %v1111_v20 = vpop.f32.mrb[55].mxu1  ;;  %v7383_v15 = vld [vmem:[%s10212_s2 + $0x140] ss:$16 sps:$4 sm:$0xff]   ;;  %v7391_v2 = vld [vmem:[%s10212_s2 + $0x164] ss:$16 sps:$4 sm:$0xff]  }
 0x174   :  { %v9000_v35 = vpack.c.bf16 %v1261_v12, %v1259_v55  ;;  %v1195_v7 = vmax.f32 %v10279_v6, %v1167_v26  ;;  %v1169_v57 = vmax.f32 %v1008_v31, %v1111_v20  ;;  %2340 = vmatprep.subr.bf16.mxu0 %v7379_v52  ;;  %2443 = vmatprep.subr.bf16.mxu1 %v7382_v1  ;;  %v7394_v5 = vld [vmem:[%s10212_s2 + $0x16c] ss:$16 sps:$4 sm:$0xff]   ;;  %v7392_v26 = vld [vmem:[%s10212_s2 + $0x168] ss:$16 sps:$4 sm:$0xff]   ;;  %v7397_v31 = vld [vmem:[%s10212_s2 + $0x184] ss:$16 sps:$4 sm:$0xff]  }
 0x175   :  { %v1234_v19 = vadd.f32 %v8671_v32, %v1194_v62  ;;  %v1196_v45 = vmax.f32 %v10282_v50, %v1168_v34  ;;  %v10285_v14 = vmax.f32 %v10283_v43, %v10284_v10  ;;  %v1313_v1 = vrot.slane %v8987_v59, 4  ;;  %v7398_v40 = vld [vmem:[%s10212_s2 + $0x188] ss:$16 sps:$4 sm:$0xff]   ;;  %v7403_v20 = vld [vmem:[%s10212_s2 + $0x1a4] ss:$16 sps:$4 sm:$0xff]  }
 0x176   :  { %v1235_v13 = vadd.f32 %v8675_v16, %v1195_v7  ;;  %2341 = vmatpush1.bf16.msra.mxu0 %v7377_v51  ;;  %2444 = vmatpush1.bf16.msra.mxu1 %v7380_v23  ;;  %v1315_v52 = vrot.slane %v9000_v35, 4  ;;  %v7401_v48 = vld [vmem:[%s10212_s2 + $0x1a0] ss:$16 sps:$4 sm:$0xff]   ;;  %v7404_v44 = vld [vmem:[%s10212_s2 + $0x1a8] ss:$16 sps:$4 sm:$0xff]  }
 0x177   :  { %v1197_v58 = vmax.f32 %v10285_v14, %v1169_v57  ;;  %v1236_v4 = vadd.f32 %v8671_v32, %v1196_v45  ;;  %2342 = vmatprep.subr.bf16.mxu0 %v7385_v11  ;;  %2445 = vmatprep.subr.bf16.mxu1 %v7388_v21  ;;  %v1262_v51 = vmax.f32 %v1234_v19, 0.0  ;;  %v7406_v11 = vld [vmem:[%s10212_s2 + $0x1ac] ss:$16 sps:$4 sm:$0xff]   ;;  %v7409_v6 = vld [vmem:[%s10212_s2 + $0x1c4] ss:$16 sps:$4 sm:$0xff]   ;;  %v7819_v57 = vmov 0  }
 0x178   :  { %v9024_v24 = vsel %vm1294_vm1, %v1311_v47, %v1315_v52  ;;  %v1263_v32 = vmax.f32 %v1235_v13, 0.0  ;;  %v7389_v47 = vld [vmem:[%s10212_s2 + $0x160] ss:$16 sps:$4 sm:$0xff]   ;;  %v7412_v7 = vld [vmem:[%s10212_s2 + $0x1cc] ss:$16 sps:$4 sm:$0xff]  }
 0x179   :  { %v1237_v54 = vadd.f32 %v8675_v16, %v1197_v58  ;;  %v1264_v55 = vmax.f32 %v1236_v4, 0.0  ;;  %1878 = vmatprep.mubr.bf16.mxu0 %v9024_v24  ;;  %1981 = vmatprep.mubr.bf16.mxu1 %v9024_v24  ;;  %v9037_v16 = vsel %vm1294_vm1, %v1309_v8, %v1313_v1  ;;  %v7400_v8 = vld [vmem:[%s10212_s2 + $0x18c] ss:$16 sps:$4 sm:$0xff]   ;;  %v7407_v19 = vld [vmem:[%s10212_s2 + $0x1c0] ss:$16 sps:$4 sm:$0xff]  }
 0x17a   :  { %2343 = vmatpush1.bf16.msra.mxu0 %v7383_v15  ;;  %2446 = vmatpush1.bf16.msra.mxu1 %v7386_v17  ;;  %v7410_v37 = vld [vmem:[%s10212_s2 + $0x1c8] ss:$16 sps:$4 sm:$0xff]   ;;  %v7415_v39 = vld [vmem:[%s10212_s2 + $0x1e4] ss:$16 sps:$4 sm:$0xff]   ;;  %v7418_v50 = vld [vmem:[%s10212_s2 + $0x1ec] ss:$16 sps:$4 sm:$0xff]  }
 0x17b   :  { %v1265_v12 = vmax.f32 %v1237_v54, 0.0  ;;  %v9045_v27 = vpack.c.bf16 %v1264_v55, %v1262_v51  ;;  %1879 = vmatmul.mubr.bf16.gmra.mrb[76].mxu0 %v9037_v16  ;;  %1982 = vmatmul.mubr.bf16.gmra.mrb[76].mxu1 %v9037_v16  ;;  %v7413_v45 = vld [vmem:[%s10212_s2 + $0x1e0] ss:$16 sps:$4 sm:$0xff]   ;;  %v7416_v13 = vld [vmem:[%s10212_s2 + $0x1e8] ss:$16 sps:$4 sm:$0xff]  }
 0x17c   :  { %2344 = vmatprep.subr.bf16.mxu0 %v7391_v2  ;;  %2447 = vmatprep.subr.bf16.mxu1 %v7394_v5  ;;  %v7421_v43 = vld [vmem:[%s10212_s2 + $0x404] ss:$16 sps:$4 sm:$0xff]   ;;  %v7424_v10 = vld [vmem:[%s10212_s2 + $0x40c] ss:$16 sps:$4 sm:$0xff]   ;;  %v7419_v14 = vld [vmem:[%s10212_s2 + $0x400] ss:$16 sps:$4 sm:$0xff]  }
 0x17d   :  { %v9055_v23 = vpack.c.bf16 %v1265_v12, %v1263_v32  ;;  %v9067_v62 = vrot.slane %v9045_v27, 4  ;;  %v7422_v58 = vld [vmem:[%s10212_s2 + $0x408] ss:$16 sps:$4 sm:$0xff]   ;;  %v7427_v15 = vld [vmem:[%s10212_s2 + $0x424] ss:$16 sps:$4 sm:$0xff]  }
 0x17e   :  { %2345 = vmatpush1.bf16.msra.mxu0 %v7389_v47  ;;  %2448 = vmatpush1.bf16.msra.mxu1 %v7392_v26  ;;  %v7430_v17 = vld [vmem:[%s10212_s2 + $0x42c] ss:$16 sps:$4 sm:$0xff]   ;;  %v7433_v4 = vld [vmem:[%s10212_s2 + $0x444] ss:$16 sps:$4 sm:$0xff]   ;;  %v7431_v2 = vld [vmem:[%s10212_s2 + $0x440] ss:$16 sps:$4 sm:$0xff]  }
 0x17f   :  { %v9064_v33 = vrot.slane %v9055_v23, 4  ;;  %2346 = vmatprep.subr.bf16.mxu0 %v7397_v31  ;;  %2449 = vmatprep.subr.bf16.mxu1 %v7400_v8  ;;  %v9083_v21 = vsel %vm1294_vm1, %v1313_v1, %v9067_v62  ;;  %v7428_v1 = vld [vmem:[%s10212_s2 + $0x428] ss:$16 sps:$4 sm:$0xff]   ;;  %v7436_v54 = vld [vmem:[%s10212_s2 + $0x44c] ss:$16 sps:$4 sm:$0xff]  }
 0x180   :  { %v7434_v5 = vld [vmem:[%s10212_s2 + $0x448] ss:$16 sps:$4 sm:$0xff]   ;;  %v7439_v51 = vld [vmem:[%s10212_s2 + $0x464] ss:$16 sps:$4 sm:$0xff]   ;;  %v7442_v55 = vld [vmem:[%s10212_s2 + $0x46c] ss:$16 sps:$4 sm:$0xff]  }
 0x181   :  { %v9071_v34 = vsel %vm1294_vm1, %v1315_v52, %v9064_v33  ;;  %v7425_v52 = vld [vmem:[%s10212_s2 + $0x420] ss:$16 sps:$4 sm:$0xff]   ;;  %v7440_v12 = vld [vmem:[%s10212_s2 + $0x468] ss:$16 sps:$4 sm:$0xff]   ;;  %v7445_v47 = vld [vmem:[%s10212_s2 + $0x484] ss:$16 sps:$4 sm:$0xff]  }
 0x182   :  { %1888 = vmatprep.mubr.bf16.mxu0 %v9071_v34  ;;  %1991 = vmatprep.mubr.bf16.mxu1 %v9071_v34  ;;  %v7437_v32 = vld [vmem:[%s10212_s2 + $0x460] ss:$16 sps:$4 sm:$0xff]   ;;  %v7448_v26 = vld [vmem:[%s10212_s2 + $0x48c] ss:$16 sps:$4 sm:$0xff]   ;;  %v7446_v8 = vld [vmem:[%s10212_s2 + $0x488] ss:$16 sps:$4 sm:$0xff]  }
 0x183   :  { %2347 = vmatpush1.bf16.msra.mxu0 %v7395_v28  ;;  %2450 = vmatpush1.bf16.msra.mxu1 %v7398_v40  ;;  %v7443_v31 = vld [vmem:[%s10212_s2 + $0x480] ss:$16 sps:$4 sm:$0xff]   ;;  %v7451_v28 = vld [vmem:[%s10212_s2 + $0x4a4] ss:$16 sps:$4 sm:$0xff]   ;;  %v7454_v40 = vld [vmem:[%s10212_s2 + $0x4ac] ss:$16 sps:$4 sm:$0xff]  }
 0x184   :  { %1889 = vmatmul.mubr.bf16.gmra.mrb[80].mxu0 %v9083_v21  ;;  %1992 = vmatmul.mubr.bf16.gmra.mrb[80].mxu1 %v9083_v21 }
 0x185   :  { %2348 = vmatprep.subr.bf16.mxu0 %v7403_v20  ;;  %2451 = vmatprep.subr.bf16.mxu1 %v7406_v11  ;;  %v7449_v20 = vld [vmem:[%s10212_s2 + $0x4a0] ss:$16 sps:$4 sm:$0xff]   ;;  %v7452_v11 = vld [vmem:[%s10212_s2 + $0x4a8] ss:$16 sps:$4 sm:$0xff]  }
 0x186   :  { %2354 = vmatprep.mubr.bf16.mxu0 %v7819_v57  ;;  %2457 = vmatprep.mubr.bf16.mxu1 %v7819_v57 }
 0x187   :  { %2349 = vmatpush1.bf16.msra.mxu0 %v7401_v48  ;;  %2452 = vmatpush1.bf16.msra.mxu1 %v7404_v44  ;;  %v7457_v48 = vld [vmem:[%s10212_s2 + $0x4c4] ss:$16 sps:$4 sm:$0xff]   ;;  %v7460_v44 = vld [vmem:[%s10212_s2 + $0x4cc] ss:$16 sps:$4 sm:$0xff]  }
 0x188   :  { %2350 = vmatprep.subr.bf16.mxu0 %v7409_v6  ;;  %2453 = vmatprep.subr.bf16.mxu1 %v7412_v7  ;;  %v7455_v6 = vld [vmem:[%s10212_s2 + $0x4c0] ss:$16 sps:$4 sm:$0xff]   ;;  %v7458_v7 = vld [vmem:[%s10212_s2 + $0x4c8] ss:$16 sps:$4 sm:$0xff]  }
 0x18b   :  { %2351 = vmatpush1.bf16.msra.mxu0 %v7407_v19  ;;  %2454 = vmatpush1.bf16.msra.mxu1 %v7410_v37  ;;  %v7463_v19 = vld [vmem:[%s10212_s2 + $0x4e4] ss:$16 sps:$4 sm:$0xff]   ;;  %v7466_v37 = vld [vmem:[%s10212_s2 + $0x4ec] ss:$16 sps:$4 sm:$0xff]  }
 0x18c   :  { %2352 = vmatprep.subr.bf16.mxu0 %v7415_v39  ;;  %2455 = vmatprep.subr.bf16.mxu1 %v7418_v50  ;;  %v7461_v39 = vld [vmem:[%s10212_s2 + $0x4e0] ss:$16 sps:$4 sm:$0xff]   ;;  %v7464_v50 = vld [vmem:[%s10212_s2 + $0x4e8] ss:$16 sps:$4 sm:$0xff]  }
 0x18f   :  { %2353 = vmatpush1.bf16.msra.mxu0 %v7413_v45  ;;  %2456 = vmatpush1.bf16.msra.mxu1 %v7416_v13  ;;  %v7469_v45 = vld [vmem:[%s10212_s2 + $0x504] ss:$16 sps:$4 sm:$0xff]   ;;  %v7472_v13 = vld [vmem:[%s10212_s2 + $0x50c] ss:$16 sps:$4 sm:$0xff]  }
 0x190   :  { %2913 = vmatprep.subr.bf16.mxu0 %v7421_v43  ;;  %3016 = vmatprep.subr.bf16.mxu1 %v7424_v10  ;;  %v7467_v43 = vld [vmem:[%s10212_s2 + $0x500] ss:$16 sps:$4 sm:$0xff]   ;;  %v7470_v10 = vld [vmem:[%s10212_s2 + $0x508] ss:$16 sps:$4 sm:$0xff]  }
 0x192   :  { %2355 = vmatmul.mubr.bf16.vlgmr.msra.gmra.mrb[56].mxu0 %v7819_v57  ;;  %2458 = vmatmul.mubr.bf16.vlgmr.msra.gmra.mrb[56].mxu1 %v7819_v57 }
 0x193   :  { %2364 = vmatprep.mubr.bf16.mxu0 %v8698_v46  ;;  %2467 = vmatprep.mubr.bf16.mxu1 %v8698_v46 }
 0x194   :  { %2914 = vmatpush1.bf16.msra.mxu0 %v7419_v14  ;;  %3017 = vmatpush1.bf16.msra.mxu1 %v7422_v58  ;;  %v7475_v14 = vld [vmem:[%s10212_s2 + $0x524] ss:$16 sps:$4 sm:$0xff]   ;;  %v7478_v58 = vld [vmem:[%s10212_s2 + $0x52c] ss:$16 sps:$4 sm:$0xff]  }
 0x195   :  { %2915 = vmatprep.subr.bf16.mxu0 %v7427_v15  ;;  %3018 = vmatprep.subr.bf16.mxu1 %v7430_v17  ;;  %v7473_v15 = vld [vmem:[%s10212_s2 + $0x520] ss:$16 sps:$4 sm:$0xff]   ;;  %v7476_v17 = vld [vmem:[%s10212_s2 + $0x528] ss:$16 sps:$4 sm:$0xff]  }
 0x198   :  { %2916 = vmatpush1.bf16.msra.mxu0 %v7425_v52  ;;  %3019 = vmatpush1.bf16.msra.mxu1 %v7428_v1  ;;  %v7481_v52 = vld [vmem:[%s10212_s2 + $0x544] ss:$16 sps:$4 sm:$0xff]   ;;  %v7484_v1 = vld [vmem:[%s10212_s2 + $0x54c] ss:$16 sps:$4 sm:$0xff]  }
 0x199   :  { %2917 = vmatprep.subr.bf16.mxu0 %v7433_v4  ;;  %3020 = vmatprep.subr.bf16.mxu1 %v7436_v54  ;;  %v7479_v4 = vld [vmem:[%s10212_s2 + $0x540] ss:$16 sps:$4 sm:$0xff]   ;;  %v7482_v54 = vld [vmem:[%s10212_s2 + $0x548] ss:$16 sps:$4 sm:$0xff]  }
 0x19a   :  { %2365 = vmatmul.mubr.bf16.gmra.mrb[60].mxu0 %v8693_v25  ;;  %2468 = vmatmul.mubr.bf16.gmra.mrb[60].mxu1 %v8693_v25 }
 0x19b   :  { %2374 = vmatprep.mubr.bf16.mxu0 %v8761_v3  ;;  %2477 = vmatprep.mubr.bf16.mxu1 %v8761_v3 }
 0x19c   :  { %2918 = vmatpush1.bf16.msra.mxu0 %v7431_v2  ;;  %3021 = vmatpush1.bf16.msra.mxu1 %v7434_v5  ;;  %v7487_v2 = vld [vmem:[%s10212_s2 + $0x564] ss:$16 sps:$4 sm:$0xff]   ;;  %v7490_v5 = vld [vmem:[%s10212_s2 + $0x56c] ss:$16 sps:$4 sm:$0xff]  }
 0x19d   :  { %2919 = vmatprep.subr.bf16.mxu0 %v7439_v51  ;;  %3022 = vmatprep.subr.bf16.mxu1 %v7442_v55  ;;  %v7485_v51 = vld [vmem:[%s10212_s2 + $0x560] ss:$16 sps:$4 sm:$0xff]   ;;  %v7488_v55 = vld [vmem:[%s10212_s2 + $0x568] ss:$16 sps:$4 sm:$0xff]  }
 0x1a0   :  { %2920 = vmatpush1.bf16.msra.mxu0 %v7437_v32  ;;  %3023 = vmatpush1.bf16.msra.mxu1 %v7440_v12  ;;  %v7493_v32 = vld [vmem:[%s10212_s2 + $0x584] ss:$16 sps:$4 sm:$0xff]   ;;  %v7496_v12 = vld [vmem:[%s10212_s2 + $0x58c] ss:$16 sps:$4 sm:$0xff]  }
 0x1a1   :  { %2921 = vmatprep.subr.bf16.mxu0 %v7445_v47  ;;  %3024 = vmatprep.subr.bf16.mxu1 %v7448_v26  ;;  %v7491_v47 = vld [vmem:[%s10212_s2 + $0x580] ss:$16 sps:$4 sm:$0xff]   ;;  %v7494_v26 = vld [vmem:[%s10212_s2 + $0x588] ss:$16 sps:$4 sm:$0xff]  }
 0x1a2   :  { %2375 = vmatmul.mubr.bf16.gmra.mrb[64].mxu0 %v8750_v41  ;;  %2478 = vmatmul.mubr.bf16.gmra.mrb[64].mxu1 %v8750_v41 }
 0x1a3   :  { %2384 = vmatprep.mubr.bf16.mxu0 %v8820_v36  ;;  %2487 = vmatprep.mubr.bf16.mxu1 %v8820_v36 }
 0x1a4   :  { %2922 = vmatpush1.bf16.msra.mxu0 %v7443_v31  ;;  %3025 = vmatpush1.bf16.msra.mxu1 %v7446_v8  ;;  %v7499_v31 = vld [vmem:[%s10212_s2 + $0x5a4] ss:$16 sps:$4 sm:$0xff]   ;;  %v7502_v8 = vld [vmem:[%s10212_s2 + $0x5ac] ss:$16 sps:$4 sm:$0xff]  }
 0x1a5   :  { %2923 = vmatprep.subr.bf16.mxu0 %v7451_v28  ;;  %3026 = vmatprep.subr.bf16.mxu1 %v7454_v40  ;;  %v7497_v28 = vld [vmem:[%s10212_s2 + $0x5a0] ss:$16 sps:$4 sm:$0xff]   ;;  %v7500_v40 = vld [vmem:[%s10212_s2 + $0x5a8] ss:$16 sps:$4 sm:$0xff]  }
 0x1a8   :  { %2924 = vmatpush1.bf16.msra.mxu0 %v7449_v20  ;;  %3027 = vmatpush1.bf16.msra.mxu1 %v7452_v11  ;;  %v7505_v20 = vld [vmem:[%s10212_s2 + $0x5c4] ss:$16 sps:$4 sm:$0xff]   ;;  %v7503_v11 = vld [vmem:[%s10212_s2 + $0x5c0] ss:$16 sps:$4 sm:$0xff]  }
 0x1a9   :  { %2925 = vmatprep.subr.bf16.mxu0 %v7457_v48  ;;  %3028 = vmatprep.subr.bf16.mxu1 %v7460_v44  ;;  %v7506_v48 = vld [vmem:[%s10212_s2 + $0x5c8] ss:$16 sps:$4 sm:$0xff]   ;;  %v7511_v44 = vld [vmem:[%s10212_s2 + $0x5e4] ss:$16 sps:$4 sm:$0xff]  }
 0x1aa   :  { %2385 = vmatmul.mubr.bf16.gmra.mrb[68].mxu0 %v8807_v29  ;;  %2488 = vmatmul.mubr.bf16.gmra.mrb[68].mxu1 %v8807_v29 }
 0x1ab   :  { %2394 = vmatprep.mubr.bf16.mxu0 %v8880_v56  ;;  %2497 = vmatprep.mubr.bf16.mxu1 %v8880_v56 }
 0x1ac   :  { %2926 = vmatpush1.bf16.msra.mxu0 %v7455_v6  ;;  %3029 = vmatpush1.bf16.msra.mxu1 %v7458_v7  ;;  %v7514_v6 = vld [vmem:[%s10212_s2 + $0x5ec] ss:$16 sps:$4 sm:$0xff]   ;;  %v7509_v7 = vld [vmem:[%s10212_s2 + $0x5e0] ss:$16 sps:$4 sm:$0xff]  }
 0x1ad   :  { %2927 = vmatprep.subr.bf16.mxu0 %v7463_v19  ;;  %3030 = vmatprep.subr.bf16.mxu1 %v7466_v37  ;;  %v7512_v19 = vld [vmem:[%s10212_s2 + $0x5e8] ss:$16 sps:$4 sm:$0xff]   ;;  %v7517_v37 = vld [vmem:[%s10212_s2 + $0x604] ss:$16 sps:$4 sm:$0xff]  }
 0x1b0   :  { %2928 = vmatpush1.bf16.msra.mxu0 %v7461_v39  ;;  %3031 = vmatpush1.bf16.msra.mxu1 %v7464_v50  ;;  %v7520_v39 = vld [vmem:[%s10212_s2 + $0x60c] ss:$16 sps:$4 sm:$0xff]   ;;  %v7515_v50 = vld [vmem:[%s10212_s2 + $0x600] ss:$16 sps:$4 sm:$0xff]  }
 0x1b1   :  { %2929 = vmatprep.subr.bf16.mxu0 %v7469_v45  ;;  %3032 = vmatprep.subr.bf16.mxu1 %v7472_v13  ;;  %v7518_v45 = vld [vmem:[%s10212_s2 + $0x608] ss:$16 sps:$4 sm:$0xff]   ;;  %v7523_v13 = vld [vmem:[%s10212_s2 + $0x624] ss:$16 sps:$4 sm:$0xff]  }
 0x1b2   :  { %2395 = vmatmul.mubr.bf16.gmra.mrb[72].mxu0 %v8867_v30  ;;  %2498 = vmatmul.mubr.bf16.gmra.mrb[72].mxu1 %v8867_v30 }
 0x1b3   :  { %2404 = vmatprep.mubr.bf16.mxu0 %v8940_v42  ;;  %2507 = vmatprep.mubr.bf16.mxu1 %v8940_v42 }
 0x1b4   :  { %2930 = vmatpush1.bf16.msra.mxu0 %v7467_v43  ;;  %3033 = vmatpush1.bf16.msra.mxu1 %v7470_v10  ;;  %v7526_v43 = vld [vmem:[%s10212_s2 + $0x62c] ss:$16 sps:$4 sm:$0xff]   ;;  %v7521_v10 = vld [vmem:[%s10212_s2 + $0x620] ss:$16 sps:$4 sm:$0xff]  }
 0x1b5   :  { %2931 = vmatprep.subr.bf16.mxu0 %v7475_v14  ;;  %3034 = vmatprep.subr.bf16.mxu1 %v7478_v58  ;;  %v7524_v14 = vld [vmem:[%s10212_s2 + $0x628] ss:$16 sps:$4 sm:$0xff]   ;;  %v7532_v58 = vld [vmem:[%s10212_s2 + $0x64c] ss:$16 sps:$4 sm:$0xff]  }
 0x1b8   :  { %2932 = vmatpush1.bf16.msra.mxu0 %v7473_v15  ;;  %3035 = vmatpush1.bf16.msra.mxu1 %v7476_v17  ;;  %v7527_v15 = vld [vmem:[%s10212_s2 + $0x640] ss:$16 sps:$4 sm:$0xff]   ;;  %v7530_v17 = vld [vmem:[%s10212_s2 + $0x648] ss:$16 sps:$4 sm:$0xff]  }
 0x1b9   :  { %2933 = vmatprep.subr.bf16.mxu0 %v7481_v52  ;;  %3036 = vmatprep.subr.bf16.mxu1 %v7484_v1  ;;  %v7535_v52 = vld [vmem:[%s10212_s2 + $0x664] ss:$16 sps:$4 sm:$0xff]   ;;  %v7538_v1 = vld [vmem:[%s10212_s2 + $0x66c] ss:$16 sps:$4 sm:$0xff]  }
 0x1ba   :  { %2405 = vmatmul.mubr.bf16.gmra.mrb[76].mxu0 %v8927_v9  ;;  %2508 = vmatmul.mubr.bf16.gmra.mrb[76].mxu1 %v8927_v9 }
 0x1bb   :  { %2414 = vmatprep.mubr.bf16.mxu0 %v9000_v35  ;;  %2517 = vmatprep.mubr.bf16.mxu1 %v9000_v35 }
 0x1bc   :  { %2934 = vmatpush1.bf16.msra.mxu0 %v7479_v4  ;;  %3037 = vmatpush1.bf16.msra.mxu1 %v7482_v54  ;;  %v7533_v4 = vld [vmem:[%s10212_s2 + $0x660] ss:$16 sps:$4 sm:$0xff]   ;;  %v7536_v54 = vld [vmem:[%s10212_s2 + $0x668] ss:$16 sps:$4 sm:$0xff]  }
 0x1bd   :  { %2935 = vmatprep.subr.bf16.mxu0 %v7487_v2  ;;  %3038 = vmatprep.subr.bf16.mxu1 %v7490_v5  ;;  %v7541_v2 = vld [vmem:[%s10212_s2 + $0x684] ss:$16 sps:$4 sm:$0xff]   ;;  %v7544_v5 = vld [vmem:[%s10212_s2 + $0x68c] ss:$16 sps:$4 sm:$0xff]  }
 0x1c0   :  { %2936 = vmatpush1.bf16.msra.mxu0 %v7485_v51  ;;  %3039 = vmatpush1.bf16.msra.mxu1 %v7488_v55  ;;  %v7539_v51 = vld [vmem:[%s10212_s2 + $0x680] ss:$16 sps:$4 sm:$0xff]   ;;  %v7542_v55 = vld [vmem:[%s10212_s2 + $0x688] ss:$16 sps:$4 sm:$0xff]  }
 0x1c1   :  { %2937 = vmatprep.subr.bf16.mxu0 %v7493_v32  ;;  %3040 = vmatprep.subr.bf16.mxu1 %v7496_v12  ;;  %v7547_v32 = vld [vmem:[%s10212_s2 + $0x6a4] ss:$16 sps:$4 sm:$0xff]   ;;  %v7550_v12 = vld [vmem:[%s10212_s2 + $0x6ac] ss:$16 sps:$4 sm:$0xff]  }
 0x1c2   :  { %2415 = vmatmul.mubr.bf16.gmra.mrb[80].mxu0 %v8987_v59  ;;  %2518 = vmatmul.mubr.bf16.gmra.mrb[80].mxu1 %v8987_v59 }
 0x1c3   :  { %2945 = vmatprep.mubr.bf16.mxu0 %v8698_v46  ;;  %3048 = vmatprep.mubr.bf16.mxu1 %v8698_v46  ;;  %v7508_v46 = vld [vmem:[%s10212_s2 + $0x5cc] ss:$16 sps:$4 sm:$0xff]  }
 0x1c4   :  { %2938 = vmatpush1.bf16.msra.mxu0 %v7491_v47  ;;  %3041 = vmatpush1.bf16.msra.mxu1 %v7494_v26  ;;  %v7545_v47 = vld [vmem:[%s10212_s2 + $0x6a0] ss:$16 sps:$4 sm:$0xff]   ;;  %v7548_v26 = vld [vmem:[%s10212_s2 + $0x6a8] ss:$16 sps:$4 sm:$0xff]  }
 0x1c5   :  { %2939 = vmatprep.subr.bf16.mxu0 %v7499_v31  ;;  %3042 = vmatprep.subr.bf16.mxu1 %v7502_v8  ;;  %v7553_v31 = vld [vmem:[%s10212_s2 + $0x6c4] ss:$16 sps:$4 sm:$0xff]   ;;  %v7556_v8 = vld [vmem:[%s10212_s2 + $0x6cc] ss:$16 sps:$4 sm:$0xff]  }
 0x1c8   :  { %2940 = vmatpush1.bf16.msra.mxu0 %v7497_v28  ;;  %3043 = vmatpush1.bf16.msra.mxu1 %v7500_v40  ;;  %v7551_v28 = vld [vmem:[%s10212_s2 + $0x6c0] ss:$16 sps:$4 sm:$0xff]   ;;  %v7554_v40 = vld [vmem:[%s10212_s2 + $0x6c8] ss:$16 sps:$4 sm:$0xff]  }
 0x1c9   :  { %2941 = vmatprep.subr.bf16.mxu0 %v7505_v20  ;;  %3044 = vmatprep.subr.bf16.mxu1 %v7508_v46  ;;  %v7559_v20 = vld [vmem:[%s10212_s2 + $0x6e4] ss:$16 sps:$4 sm:$0xff]   ;;  %v7562_v46 = vld [vmem:[%s10212_s2 + $0x6ec] ss:$16 sps:$4 sm:$0xff]  }
 0x1cc   :  { %2942 = vmatpush1.bf16.msra.mxu0 %v7503_v11  ;;  %3045 = vmatpush1.bf16.msra.mxu1 %v7506_v48  ;;  %v7557_v11 = vld [vmem:[%s10212_s2 + $0x6e0] ss:$16 sps:$4 sm:$0xff]   ;;  %v7560_v48 = vld [vmem:[%s10212_s2 + $0x6e8] ss:$16 sps:$4 sm:$0xff]  }
 0x1cd   :  { %2943 = vmatprep.subr.bf16.mxu0 %v7511_v44  ;;  %3046 = vmatprep.subr.bf16.mxu1 %v7514_v6  ;;  %v7565_v44 = vld [vmem:[%s10212_s2 + $0x704] ss:$16 sps:$4 sm:$0xff]   ;;  %v7568_v6 = vld [vmem:[%s10212_s2 + $0x70c] ss:$16 sps:$4 sm:$0xff]  }
 0x1d0   :  { %2944 = vmatpush1.bf16.msra.mxu0 %v7509_v7  ;;  %3047 = vmatpush1.bf16.msra.mxu1 %v7512_v19  ;;  %v7563_v7 = vld [vmem:[%s10212_s2 + $0x700] ss:$16 sps:$4 sm:$0xff]   ;;  %v7566_v19 = vld [vmem:[%s10212_s2 + $0x708] ss:$16 sps:$4 sm:$0xff]  }
 0x1d1   :  { %3560 = vmatprep.subr.bf16.mxu0 %v7517_v37  ;;  %3663 = vmatprep.subr.bf16.mxu1 %v7520_v39  ;;  %v7571_v37 = vld [vmem:[%s10212_s2 + $0x724] ss:$16 sps:$4 sm:$0xff]   ;;  %v7574_v39 = vld [vmem:[%s10212_s2 + $0x72c] ss:$16 sps:$4 sm:$0xff]  }
 0x1d3   :  { %2946 = vmatmul.mubr.bf16.vlgmr.msra.gmra.mrb[56].mxu0 %v8693_v25  ;;  %3049 = vmatmul.mubr.bf16.vlgmr.msra.gmra.mrb[56].mxu1 %v8693_v25  ;;  %v7529_v25 = vld [vmem:[%s10212_s2 + $0x644] ss:$16 sps:$4 sm:$0xff]  }
 0x1d4   :  { %2955 = vmatprep.mubr.bf16.mxu0 %v8761_v3  ;;  %3058 = vmatprep.mubr.bf16.mxu1 %v8761_v3 }
 0x1d5   :  { %3561 = vmatpush1.bf16.msra.mxu0 %v7515_v50  ;;  %3664 = vmatpush1.bf16.msra.mxu1 %v7518_v45  ;;  %v7569_v50 = vld [vmem:[%s10212_s2 + $0x720] ss:$16 sps:$4 sm:$0xff]   ;;  %v7572_v45 = vld [vmem:[%s10212_s2 + $0x728] ss:$16 sps:$4 sm:$0xff]  }
 0x1d6   :  { %3562 = vmatprep.subr.bf16.mxu0 %v7523_v13  ;;  %3665 = vmatprep.subr.bf16.mxu1 %v7526_v43  ;;  %v7577_v13 = vld [vmem:[%s10212_s2 + $0x744] ss:$16 sps:$4 sm:$0xff]   ;;  %v7580_v43 = vld [vmem:[%s10212_s2 + $0x74c] ss:$16 sps:$4 sm:$0xff]  }
 0x1d9   :  { %3563 = vmatpush1.bf16.msra.mxu0 %v7521_v10  ;;  %3666 = vmatpush1.bf16.msra.mxu1 %v7524_v14  ;;  %v7575_v10 = vld [vmem:[%s10212_s2 + $0x740] ss:$16 sps:$4 sm:$0xff]   ;;  %v7578_v14 = vld [vmem:[%s10212_s2 + $0x748] ss:$16 sps:$4 sm:$0xff]  }
 0x1da   :  { %3564 = vmatprep.subr.bf16.mxu0 %v7529_v25  ;;  %3667 = vmatprep.subr.bf16.mxu1 %v7532_v58  ;;  %v7583_v25 = vld [vmem:[%s10212_s2 + $0x764] ss:$16 sps:$4 sm:$0xff]   ;;  %v7586_v58 = vld [vmem:[%s10212_s2 + $0x76c] ss:$16 sps:$4 sm:$0xff]  }
 0x1db   :  { %2956 = vmatmul.mubr.bf16.gmra.mrb[60].mxu0 %v8750_v41  ;;  %3059 = vmatmul.mubr.bf16.gmra.mrb[60].mxu1 %v8750_v41 }
 0x1dc   :  { %2965 = vmatprep.mubr.bf16.mxu0 %v8820_v36  ;;  %3068 = vmatprep.mubr.bf16.mxu1 %v8820_v36 }
 0x1dd   :  { %3565 = vmatpush1.bf16.msra.mxu0 %v7527_v15  ;;  %3668 = vmatpush1.bf16.msra.mxu1 %v7530_v17  ;;  %v7581_v15 = vld [vmem:[%s10212_s2 + $0x760] ss:$16 sps:$4 sm:$0xff]   ;;  %v7584_v17 = vld [vmem:[%s10212_s2 + $0x768] ss:$16 sps:$4 sm:$0xff]  }
 0x1de   :  { %3566 = vmatprep.subr.bf16.mxu0 %v7535_v52  ;;  %3669 = vmatprep.subr.bf16.mxu1 %v7538_v1  ;;  %v7589_v52 = vld [vmem:[%s10212_s2 + $0x784] ss:$16 sps:$4 sm:$0xff]   ;;  %v7592_v1 = vld [vmem:[%s10212_s2 + $0x78c] ss:$16 sps:$4 sm:$0xff]  }
 0x1e1   :  { %3567 = vmatpush1.bf16.msra.mxu0 %v7533_v4  ;;  %3670 = vmatpush1.bf16.msra.mxu1 %v7536_v54  ;;  %v7587_v4 = vld [vmem:[%s10212_s2 + $0x780] ss:$16 sps:$4 sm:$0xff]   ;;  %v7590_v54 = vld [vmem:[%s10212_s2 + $0x788] ss:$16 sps:$4 sm:$0xff]  }
 0x1e2   :  { %3568 = vmatprep.subr.bf16.mxu0 %v7541_v2  ;;  %3671 = vmatprep.subr.bf16.mxu1 %v7544_v5  ;;  %v7595_v2 = vld [vmem:[%s10212_s2 + $0x7a4] ss:$16 sps:$4 sm:$0xff]   ;;  %v7598_v5 = vld [vmem:[%s10212_s2 + $0x7ac] ss:$16 sps:$4 sm:$0xff]  }
 0x1e3   :  { %2966 = vmatmul.mubr.bf16.gmra.mrb[64].mxu0 %v8807_v29  ;;  %3069 = vmatmul.mubr.bf16.gmra.mrb[64].mxu1 %v8807_v29 }
 0x1e4   :  { %2975 = vmatprep.mubr.bf16.mxu0 %v8880_v56  ;;  %3078 = vmatprep.mubr.bf16.mxu1 %v8880_v56 }
 0x1e5   :  { %3569 = vmatpush1.bf16.msra.mxu0 %v7539_v51  ;;  %3672 = vmatpush1.bf16.msra.mxu1 %v7542_v55  ;;  %v7593_v51 = vld [vmem:[%s10212_s2 + $0x7a0] ss:$16 sps:$4 sm:$0xff]   ;;  %v7596_v55 = vld [vmem:[%s10212_s2 + $0x7a8] ss:$16 sps:$4 sm:$0xff]  }
 0x1e6   :  { %3570 = vmatprep.subr.bf16.mxu0 %v7547_v32  ;;  %3673 = vmatprep.subr.bf16.mxu1 %v7550_v12  ;;  %v7601_v32 = vld [vmem:[%s10212_s2 + $0x7c4] ss:$16 sps:$4 sm:$0xff]   ;;  %v7599_v12 = vld [vmem:[%s10212_s2 + $0x7c0] ss:$16 sps:$4 sm:$0xff]  }
 0x1e9   :  { %3571 = vmatpush1.bf16.msra.mxu0 %v7545_v47  ;;  %3674 = vmatpush1.bf16.msra.mxu1 %v7548_v26  ;;  %v7602_v47 = vld [vmem:[%s10212_s2 + $0x7c8] ss:$16 sps:$4 sm:$0xff]   ;;  %v7607_v26 = vld [vmem:[%s10212_s2 + $0x7e4] ss:$16 sps:$4 sm:$0xff]  }
 0x1ea   :  { %3572 = vmatprep.subr.bf16.mxu0 %v7553_v31  ;;  %3675 = vmatprep.subr.bf16.mxu1 %v7556_v8  ;;  %v7610_v31 = vld [vmem:[%s10212_s2 + $0x7ec] ss:$16 sps:$4 sm:$0xff]   ;;  %v7605_v8 = vld [vmem:[%s10212_s2 + $0x7e0] ss:$16 sps:$4 sm:$0xff]  }
 0x1eb   :  { %2976 = vmatmul.mubr.bf16.gmra.mrb[68].mxu0 %v8867_v30  ;;  %3079 = vmatmul.mubr.bf16.gmra.mrb[68].mxu1 %v8867_v30 }
 0x1ec   :  { %2985 = vmatprep.mubr.bf16.mxu0 %v8940_v42  ;;  %3088 = vmatprep.mubr.bf16.mxu1 %v8940_v42 }
 0x1ed   :  { %3573 = vmatpush1.bf16.msra.mxu0 %v7551_v28  ;;  %3676 = vmatpush1.bf16.msra.mxu1 %v7554_v40  ;;  %v7608_v28 = vld [vmem:[%s10212_s2 + $0x7e8] ss:$16 sps:$4 sm:$0xff]   ;;  %v7613_v40 = vld [vmem:[%s10212_s2 + $0x804] ss:$16 sps:$4 sm:$0xff]  }
 0x1ee   :  { %3574 = vmatprep.subr.bf16.mxu0 %v7559_v20  ;;  %3677 = vmatprep.subr.bf16.mxu1 %v7562_v46  ;;  %v7616_v20 = vld [vmem:[%s10212_s2 + $0x80c] ss:$16 sps:$4 sm:$0xff]   ;;  %v7611_v46 = vld [vmem:[%s10212_s2 + $0x800] ss:$16 sps:$4 sm:$0xff]  }
 0x1f1   :  { %3575 = vmatpush1.bf16.msra.mxu0 %v7557_v11  ;;  %3678 = vmatpush1.bf16.msra.mxu1 %v7560_v48  ;;  %v7614_v11 = vld [vmem:[%s10212_s2 + $0x808] ss:$16 sps:$4 sm:$0xff]   ;;  %v7619_v48 = vld [vmem:[%s10212_s2 + $0x824] ss:$16 sps:$4 sm:$0xff]  }
 0x1f2   :  { %3576 = vmatprep.subr.bf16.mxu0 %v7565_v44  ;;  %3679 = vmatprep.subr.bf16.mxu1 %v7568_v6  ;;  %v7622_v44 = vld [vmem:[%s10212_s2 + $0x82c] ss:$16 sps:$4 sm:$0xff]   ;;  %v7617_v6 = vld [vmem:[%s10212_s2 + $0x820] ss:$16 sps:$4 sm:$0xff]  }
 0x1f3   :  { %2986 = vmatmul.mubr.bf16.gmra.mrb[72].mxu0 %v8927_v9  ;;  %3089 = vmatmul.mubr.bf16.gmra.mrb[72].mxu1 %v8927_v9 }
 0x1f4   :  { %2995 = vmatprep.mubr.bf16.mxu0 %v9000_v35  ;;  %3098 = vmatprep.mubr.bf16.mxu1 %v9000_v35 }
 0x1f5   :  { %3577 = vmatpush1.bf16.msra.mxu0 %v7563_v7  ;;  %3680 = vmatpush1.bf16.msra.mxu1 %v7566_v19  ;;  %v7620_v7 = vld [vmem:[%s10212_s2 + $0x828] ss:$16 sps:$4 sm:$0xff]   ;;  %v7625_v19 = vld [vmem:[%s10212_s2 + $0x844] ss:$16 sps:$4 sm:$0xff]  }
 0x1f6   :  { %3578 = vmatprep.subr.bf16.mxu0 %v7571_v37  ;;  %3681 = vmatprep.subr.bf16.mxu1 %v7574_v39  ;;  %v7626_v37 = vld [vmem:[%s10212_s2 + $0x848] ss:$16 sps:$4 sm:$0xff]   ;;  %v7631_v39 = vld [vmem:[%s10212_s2 + $0x864] ss:$16 sps:$4 sm:$0xff]  }
 0x1f9   :  { %3579 = vmatpush1.bf16.msra.mxu0 %v7569_v50  ;;  %3682 = vmatpush1.bf16.msra.mxu1 %v7572_v45  ;;  %v7634_v50 = vld [vmem:[%s10212_s2 + $0x86c] ss:$16 sps:$4 sm:$0xff]   ;;  %v7629_v45 = vld [vmem:[%s10212_s2 + $0x860] ss:$16 sps:$4 sm:$0xff]  }
 0x1fa   :  { %3580 = vmatprep.subr.bf16.mxu0 %v7577_v13  ;;  %3683 = vmatprep.subr.bf16.mxu1 %v7580_v43  ;;  %v7632_v13 = vld [vmem:[%s10212_s2 + $0x868] ss:$16 sps:$4 sm:$0xff]   ;;  %v7637_v43 = vld [vmem:[%s10212_s2 + $0x884] ss:$16 sps:$4 sm:$0xff]  }
 0x1fb   :  { %2996 = vmatmul.mubr.bf16.gmra.mrb[76].mxu0 %v8987_v59  ;;  %3099 = vmatmul.mubr.bf16.gmra.mrb[76].mxu1 %v8987_v59 }
 0x1fc   :  { %3005 = vmatprep.mubr.bf16.mxu0 %v9055_v23  ;;  %3108 = vmatprep.mubr.bf16.mxu1 %v9055_v23 }
 0x1fd   :  { %3581 = vmatpush1.bf16.msra.mxu0 %v7575_v10  ;;  %3684 = vmatpush1.bf16.msra.mxu1 %v7578_v14  ;;  %v7635_v10 = vld [vmem:[%s10212_s2 + $0x880] ss:$16 sps:$4 sm:$0xff]   ;;  %v7643_v14 = vld [vmem:[%s10212_s2 + $0x8a4] ss:$16 sps:$4 sm:$0xff]  }
 0x1fe   :  { %3582 = vmatprep.subr.bf16.mxu0 %v7583_v25  ;;  %3685 = vmatprep.subr.bf16.mxu1 %v7586_v58  ;;  %v7646_v25 = vld [vmem:[%s10212_s2 + $0x8ac] ss:$16 sps:$4 sm:$0xff]   ;;  %v7641_v58 = vld [vmem:[%s10212_s2 + $0x8a0] ss:$16 sps:$4 sm:$0xff]  }
 0x201   :  { %3583 = vmatpush1.bf16.msra.mxu0 %v7581_v15  ;;  %3686 = vmatpush1.bf16.msra.mxu1 %v7584_v17  ;;  %v7644_v15 = vld [vmem:[%s10212_s2 + $0x8a8] ss:$16 sps:$4 sm:$0xff]   ;;  %v7649_v17 = vld [vmem:[%s10212_s2 + $0x8c4] ss:$16 sps:$4 sm:$0xff]  }
 0x202   :  { %3584 = vmatprep.subr.bf16.mxu0 %v7589_v52  ;;  %3687 = vmatprep.subr.bf16.mxu1 %v7592_v1  ;;  %v7647_v52 = vld [vmem:[%s10212_s2 + $0x8c0] ss:$16 sps:$4 sm:$0xff]   ;;  %v7655_v1 = vld [vmem:[%s10212_s2 + $0x8e4] ss:$16 sps:$4 sm:$0xff]  }
 0x203   :  { %3006 = vmatmul.mubr.bf16.gmra.mrb[80].mxu0 %v9045_v27  ;;  %3109 = vmatmul.mubr.bf16.gmra.mrb[80].mxu1 %v9045_v27 }
 0x204   :  { %3592 = vmatprep.mubr.bf16.mxu0 %v8785_v22  ;;  %3695 = vmatprep.mubr.bf16.mxu1 %v8785_v22  ;;  %v7604_v22 = vld [vmem:[%s10212_s2 + $0x7cc] ss:$16 sps:$4 sm:$0xff]  }
 0x205   :  { %3585 = vmatpush1.bf16.msra.mxu0 %v7587_v4  ;;  %3688 = vmatpush1.bf16.msra.mxu1 %v7590_v54  ;;  %v7658_v4 = vld [vmem:[%s10212_s2 + $0x8ec] ss:$16 sps:$4 sm:$0xff]   ;;  %v7653_v54 = vld [vmem:[%s10212_s2 + $0x8e0] ss:$16 sps:$4 sm:$0xff]  }
 0x206   :  { %3586 = vmatprep.subr.bf16.mxu0 %v7595_v2  ;;  %3689 = vmatprep.subr.bf16.mxu1 %v7598_v5  ;;  %v7656_v2 = vld [vmem:[%s10212_s2 + $0x8e8] ss:$16 sps:$4 sm:$0xff]   ;;  %v7661_v5 = vld [vmem:[%s10212_s2 + $0x904] ss:$16 sps:$4 sm:$0xff]  }
 0x209   :  { %3587 = vmatpush1.bf16.msra.mxu0 %v7593_v51  ;;  %3690 = vmatpush1.bf16.msra.mxu1 %v7596_v55  ;;  %v7659_v51 = vld [vmem:[%s10212_s2 + $0x900] ss:$16 sps:$4 sm:$0xff]   ;;  %v7667_v55 = vld [vmem:[%s10212_s2 + $0x924] ss:$16 sps:$4 sm:$0xff]  }
 0x20a   :  { %3588 = vmatprep.subr.bf16.mxu0 %v7601_v32  ;;  %3691 = vmatprep.subr.bf16.mxu1 %v7604_v22  ;;  %v7670_v32 = vld [vmem:[%s10212_s2 + $0x92c] ss:$16 sps:$4 sm:$0xff]   ;;  %v7665_v22 = vld [vmem:[%s10212_s2 + $0x920] ss:$16 sps:$4 sm:$0xff]  }
 0x20d   :  { %3589 = vmatpush1.bf16.msra.mxu0 %v7599_v12  ;;  %3692 = vmatpush1.bf16.msra.mxu1 %v7602_v47  ;;  %v7668_v12 = vld [vmem:[%s10212_s2 + $0x928] ss:$16 sps:$4 sm:$0xff]   ;;  %v7673_v47 = vld [vmem:[%s10212_s2 + $0x944] ss:$16 sps:$4 sm:$0xff]  }
 0x20e   :  { %3590 = vmatprep.subr.bf16.mxu0 %v7607_v26  ;;  %3693 = vmatprep.subr.bf16.mxu1 %v7610_v31  ;;  %v7671_v26 = vld [vmem:[%s10212_s2 + $0x940] ss:$16 sps:$4 sm:$0xff]   ;;  %v7679_v31 = vld [vmem:[%s10212_s2 + $0x964] ss:$16 sps:$4 sm:$0xff]  }
 0x211   :  { %3591 = vmatpush1.bf16.msra.mxu0 %v7605_v8  ;;  %3694 = vmatpush1.bf16.msra.mxu1 %v7608_v28  ;;  %v7682_v8 = vld [vmem:[%s10212_s2 + $0x96c] ss:$16 sps:$4 sm:$0xff]   ;;  %v7677_v28 = vld [vmem:[%s10212_s2 + $0x960] ss:$16 sps:$4 sm:$0xff]  }
 0x212   :  { %4207 = vmatprep.subr.bf16.mxu0 %v7613_v40  ;;  %4310 = vmatprep.subr.bf16.mxu1 %v7616_v20  ;;  %v7680_v40 = vld [vmem:[%s10212_s2 + $0x968] ss:$16 sps:$4 sm:$0xff]   ;;  %v7685_v20 = vld [vmem:[%s10212_s2 + $0x984] ss:$16 sps:$4 sm:$0xff]  }
 0x214   :  { %3593 = vmatmul.mubr.bf16.vlgmr.msra.gmra.mrb[56].mxu0 %v8802_v60  ;;  %3696 = vmatmul.mubr.bf16.vlgmr.msra.gmra.mrb[56].mxu1 %v8802_v60  ;;  %v7628_v60 = vld [vmem:[%s10212_s2 + $0x84c] ss:$16 sps:$4 sm:$0xff]  }
 0x215   :  { %3602 = vmatprep.mubr.bf16.mxu0 %v8844_v63  ;;  %3705 = vmatprep.mubr.bf16.mxu1 %v8844_v63  ;;  %v7623_v63 = vld [vmem:[%s10212_s2 + $0x840] ss:$16 sps:$4 sm:$0xff]  }
 0x216   :  { %4208 = vmatpush1.bf16.msra.mxu0 %v7611_v46  ;;  %4311 = vmatpush1.bf16.msra.mxu1 %v7614_v11  ;;  %v7683_v46 = vld [vmem:[%s10212_s2 + $0x980] ss:$16 sps:$4 sm:$0xff]   ;;  %v7691_v11 = vld [vmem:[%s10212_s2 + $0x9a4] ss:$16 sps:$4 sm:$0xff]  }
 0x217   :  { %4209 = vmatprep.subr.bf16.mxu0 %v7619_v48  ;;  %4312 = vmatprep.subr.bf16.mxu1 %v7622_v44  ;;  %v7694_v48 = vld [vmem:[%s10212_s2 + $0x9ac] ss:$16 sps:$4 sm:$0xff]   ;;  %v7689_v44 = vld [vmem:[%s10212_s2 + $0x9a0] ss:$16 sps:$4 sm:$0xff]  }
 0x21a   :  { %4210 = vmatpush1.bf16.msra.mxu0 %v7617_v6  ;;  %4313 = vmatpush1.bf16.msra.mxu1 %v7620_v7  ;;  %v7692_v6 = vld [vmem:[%s10212_s2 + $0x9a8] ss:$16 sps:$4 sm:$0xff]   ;;  %v7697_v7 = vld [vmem:[%s10212_s2 + $0x9c4] ss:$16 sps:$4 sm:$0xff]  }
 0x21b   :  { %4211 = vmatprep.subr.bf16.mxu0 %v7625_v19  ;;  %4314 = vmatprep.subr.bf16.mxu1 %v7628_v60  ;;  %v7695_v19 = vld [vmem:[%s10212_s2 + $0x9c0] ss:$16 sps:$4 sm:$0xff]   ;;  %v7703_v60 = vld [vmem:[%s10212_s2 + $0x9e4] ss:$16 sps:$4 sm:$0xff]  }
 0x21c   :  { %3603 = vmatmul.mubr.bf16.gmra.mrb[60].mxu0 %v8862_v49  ;;  %3706 = vmatmul.mubr.bf16.gmra.mrb[60].mxu1 %v8862_v49  ;;  %v7640_v49 = vld [vmem:[%s10212_s2 + $0x88c] ss:$16 sps:$4 sm:$0xff]  }
 0x21d   :  { %3612 = vmatprep.mubr.bf16.mxu0 %v8904_v0  ;;  %3715 = vmatprep.mubr.bf16.mxu1 %v8904_v0  ;;  %v7638_v0 = vld [vmem:[%s10212_s2 + $0x888] ss:$16 sps:$4 sm:$0xff]  }
 0x21e   :  { %4212 = vmatpush1.bf16.msra.mxu0 %v7623_v63  ;;  %4315 = vmatpush1.bf16.msra.mxu1 %v7626_v37  ;;  %v7706_v63 = vld [vmem:[%s10212_s2 + $0x9ec] ss:$16 sps:$4 sm:$0xff]   ;;  %v7701_v37 = vld [vmem:[%s10212_s2 + $0x9e0] ss:$16 sps:$4 sm:$0xff]  }
 0x21f   :  { %4213 = vmatprep.subr.bf16.mxu0 %v7631_v39  ;;  %4316 = vmatprep.subr.bf16.mxu1 %v7634_v50  ;;  %v7704_v39 = vld [vmem:[%s10212_s2 + $0x9e8] ss:$16 sps:$4 sm:$0xff]   ;;  %v7707_v50 = vld [vmem:[%s10214_s3 + $0x40] sm:$0xff]  }
 0x222   :  { %4214 = vmatpush1.bf16.msra.mxu0 %v7629_v45  ;;  %4317 = vmatpush1.bf16.msra.mxu1 %v7632_v13  ;;  %v7717_v45 = vld [vmem:[%s10214_s3 + $0xc0] sm:$0xff]  }
 0x223   :  { %4215 = vmatprep.subr.bf16.mxu0 %v7637_v43  ;;  %4318 = vmatprep.subr.bf16.mxu1 %v7640_v49  ;;  %v7708_v13 = vld [vmem:[%s10214_s3] sm:$0xff]   ;;  %v7709_v49 = vld [vmem:[%s10214_s3 + $0x48] sm:$0xff]  }
 0x224   :  { %3613 = vmatmul.mubr.bf16.gmra.mrb[64].mxu0 %v8922_v53  ;;  %3716 = vmatmul.mubr.bf16.gmra.mrb[64].mxu1 %v8922_v53  ;;  %v7652_v53 = vld [vmem:[%s10212_s2 + $0x8cc] ss:$16 sps:$4 sm:$0xff]   ;;  %v7718_v43 = vld [vmem:[%s10214_s3 + $0x80] sm:$0xff]  }
 0x225   :  { %3622 = vmatprep.mubr.bf16.mxu0 %v8964_v61  ;;  %3725 = vmatprep.mubr.bf16.mxu1 %v8964_v61  ;;  %v7650_v61 = vld [vmem:[%s10212_s2 + $0x8c8] ss:$16 sps:$4 sm:$0xff]  }
 0x226   :  { %4216 = vmatpush1.bf16.msra.mxu0 %v7635_v10  ;;  %4319 = vmatpush1.bf16.msra.mxu1 %v7638_v0  ;;  %v7720_v10 = vld [vmem:[%s10214_s3 + $0xc8] sm:$0xff]  }
 0x227   :  { %4217 = vmatprep.subr.bf16.mxu0 %v7643_v14  ;;  %4320 = vmatprep.subr.bf16.mxu1 %v7646_v25  ;;  %v7710_v0 = vld [vmem:[%s10214_s3 + $0x8] sm:$0xff]   ;;  %v7711_v25 = vld [vmem:[%s10214_s3 + $0x50] sm:$0xff]  }
 0x228   :  { %v7722_v14 = vld [vmem:[%s10214_s3 + $0x88] sm:$0xff]  }
 0x22a   :  { %4218 = vmatpush1.bf16.msra.mxu0 %v7641_v58  ;;  %4321 = vmatpush1.bf16.msra.mxu1 %v7644_v15  ;;  %v7724_v58 = vld [vmem:[%s10214_s3 + $0x90] sm:$0xff]   ;;  %v7713_v15 = vld [vmem:[%s10214_s3 + $0x58] sm:$0xff]  }
 0x22b   :  { %4219 = vmatprep.subr.bf16.mxu0 %v7649_v17  ;;  %4322 = vmatprep.subr.bf16.mxu1 %v7652_v53  ;;  %v7714_v17 = vld [vmem:[%s10214_s3 + $0x18] sm:$0xff]   ;;  %v7715_v53 = vld [vmem:[%s10214_s3 + $0x60] sm:$0xff]  }
 0x22c   :  { %3623 = vmatmul.mubr.bf16.gmra.mrb[68].mxu0 %v8982_v38  ;;  %3726 = vmatmul.mubr.bf16.gmra.mrb[68].mxu1 %v8982_v38  ;;  %v7664_v38 = vld [vmem:[%s10212_s2 + $0x90c] ss:$16 sps:$4 sm:$0xff]  }
 0x22d   :  { %3632 = vmatprep.mubr.bf16.mxu0 %v9024_v24  ;;  %3735 = vmatprep.mubr.bf16.mxu1 %v9024_v24  ;;  %v7662_v24 = vld [vmem:[%s10212_s2 + $0x908] ss:$16 sps:$4 sm:$0xff]  }
 0x22e   :  { %4220 = vmatpush1.bf16.msra.mxu0 %v7647_v52  ;;  %4323 = vmatpush1.bf16.msra.mxu1 %v7650_v61  ;;  %v7721_v52 = vld [vmem:[%s10214_s3 + $0x28] sm:$0xff]   ;;  %v7732_v61 = vld [vmem:[%s10214_s3 + $0x38] sm:$0xff]  }
 0x22f   :  { %4221 = vmatprep.subr.bf16.mxu0 %v7655_v1  ;;  %4324 = vmatprep.subr.bf16.mxu1 %v7658_v4  ;;  %v7734_v1 = vld [vmem:[%s10214_s3 + $0xa8] sm:$0xff]   ;;  %v7735_v4 = vld [vmem:[%s10214_s3 + $0xf0] sm:$0xff]  }
 0x232   :  { %4222 = vmatpush1.bf16.msra.mxu0 %v7653_v54  ;;  %4325 = vmatpush1.bf16.msra.mxu1 %v7656_v2  ;;  %v7736_v54 = vld [vmem:[%s10214_s3 + $0x140] sm:$0xff]   ;;  %v7737_v2 = vld [vmem:[%s10214_s3 + $0xb0] sm:$0xff]  }
 0x233   :  { %4223 = vmatprep.subr.bf16.mxu0 %v7661_v5  ;;  %4326 = vmatprep.subr.bf16.mxu1 %v7664_v38  ;;  %v7739_v5 = vld [vmem:[%s10214_s3 + $0xf8] sm:$0xff]  }
 0x234   :  { %3633 = vmatmul.mubr.bf16.gmra.mrb[72].mxu0 %v9037_v16  ;;  %3736 = vmatmul.mubr.bf16.gmra.mrb[72].mxu1 %v9037_v16  ;;  %v7676_v16 = vld [vmem:[%s10212_s2 + $0x94c] ss:$16 sps:$4 sm:$0xff]  }
 0x235   :  { %3642 = vmatprep.mubr.bf16.mxu0 %v9071_v34  ;;  %3745 = vmatprep.mubr.bf16.mxu1 %v9071_v34  ;;  %v7674_v34 = vld [vmem:[%s10212_s2 + $0x948] ss:$16 sps:$4 sm:$0xff]  }
 0x236   :  { %4224 = vmatpush1.bf16.msra.mxu0 %v7659_v51  ;;  %4327 = vmatpush1.bf16.msra.mxu1 %v7662_v24  ;;  %v7741_v38 = vld [vmem:[%s10214_s3 + $0xb8] sm:$0xff]   ;;  %v7744_v51 = vld [vmem:[%s10214_s3 + $0x1c0] sm:$0xff]  }
 0x237   :  { %4225 = vmatprep.subr.bf16.mxu0 %v7667_v55  ;;  %4328 = vmatprep.subr.bf16.mxu1 %v7670_v32  ;;  %v4497_v24 = vld [vmem:[%s10215_s5] sm:$0x3]  ;;  %v10286_v55 = vsub.s32 0, %v8650_v18 }
 0x239   :  { %v9916_v32 = vrot.slane %v4497_v24, %v10286_v55 }
 0x23a   :  { %4226 = vmatpush1.bf16.msra.mxu0 %v7665_v22  ;;  %4329 = vmatpush1.bf16.msra.mxu1 %v7668_v12 }
 0x23b   :  { %4227 = vmatprep.subr.bf16.mxu0 %v7673_v47  ;;  %4330 = vmatprep.subr.bf16.mxu1 %v7676_v16  ;;  %v10287_v47 = vsub.s32 1, %v8650_v18 }
 0x23c   :  { %3643 = vmatmul.mubr.bf16.gmra.mrb[76].mxu0 %v9083_v21  ;;  %3746 = vmatmul.mubr.bf16.gmra.mrb[76].mxu1 %v9083_v21  ;;  %v7688_v21 = vld [vmem:[%s10212_s2 + $0x98c] ss:$16 sps:$4 sm:$0xff]  }
 0x23d   :  { %6390 = vmatprep.mubr.msk.bf16.mxu0 %vm1294_vm1, %v9064_v33  ;;  %6392 = vmatprep.mubr.msk.bf16.mxu1 %vm1294_vm1, %v9064_v33  ;;  %v7686_v33 = vld [vmem:[%s10212_s2 + $0x988] ss:$16 sps:$4 sm:$0xff]   ;;  %v9920_v16 = vrot.slane %v4497_v24, %v10287_v47 }
 0x23e   :  { %4228 = vmatpush1.bf16.msra.mxu0 %v7671_v26  ;;  %4331 = vmatpush1.bf16.msra.mxu1 %v7674_v34 }
 0x23f   :  { %4229 = vmatprep.subr.bf16.mxu0 %v7679_v31  ;;  %4332 = vmatprep.subr.bf16.mxu1 %v7682_v8 }
 0x242   :  { %4230 = vmatpush1.bf16.msra.mxu0 %v7677_v28  ;;  %4333 = vmatpush1.bf16.msra.mxu1 %v7680_v40 }
 0x243   :  { %4231 = vmatprep.subr.bf16.mxu0 %v7685_v20  ;;  %4334 = vmatprep.subr.bf16.mxu1 %v7688_v21 }
 0x244   :  { %6391 = vmatmul.mubr.msk.bf16.gmra.mrb[80].mxu0 %vm1294_vm1, %v9067_v62  ;;  %6393 = vmatmul.mubr.msk.bf16.gmra.mrb[80].mxu1 %vm1294_vm1, %v9067_v62  ;;  %v7700_v62 = vld [vmem:[%s10212_s2 + $0x9cc] ss:$16 sps:$4 sm:$0xff]  }
 0x245   :  { %4239 = vmatprep.mubr.bf16.mxu0 %v8761_v3  ;;  %4342 = vmatprep.mubr.bf16.mxu1 %v8761_v3  ;;  %v7698_v3 = vld [vmem:[%s10212_s2 + $0x9c8] ss:$16 sps:$4 sm:$0xff]  }
 0x246   :  { %4232 = vmatpush1.bf16.msra.mxu0 %v7683_v46  ;;  %4335 = vmatpush1.bf16.msra.mxu1 %v7686_v33 }
 0x247   :  { %4233 = vmatprep.subr.bf16.mxu0 %v7691_v11  ;;  %4336 = vmatprep.subr.bf16.mxu1 %v7694_v48 }
 0x24a   :  { %4234 = vmatpush1.bf16.msra.mxu0 %v7689_v44  ;;  %4337 = vmatpush1.bf16.msra.mxu1 %v7692_v6 }
 0x24b   :  { %4235 = vmatprep.subr.bf16.mxu0 %v7697_v7  ;;  %4338 = vmatprep.subr.bf16.mxu1 %v7700_v62 }
 0x24e   :  { %4236 = vmatpush1.bf16.msra.mxu0 %v7695_v19  ;;  %4339 = vmatpush1.bf16.msra.mxu1 %v7698_v3 }
 0x24f   :  { %4237 = vmatprep.subr.bf16.mxu0 %v7703_v60  ;;  %4340 = vmatprep.subr.bf16.mxu1 %v7706_v63 }
 0x252   :  { %4238 = vmatpush1.bf16.msra.mxu0 %v7701_v37  ;;  %4341 = vmatpush1.bf16.msra.mxu1 %v7704_v39 }
 0x253   :  { %6827 = vmatprep.subr.bf16.mxu0 %v7707_v50  ;;  %6849 = vmatprep.subr.bf16.mxu1 %v7717_v45 }
 0x255   :  { %4240 = vmatmul.mubr.bf16.vlgmr.msra.gmra.mrb[56].mxu0 %v8750_v41  ;;  %4343 = vmatmul.mubr.bf16.vlgmr.msra.gmra.mrb[56].mxu1 %v8750_v41  ;;  %v7723_v41 = vld [vmem:[%s10214_s3 + $0xd0] sm:$0xff]  }
 0x256   :  { %4249 = vmatprep.mubr.bf16.mxu0 %v8820_v36  ;;  %4352 = vmatprep.mubr.bf16.mxu1 %v8820_v36  ;;  %v7712_v36 = vld [vmem:[%s10214_s3 + $0x10] sm:$0xff]  }
 0x257   :  { %6828 = vmatpush3.bf16.msra.mxu0 %v7708_v13  ;;  %6850 = vmatpush3.bf16.msra.mxu1 %v7718_v43 }
 0x258   :  { %6829 = vmatprep.subr.bf16.mxu0 %v7709_v49  ;;  %6851 = vmatprep.subr.bf16.mxu1 %v7720_v10 }
 0x25b   :  { %6830 = vmatpush3.bf16.msra.mxu0 %v7710_v0  ;;  %6852 = vmatpush3.bf16.msra.mxu1 %v7722_v14 }
 0x25c   :  { %6831 = vmatprep.subr.bf16.mxu0 %v7711_v25  ;;  %6853 = vmatprep.subr.bf16.mxu1 %v7723_v41 }
 0x25d   :  { %4250 = vmatmul.mubr.bf16.gmra.mrb[60].mxu0 %v8807_v29  ;;  %4353 = vmatmul.mubr.bf16.gmra.mrb[60].mxu1 %v8807_v29  ;;  %v7716_v29 = vld [vmem:[%s10214_s3 + $0x20] sm:$0xff]  }
 0x25e   :  { %4259 = vmatprep.mubr.bf16.mxu0 %v8880_v56  ;;  %4362 = vmatprep.mubr.bf16.mxu1 %v8880_v56  ;;  %v7719_v56 = vld [vmem:[%s10214_s3 + $0x68] sm:$0xff]  }
 0x25f   :  { %6832 = vmatpush3.bf16.msra.mxu0 %v7712_v36  ;;  %6854 = vmatpush3.bf16.msra.mxu1 %v7724_v58 }
 0x260   :  { %6833 = vmatprep.subr.bf16.mxu0 %v7713_v15  ;;  %v7738_v15 = vld [vmem:[%s10214_s3 + $0x100] sm:$0xff]  }
 0x263   :  { %6834 = vmatpush3.bf16.msra.mxu0 %v7714_v17 }
 0x264   :  { %6835 = vmatprep.subr.bf16.mxu0 %v7715_v53 }
 0x265   :  { %4260 = vmatmul.mubr.bf16.gmra.mrb[64].mxu0 %v8867_v30  ;;  %4363 = vmatmul.mubr.bf16.gmra.mrb[64].mxu1 %v8867_v30  ;;  %v7727_v30 = vld [vmem:[%s10214_s3 + $0xd8] sm:$0xff]  }
 0x266   :  { %4269 = vmatprep.mubr.bf16.mxu0 %v8940_v42  ;;  %4372 = vmatprep.mubr.bf16.mxu1 %v8940_v42  ;;  %v7725_v42 = vld [vmem:[%s10214_s3 + $0x70] sm:$0xff]  }
 0x267   :  { %6836 = vmatpush3.bf16.msra.mxu0 %v7716_v29  ;;  %6855 = vmatprep.subr.bf16.mxu1 %v7727_v30  ;;  %v7740_v29 = vld [vmem:[%s10214_s3 + $0x148] sm:$0xff]  }
 0x268   :  { %6837 = vmatprep.subr.bf16.mxu0 %v7719_v56 }
 0x26b   :  { %6838 = vmatpush3.bf16.msra.mxu0 %v7721_v52 }
 0x26c   :  { %6839 = vmatprep.subr.bf16.mxu0 %v7725_v42 }
 0x26d   :  { %4270 = vmatmul.mubr.bf16.gmra.mrb[68].mxu0 %v8927_v9  ;;  %4373 = vmatmul.mubr.bf16.gmra.mrb[68].mxu1 %v8927_v9  ;;  %v7728_v9 = vld [vmem:[%s10214_s3 + $0x98] sm:$0xff]  }
 0x26e   :  { %4279 = vmatprep.mubr.bf16.mxu0 %v9000_v35  ;;  %4382 = vmatprep.mubr.bf16.mxu1 %v9000_v35  ;;  %v7726_v35 = vld [vmem:[%s10214_s3 + $0x30] sm:$0xff]  }
 0x26f   :  { %6856 = vmatpush3.bf16.msra.mxu1 %v7728_v9  ;;  %6840 = vmatpush3.bf16.msra.mxu0 %v7726_v35 }
 0x275   :  { %4280 = vmatmul.mubr.bf16.gmra.mrb[72].mxu0 %v8987_v59  ;;  %4383 = vmatmul.mubr.bf16.gmra.mrb[72].mxu1 %v8987_v59  ;;  %v7729_v59 = vld [vmem:[%s10214_s3 + $0xe0] sm:$0xff]  }
 0x276   :  { %4289 = vmatprep.mubr.bf16.mxu0 %v9055_v23  ;;  %4392 = vmatprep.mubr.bf16.mxu1 %v9055_v23  ;;  %v7731_v23 = vld [vmem:[%s10214_s3 + $0x78] sm:$0xff]  }
 0x277   :  { %6857 = vmatprep.subr.bf16.mxu1 %v7729_v59  ;;  %6841 = vmatprep.subr.bf16.mxu0 %v7731_v23 }
 0x278   :  { %6842 = vmatpush3.bf16.msra.mxu0 %v7732_v61 }
 0x279   :  { %6871 = vmatprep.subr.bf16.mxu0 %v7736_v54 }
 0x27d   :  { %4290 = vmatmul.mubr.bf16.gmra.mrb[76].mxu0 %v9045_v27  ;;  %4393 = vmatmul.mubr.bf16.gmra.mrb[76].mxu1 %v9045_v27  ;;  %v7730_v27 = vld [vmem:[%s10214_s3 + $0xa0] sm:$0xff]  }
 0x27e   :  { %4299 = vmatprep.mubr.bf16.mxu0 %v7819_v57  ;;  %4402 = vmatprep.mubr.bf16.mxu1 %v7819_v57 }
 0x27f   :  { %6858 = vmatpush3.bf16.msra.mxu1 %v7730_v27  ;;  %v7742_v27 = vld [vmem:[%s10214_s3 + $0x108] sm:$0xff]  }
 0x285   :  { %4300 = vmatmul.mubr.bf16.gmra.mrb[80].mxu0 %v7819_v57  ;;  %4403 = vmatmul.mubr.bf16.gmra.mrb[80].mxu1 %v7819_v57  ;;  %v7733_v57 = vld [vmem:[%s10214_s3 + $0xe8] sm:$0xff]  }
 0x286   :  { %6859 = vmatprep.subr.bf16.mxu1 %v7733_v57 }
 0x287   :  { %6860 = vmatpush3.bf16.msra.mxu1 %v7734_v1 }
 0x288   :  { %6861 = vmatprep.subr.bf16.mxu1 %v7735_v4  ;;  %v7743_v4 = vld [vmem:[%s10214_s3 + $0x150] sm:$0xff]  }
 0x28b   :  { %6862 = vmatpush3.bf16.msra.mxu1 %v7737_v2 }
 0x28c   :  { %6863 = vmatprep.subr.bf16.mxu1 %v7739_v5 }
 0x28f   :  { %6864 = vmatpush3.bf16.msra.mxu1 %v7741_v38 }
 0x290   :  { %6893 = vmatprep.subr.bf16.mxu1 %v7744_v51 }
 0x328   :  { %v4241_v22 = vpop.f32.mrb[56].mxu0  ;;  %v4344_v12 = vpop.f32.mrb[56].mxu1 }
 0x329   :  { %v4469_v26 = vmax.f32 %v4241_v22, %v4344_v12  ;;  %v4243_v34 = vpop.f32.mrb[57].mxu0  ;;  %v4346_v31 = vpop.f32.mrb[57].mxu1 }
 0x32a   :  { %v4470_v8 = vmax.f32 %v4243_v34, %v4346_v31  ;;  %v4245_v28 = vpop.f32.mrb[58].mxu0  ;;  %v4348_v40 = vpop.f32.mrb[58].mxu1  ;;  %v7745_v34 = vld [vmem:[%s10214_s3 + $0x110] sm:$0xff]   ;;  %v7746_v31 = vld [vmem:[%s10214_s3 + $0x180] sm:$0xff]  }
 0x32b   :  { %v4509_v20 = vadd.f32 %v9916_v32, %v4469_v26  ;;  %v4471_v21 = vmax.f32 %v4245_v28, %v4348_v40  ;;  %v4247_v46 = vpop.f32.mrb[59].mxu0  ;;  %v4350_v33 = vpop.f32.mrb[59].mxu1  ;;  %v7747_v40 = vld [vmem:[%s10214_s3 + $0x158] sm:$0xff]  }
 0x32c   :  { %v4510_v11 = vadd.f32 %v9920_v16, %v4470_v8  ;;  %v4472_v48 = vmax.f32 %v4247_v46, %v4350_v33 }
 0x32d   :  { %v4511_v44 = vadd.f32 %v9916_v32, %v4471_v21  ;;  %v4537_v6 = vmax.f32 %v4509_v20, 0.0  ;;  %v7748_v20 = vld [vmem:[%s10214_s3 + $0x1c8] sm:$0xff]  }
 0x32e   :  { %v4512_v18 = vadd.f32 %v9920_v16, %v4472_v48  ;;  %v4538_v62 = vmax.f32 %v4510_v11, 0.0 }
 0x32f   :  { %v4539_v7 = vmax.f32 %v4511_v44, 0.0 }
 0x330   :  { %v4540_v19 = vmax.f32 %v4512_v18, 0.0  ;;  %v4251_v3 = vpop.f32.mrb[60].mxu0  ;;  %v4354_v60 = vpop.f32.mrb[60].mxu1 }
 0x331   :  { %v4565_v63 = vmax.f32 %v4537_v6, %v4539_v7  ;;  %v4473_v37 = vmax.f32 %v4251_v3, %v4354_v60  ;;  %v4253_v39 = vpop.f32.mrb[61].mxu0  ;;  %v4356_v50 = vpop.f32.mrb[61].mxu1  ;;  %v7749_v6 = vld [vmem:[%s10214_s3 + $0x118] sm:$0xff]   ;;  %v7750_v7 = vld [vmem:[%s10214_s3 + $0x188] sm:$0xff]  }
 0x332   :  { %v4474_v45 = vmax.f32 %v4253_v39, %v4356_v50  ;;  %v4255_v13 = vpop.f32.mrb[62].mxu0  ;;  %v4358_v43 = vpop.f32.mrb[62].mxu1  ;;  %v4566_v49 = vmax.f32 %v4538_v62, %v4540_v19 }
 0x333   :  { %v4513_v10 = vadd.f32 %v9916_v32, %v4473_v37  ;;  %v4475_v0 = vmax.f32 %v4255_v13, %v4358_v43  ;;  %v4257_v14 = vpop.f32.mrb[63].mxu0  ;;  %v4360_v25 = vpop.f32.mrb[63].mxu1  ;;  %v4579_v17 = vpack.c.bf16 %v4565_v63, %v4565_v63  ;;  %v7751_v63 = vld [vmem:[%s10214_s3 + $0x160] sm:$0xff]   ;;  %v7752_v37 = vld [vmem:[%s10214_s3 + $0x1d0] sm:$0xff]  }
 0x334   :  { %v4514_v41 = vadd.f32 %v9920_v16, %v4474_v45  ;;  %v4476_v36 = vmax.f32 %v4257_v14, %v4360_v25  ;;  %v4580_v58 = vpack.c.bf16 %v4566_v49, %v4566_v49 }
 0x335   :  { %v4515_v53 = vadd.f32 %v9916_v32, %v4475_v0  ;;  %v4541_v52 = vmax.f32 %v4513_v10, 0.0 }
 0x336   :  { %v4516_v56 = vadd.f32 %v9920_v16, %v4476_v36  ;;  %4761 = vmatprep.mubr.bf16.mxu0 %v4580_v58  ;;  %v4542_v9 = vmax.f32 %v4514_v41, 0.0  ;;  %v7753_v36 = vld [vmem:[%s10214_s3 + $0x120] sm:$0xff]   ;;  %v7754_v58 = vld [vmem:[%s10214_s3 + $0x190] sm:$0xff]  }
 0x337   :  { %v4543_v30 = vmax.f32 %v4515_v53, 0.0  ;;  %4762 = vmatmul.mubr.bf16.vlgmr.msra.gmra.mrb[84].mxu0 %v4579_v17  ;;  %v7755_v17 = vld [vmem:[%s10214_s3 + $0x168] sm:$0xff]   ;;  %v7756_v53 = vld [vmem:[%s10214_s3 + $0x1d8] sm:$0xff]  }
 0x338   :  { %v4544_v42 = vmax.f32 %v4516_v56, 0.0  ;;  %6872 = vmatpush3.bf16.msra.mxu0 %v7738_v15  ;;  %v4261_v59 = vpop.f32.mrb[64].mxu0  ;;  %v4364_v35 = vpop.f32.mrb[64].mxu1 }
 0x339   :  { %v4567_v23 = vmax.f32 %v4541_v52, %v4543_v30  ;;  %v4477_v57 = vmax.f32 %v4261_v59, %v4364_v35  ;;  %v4263_v61 = vpop.f32.mrb[65].mxu0  ;;  %v4366_v1 = vpop.f32.mrb[65].mxu1  ;;  %6873 = vmatprep.subr.bf16.mxu0 %v7740_v29  ;;  %v7757_v35 = vld [vmem:[%s10214_s3 + $0x128] sm:$0xff]  }
 0x33a   :  { %v4478_v54 = vmax.f32 %v4263_v61, %v4366_v1  ;;  %v4265_v2 = vpop.f32.mrb[66].mxu0  ;;  %v4368_v5 = vpop.f32.mrb[66].mxu1  ;;  %v4568_v38 = vmax.f32 %v4542_v9, %v4544_v42 }
 0x33b   :  { %v4517_v51 = vadd.f32 %v9916_v32, %v4477_v57  ;;  %v4479_v24 = vmax.f32 %v4265_v2, %v4368_v5  ;;  %v4267_v55 = vpop.f32.mrb[67].mxu0  ;;  %v4370_v22 = vpop.f32.mrb[67].mxu1  ;;  %v4581_v8 = vpack.c.bf16 %v4567_v23, %v4567_v23 }
 0x33c   :  { %v4518_v12 = vadd.f32 %v9920_v16, %v4478_v54  ;;  %v4480_v47 = vmax.f32 %v4267_v55, %v4370_v22  ;;  %6874 = vmatpush3.bf16.msra.mxu0 %v7742_v27  ;;  %v4582_v26 = vpack.c.bf16 %v4568_v38, %v4568_v38  ;;  %v7758_v27 = vld [vmem:[%s10214_s3 + $0x198] sm:$0xff]   ;;  %v7760_v54 = vld [vmem:[%s10214_s3 + $0x1e0] sm:$0xff]  }
 0x33d   :  { %v4519_v28 = vadd.f32 %v9916_v32, %v4479_v24  ;;  %6875 = vmatprep.subr.bf16.mxu0 %v7743_v4  ;;  %v4545_v46 = vmax.f32 %v4517_v51, 0.0  ;;  %v7759_v4 = vld [vmem:[%s10214_s3 + $0x170] sm:$0xff]  }
 0x33e   :  { %v4520_v21 = vadd.f32 %v9920_v16, %v4480_v47  ;;  %4931 = vmatprep.mubr.bf16.mxu1 %v4582_v26  ;;  %v4546_v11 = vmax.f32 %v4518_v12, 0.0 }
 0x33f   :  { %v4547_v33 = vmax.f32 %v4519_v28, 0.0  ;;  %4932 = vmatmul.mubr.bf16.vlgmr.msra.gmra.mrb[84].mxu1 %v4581_v8  ;;  %v7762_v8 = vld [vmem:[%s10214_s3 + $0x1a0] sm:$0xff]  }
 0x340   :  { %v4548_v48 = vmax.f32 %v4520_v21, 0.0  ;;  %6876 = vmatpush3.bf16.msra.mxu0 %v7745_v34  ;;  %6894 = vmatpush3.bf16.msra.mxu1 %v7746_v31  ;;  %v4271_v44 = vpop.f32.mrb[68].mxu0  ;;  %v4374_v18 = vpop.f32.mrb[68].mxu1  ;;  %v7761_v31 = vld [vmem:[%s10214_s3 + $0x130] sm:$0xff]  }
 0x341   :  { %v9964_v62 = vmax.f32 %v4545_v46, %v4547_v33  ;;  %v4481_v19 = vmax.f32 %v4271_v44, %v4374_v18  ;;  %v4273_v3 = vpop.f32.mrb[69].mxu0  ;;  %v4376_v60 = vpop.f32.mrb[69].mxu1  ;;  %6877 = vmatprep.subr.bf16.mxu0 %v7747_v40  ;;  %6895 = vmatprep.subr.bf16.mxu1 %v7748_v20  ;;  %v7763_v40 = vld [vmem:[%s10214_s3 + $0x178] sm:$0xff]   ;;  %v7764_v20 = vld [vmem:[%s10214_s3 + $0x1e8] sm:$0xff]  }
 0x342   :  { %v4482_v39 = vmax.f32 %v4273_v3, %v4376_v60  ;;  %v4275_v50 = vpop.f32.mrb[70].mxu0  ;;  %v4378_v45 = vpop.f32.mrb[70].mxu1  ;;  %v4570_v13 = vmax.f32 %v4546_v11, %v4548_v48 }
 0x343   :  { %v4521_v43 = vadd.f32 %v9916_v32, %v4481_v19  ;;  %v4483_v49 = vmax.f32 %v4275_v50, %v4378_v45  ;;  %v4277_v10 = vpop.f32.mrb[71].mxu0  ;;  %v4380_v0 = vpop.f32.mrb[71].mxu1 }
 0x344   :  { %v4522_v14 = vadd.f32 %v9920_v16, %v4482_v39  ;;  %v4484_v25 = vmax.f32 %v4277_v10, %v4380_v0  ;;  %6878 = vmatpush3.bf16.msra.mxu0 %v7749_v6  ;;  %6896 = vmatpush3.bf16.msra.mxu1 %v7750_v7  ;;  %v4584_v41 = vpack.c.bf16 %v4570_v13, %v4570_v13  ;;  %v7765_v6 = vld [vmem:[%s10214_s3 + $0x138] sm:$0xff]   ;;  %v7766_v7 = vld [vmem:[%s10214_s3 + $0x1a8] sm:$0xff]   ;;  %v7768_v39 = vld [vmem:[%s10214_s3 + $0x240] sm:$0xff]  }
 0x345   :  { %v4523_v15 = vadd.f32 %v9916_v32, %v4483_v49  ;;  %6879 = vmatprep.subr.bf16.mxu0 %v7751_v63  ;;  %6897 = vmatprep.subr.bf16.mxu1 %v7752_v37  ;;  %v4549_v56 = vmax.f32 %v4521_v43, 0.0  ;;  %v7767_v37 = vld [vmem:[%s10214_s3 + $0x1f0] sm:$0xff]  }
 0x346   :  { %v4524_v29 = vadd.f32 %v9920_v16, %v4484_v25  ;;  %5101 = vmatprep.mubr.bf16.mxu0 %v4584_v41  ;;  %v4550_v30 = vmax.f32 %v4522_v14, 0.0 }
 0x347   :  { %v4551_v52 = vmax.f32 %v4523_v15, 0.0  ;;  %v4583_v15 = vpack.c.bf16 %v9964_v62, %v9964_v62 }
 0x348   :  { %v4552_v9 = vmax.f32 %v4524_v29, 0.0  ;;  %6880 = vmatpush3.bf16.msra.mxu0 %v7753_v36  ;;  %6898 = vmatpush3.bf16.msra.mxu1 %v7754_v58  ;;  %v4281_v42 = vpop.f32.mrb[72].mxu0  ;;  %v4384_v59 = vpop.f32.mrb[72].mxu1  ;;  %v7769_v36 = vld [vmem:[%s10214_s3 + $0x1b0] sm:$0xff]   ;;  %v7770_v58 = vld [vmem:[%s10214_s3 + $0x200] sm:$0xff]   ;;  %v7771_v29 = vld [vmem:[%s10214_s3 + $0x1f8] sm:$0xff]  }
 0x349   :  { %v9994_v23 = vmax.f32 %v4549_v56, %v4551_v52  ;;  %v4485_v57 = vmax.f32 %v4281_v42, %v4384_v59  ;;  %v4283_v61 = vpop.f32.mrb[73].mxu0  ;;  %v4386_v1 = vpop.f32.mrb[73].mxu1  ;;  %6881 = vmatprep.subr.bf16.mxu0 %v7755_v17  ;;  %6899 = vmatprep.subr.bf16.mxu1 %v7756_v53  ;;  %v7772_v52 = vld [vmem:[%s10214_s3 + $0x248] sm:$0xff]  }
 0x34a   :  { %v4486_v2 = vmax.f32 %v4283_v61, %v4386_v1  ;;  %v4285_v5 = vpop.f32.mrb[74].mxu0  ;;  %v4388_v38 = vpop.f32.mrb[74].mxu1  ;;  %v4572_v51 = vmax.f32 %v4550_v30, %v4552_v9 }
 0x34b   :  { %v4525_v24 = vadd.f32 %v9916_v32, %v4485_v57  ;;  %v4487_v55 = vmax.f32 %v4285_v5, %v4388_v38  ;;  %v4287_v22 = vpop.f32.mrb[75].mxu0  ;;  %v4390_v12 = vpop.f32.mrb[75].mxu1  ;;  %v7774_v57 = vld [vmem:[%s10214_s3 + $0x208] sm:$0xff]   ;;  %v7776_v5 = vld [vmem:[%s10214_s3 + $0x2c0] sm:$0xff]  }
 0x34c   :  { %v4526_v47 = vadd.f32 %v9920_v16, %v4486_v2  ;;  %v4488_v26 = vmax.f32 %v4287_v22, %v4390_v12  ;;  %6882 = vmatpush3.bf16.msra.mxu0 %v7757_v35  ;;  %6900 = vmatpush3.bf16.msra.mxu1 %v7758_v27  ;;  %v4586_v34 = vpack.c.bf16 %v4572_v51, %v4572_v51  ;;  %v7773_v27 = vld [vmem:[%s10214_s3 + $0x1b8] sm:$0xff]   ;;  %v7775_v2 = vld [vmem:[%s10214_s3 + $0x250] sm:$0xff]  }
 0x34d   :  { %v4527_v28 = vadd.f32 %v9916_v32, %v4487_v55  ;;  %6883 = vmatprep.subr.bf16.mxu0 %v7759_v4  ;;  %6901 = vmatprep.subr.bf16.mxu1 %v7760_v54  ;;  %v4553_v46 = vmax.f32 %v4525_v24, 0.0 }
 0x34e   :  { %v4528_v21 = vadd.f32 %v9920_v16, %v4488_v26  ;;  %5271 = vmatprep.mubr.bf16.mxu1 %v4586_v34  ;;  %v4554_v11 = vmax.f32 %v4526_v47, 0.0 }
 0x34f   :  { %v4555_v33 = vmax.f32 %v4527_v28, 0.0  ;;  %v7778_v28 = vld [vmem:[%s10214_s3 + $0x280] sm:$0xff]  }
 0x350   :  { %v4556_v48 = vmax.f32 %v4528_v21, 0.0  ;;  %6884 = vmatpush3.bf16.msra.mxu0 %v7761_v31  ;;  %6902 = vmatpush3.bf16.msra.mxu1 %v7762_v8  ;;  %v4291_v44 = vpop.f32.mrb[76].mxu0  ;;  %v4394_v18 = vpop.f32.mrb[76].mxu1  ;;  %v7777_v8 = vld [vmem:[%s10214_s3 + $0x210] sm:$0xff]  }
 0x351   :  { %v10024_v19 = vmax.f32 %v4553_v46, %v4555_v33  ;;  %v4489_v3 = vmax.f32 %v4291_v44, %v4394_v18  ;;  %v4293_v60 = vpop.f32.mrb[77].mxu0  ;;  %v4396_v63 = vpop.f32.mrb[77].mxu1  ;;  %6885 = vmatprep.subr.bf16.mxu0 %v7763_v40  ;;  %6903 = vmatprep.subr.bf16.mxu1 %v7764_v20  ;;  %v4585_v40 = vpack.c.bf16 %v9994_v23, %v9994_v23  ;;  %v7779_v46 = vld [vmem:[%s10214_s3 + $0x258] sm:$0xff]  }
 0x352   :  { %v4490_v50 = vmax.f32 %v4293_v60, %v4396_v63  ;;  %v4295_v45 = vpop.f32.mrb[78].mxu0  ;;  %v4398_v13 = vpop.f32.mrb[78].mxu1  ;;  %v4574_v43 = vmax.f32 %v4554_v11, %v4556_v48  ;;  %v7780_v11 = vld [vmem:[%s10214_s3 + $0x2c8] sm:$0xff]   ;;  %v7785_v63 = vld [vmem:[%s10214_s3 + $0x220] sm:$0xff]  }
 0x353   :  { %v4529_v49 = vadd.f32 %v9916_v32, %v4489_v3  ;;  %v4491_v10 = vmax.f32 %v4295_v45, %v4398_v13  ;;  %v4297_v0 = vpop.f32.mrb[79].mxu0  ;;  %v4400_v14 = vpop.f32.mrb[79].mxu1  ;;  %v7784_v3 = vld [vmem:[%s10214_s3 + $0x2d0] sm:$0xff]   ;;  %v7789_v45 = vld [vmem:[%s10214_s3 + $0x228] sm:$0xff]   ;;  %v7790_v13 = vld [vmem:[%s10214_s3 + $0x298] sm:$0xff]  }
 0x354   :  { %v4530_v25 = vadd.f32 %v9920_v16, %v4490_v50  ;;  %v4492_v41 = vmax.f32 %v4297_v0, %v4400_v14  ;;  %6886 = vmatpush3.bf16.msra.mxu0 %v7765_v6  ;;  %6904 = vmatpush3.bf16.msra.mxu1 %v7766_v7  ;;  %v4588_v53 = vpack.c.bf16 %v4574_v43, %v4574_v43  ;;  %v7782_v6 = vld [vmem:[%s10214_s3 + $0x288] sm:$0xff]   ;;  %v7783_v7 = vld [vmem:[%s10214_s3 + $0x260] sm:$0xff]   ;;  %v7788_v50 = vld [vmem:[%s10214_s3 + $0x2d8] sm:$0xff]  }
 0x355   :  { %v4531_v17 = vadd.f32 %v9916_v32, %v4491_v10  ;;  %6905 = vmatprep.subr.bf16.mxu1 %v7767_v37  ;;  %6915 = vmatprep.subr.bf16.mxu0 %v7768_v39  ;;  %v4557_v30 = vmax.f32 %v4529_v49, 0.0  ;;  %v7786_v37 = vld [vmem:[%s10214_s3 + $0x290] sm:$0xff]   ;;  %v7787_v39 = vld [vmem:[%s10214_s3 + $0x268] sm:$0xff]   ;;  %v7792_v49 = vld [vmem:[%s10214_s3 + $0x2e0] sm:$0xff]  }
 0x356   :  { %v4532_v56 = vadd.f32 %v9920_v16, %v4492_v41  ;;  %v4558_v42 = vmax.f32 %v4530_v25, 0.0  ;;  %v7791_v43 = vld [vmem:[%s10214_s3 + $0x270] sm:$0xff]   ;;  %v7794_v0 = vld [vmem:[%s10214_s3 + $0x2a0] sm:$0xff]   ;;  %v7795_v14 = vld [vmem:[%s10214_s3 + $0x278] sm:$0xff]  }
 0x357   :  { %v4559_v9 = vmax.f32 %v4531_v17, 0.0  ;;  %5102 = vmatmul.mubr.bf16.vlgmr.msra.gmra.mrb[88].mxu0 %v4583_v15  ;;  %v7793_v10 = vld [vmem:[%s10214_s3 + $0x230] sm:$0xff]   ;;  %v7796_v25 = vld [vmem:[%s10214_s3 + $0x2e8] sm:$0xff]   ;;  %v7797_v41 = vld [vmem:[%s10214_s3 + $0x238] sm:$0xff]  }
 0x358   :  { %v4560_v62 = vmax.f32 %v4532_v56, 0.0  ;;  %6906 = vmatpush3.bf16.msra.mxu1 %v7769_v36  ;;  %6916 = vmatpush3.bf16.msra.mxu0 %v7770_v58  ;;  %v4301_v59 = vpop.f32.mrb[80].mxu0  ;;  %v4404_v35 = vpop.f32.mrb[80].mxu1  ;;  %v7798_v36 = vld [vmem:[%s10214_s3 + $0x2a8] sm:$0xff]   ;;  %v7799_v58 = vld [vmem:[%s10214_s3 + $0x2f0] sm:$0xff]   ;;  %v7800_v15 = vld [vmem:[%s10214_s3 + $0x340] sm:$0xff]  }
 0x359   :  { %v10056_v61 = vmax.f32 %v4557_v30, %v4559_v9  ;;  %5441 = vmatprep.mubr.bf16.mxu0 %v4588_v53  ;;  %v4493_v1 = vmax.f32 %v4301_v59, %v4404_v35  ;;  %v4303_v4 = vpop.f32.mrb[81].mxu0  ;;  %v4406_v54 = vpop.f32.mrb[81].mxu1  ;;  %6907 = vmatprep.subr.bf16.mxu1 %v7771_v29  ;;  %v7801_v17 = vld [vmem:[%s10214_s3 + $0x2b0] sm:$0xff]   ;;  %v7802_v53 = vld [vmem:[%s10214_s3 + $0x300] sm:$0xff]   ;;  %v4587_v29 = vpack.c.bf16 %v10024_v19, %v10024_v19  ;;  %v7803_v56 = vld [vmem:[%s10214_s3 + $0x2f8] sm:$0xff]  }
 0x35a   :  { %v4494_v38 = vmax.f32 %v4303_v4, %v4406_v54  ;;  %v4305_v51 = vpop.f32.mrb[82].mxu0  ;;  %v4408_v24 = vpop.f32.mrb[82].mxu1  ;;  %6917 = vmatprep.subr.bf16.mxu0 %v7772_v52  ;;  %v4576_v55 = vmax.f32 %v4558_v42, %v4560_v62  ;;  %v7804_v52 = vld [vmem:[%s10214_s3 + $0x348] sm:$0xff]   ;;  %v7805_v9 = vld [vmem:[%s10214_s3 + $0x2b8] sm:$0xff]   ;;  %v7807_v42 = vld [vmem:[%s10214_s3 + $0x350] sm:$0xff]  }
 0x35b   :  { %v4533_v22 = vadd.f32 %v9916_v32, %v4493_v1  ;;  %v4495_v12 = vmax.f32 %v4305_v51, %v4408_v24  ;;  %v4307_v47 = vpop.f32.mrb[83].mxu0  ;;  %v4410_v26 = vpop.f32.mrb[83].mxu1  ;;  %v7806_v19 = vld [vmem:[%s10214_s3 + $0x308] sm:$0xff]   ;;  %v7808_v62 = vld [vmem:[%s10214_s3 + $0x310] sm:$0xff]   ;;  %v4589_v59 = vpack.c.bf16 %v10056_v61, %v10056_v61  ;;  %v7809_v35 = vld [vmem:[%s10214_s3 + $0x358] sm:$0xff]  }
 0x35c   :  { %v4534_v34 = vadd.f32 %v9920_v16, %v4494_v38  ;;  %v4496_v31 = vmax.f32 %v4307_v47, %v4410_v26  ;;  %6908 = vmatpush3.bf16.msra.mxu1 %v7773_v27  ;;  %6918 = vmatpush3.bf16.msra.mxu0 %v7774_v57  ;;  %v4590_v21 = vpack.c.bf16 %v4576_v55, %v4576_v55  ;;  %v7810_v27 = vld [vmem:[%s10214_s3 + $0x318] sm:$0xff]   ;;  %v7811_v57 = vld [vmem:[%s10214_s3 + $0x360] sm:$0xff]   ;;  %v7813_v1 = vld [vmem:[%s10214_s3 + $0x368] sm:$0xff]  }
 0x35d   :  { %v4535_v20 = vadd.f32 %v9916_v32, %v4495_v12  ;;  %6919 = vmatprep.subr.bf16.mxu0 %v7775_v2  ;;  %6937 = vmatprep.subr.bf16.mxu1 %v7776_v5  ;;  %v4561_v48 = vmax.f32 %v4533_v22, 0.0  ;;  %v7781_v32 = vld [vmem:[%s10214_s3 + $0x218] sm:$0xff]   ;;  %v7812_v61 = vld [vmem:[%s10214_s3 + $0x320] sm:$0xff]   ;;  %v7814_v4 = vld [vmem:[%s10214_s3 + $0x328] sm:$0xff]  }
 0x35e   :  { %v4536_v33 = vadd.f32 %v9920_v16, %v4496_v31  ;;  %v4562_v18 = vmax.f32 %v4534_v34, 0.0  ;;  %v7815_v54 = vld [vmem:[%s10214_s3 + $0x370] sm:$0xff]   ;;  %v7817_v5 = vld [vmem:[%s10214_s3 + $0x378] sm:$0xff]   ;;  %v6522_v26 = vld [vmem:[%s10216_s6] ss:$0 sm:$0xff] }
 0x35f   :  { %v4563_v44 = vmax.f32 %v4535_v20, 0.0  ;;  %5272 = vmatmul.mubr.bf16.vlgmr.msra.gmra.mrb[88].mxu1 %v4585_v40  ;;  %v7816_v2 = vld [vmem:[%s10214_s3 + $0x330] sm:$0xff]   ;;  %v7818_v38 = vld [vmem:[%s10214_s3 + $0x338] sm:$0xff]  }
 0x360   :  { %v4564_v23 = vmax.f32 %v4536_v33, 0.0  ;;  %6920 = vmatpush3.bf16.msra.mxu0 %v7777_v8  ;;  %6938 = vmatpush3.bf16.msra.mxu1 %v7778_v28 }
 0x361   :  { %v10088_v16 = vmax.f32 %v4561_v48, %v4563_v44  ;;  %5611 = vmatprep.mubr.bf16.mxu1 %v4590_v21  ;;  %6921 = vmatprep.subr.bf16.mxu0 %v7779_v46 }
 0x362   :  { %6939 = vmatprep.subr.bf16.mxu1 %v7780_v11  ;;  %v4578_v60 = vmax.f32 %v4562_v18, %v4564_v23 }
 0x363   :  { %v4591_v51 = vpack.c.bf16 %v10088_v16, %v10088_v16 }
 0x364   :  { %6922 = vmatpush3.bf16.msra.mxu0 %v7781_v32  ;;  %6940 = vmatpush3.bf16.msra.mxu1 %v7782_v6  ;;  %v4592_v30 = vpack.c.bf16 %v4578_v60, %v4578_v60 }
 0x365   :  { %6923 = vmatprep.subr.bf16.mxu0 %v7783_v7  ;;  %6941 = vmatprep.subr.bf16.mxu1 %v7784_v3 }
 0x368   :  { %6924 = vmatpush3.bf16.msra.mxu0 %v7785_v63  ;;  %6942 = vmatpush3.bf16.msra.mxu1 %v7786_v37 }
 0x369   :  { %6925 = vmatprep.subr.bf16.mxu0 %v7787_v39  ;;  %6943 = vmatprep.subr.bf16.mxu1 %v7788_v50 }
 0x36c   :  { %6926 = vmatpush3.bf16.msra.mxu0 %v7789_v45  ;;  %6944 = vmatpush3.bf16.msra.mxu1 %v7790_v13 }
 0x36d   :  { %6927 = vmatprep.subr.bf16.mxu0 %v7791_v43  ;;  %6945 = vmatprep.subr.bf16.mxu1 %v7792_v49 }
 0x370   :  { %6928 = vmatpush3.bf16.msra.mxu0 %v7793_v10  ;;  %6946 = vmatpush3.bf16.msra.mxu1 %v7794_v0 }
 0x371   :  { %6929 = vmatprep.subr.bf16.mxu0 %v7795_v14  ;;  %6947 = vmatprep.subr.bf16.mxu1 %v7796_v25 }
 0x374   :  { %6930 = vmatpush3.bf16.msra.mxu0 %v7797_v41  ;;  %6948 = vmatpush3.bf16.msra.mxu1 %v7798_v36 }
 0x375   :  { %6949 = vmatprep.subr.bf16.mxu1 %v7799_v58  ;;  %6959 = vmatprep.subr.bf16.mxu0 %v7800_v15 }
 0x377   :  { %5442 = vmatmul.mubr.bf16.vlgmr.msra.gmra.mrb[92].mxu0 %v4587_v29 }
 0x378   :  { %6950 = vmatpush3.bf16.msra.mxu1 %v7801_v17  ;;  %6960 = vmatpush3.bf16.msra.mxu0 %v7802_v53 }
 0x379   :  { %5781 = vmatprep.mubr.bf16.mxu0 %v4592_v30  ;;  %6951 = vmatprep.subr.bf16.mxu1 %v7803_v56 }
 0x37a   :  { %6961 = vmatprep.subr.bf16.mxu0 %v7804_v52 }
 0x37c   :  { %6952 = vmatpush3.bf16.msra.mxu1 %v7805_v9  ;;  %6962 = vmatpush3.bf16.msra.mxu0 %v7806_v19 }
 0x37d   :  { %6963 = vmatprep.subr.bf16.mxu0 %v7807_v42 }
 0x37f   :  { %5612 = vmatmul.mubr.bf16.vlgmr.msra.gmra.mrb[92].mxu1 %v4589_v59 }
 0x380   :  { %6964 = vmatpush3.bf16.msra.mxu0 %v7808_v62 }
 0x381   :  { %6965 = vmatprep.subr.bf16.mxu0 %v7809_v35 }
 0x384   :  { %6966 = vmatpush3.bf16.msra.mxu0 %v7810_v27 }
 0x385   :  { %6967 = vmatprep.subr.bf16.mxu0 %v7811_v57 }
 0x388   :  { %6968 = vmatpush3.bf16.msra.mxu0 %v7812_v61 }
 0x389   :  { %6969 = vmatprep.subr.bf16.mxu0 %v7813_v1 }
 0x38c   :  { %6970 = vmatpush3.bf16.msra.mxu0 %v7814_v4 }
 0x38d   :  { %6971 = vmatprep.subr.bf16.mxu0 %v7815_v54 }
 0x390   :  { %6972 = vmatpush3.bf16.msra.mxu0 %v7816_v2 }
 0x391   :  { %6973 = vmatprep.subr.bf16.mxu0 %v7817_v5 }
 0x394   :  { %6974 = vmatpush3.bf16.msra.mxu0 %v7818_v38 }
 0x397   :  { %5782 = vmatmul.mubr.bf16.vlgmr.msra.gmra.mrb[96].mxu0 %v4591_v51 }
 0x40a   :  { %v6843_v24 = vpop.f32.mrb[84].mxu0 }
 0x40b   :  { %v6844_v55 = vpop.f32.mrb[85].mxu0 }
 0x40c   :  { %v6845_v22 = vadd.f32 %v6844_v55, %v6843_v24  ;;  %v6846_v12 = vpop.f32.mrb[86].mxu0 }
 0x40d   :  { %v6847_v47 = vpop.f32.mrb[87].mxu0 }
 0x40e   :  { %v4769_v8 = vadd.f32 %v6845_v22, %v6522_v26 }
 0x412   :  { %v6865_v34 = vpop.f32.mrb[84].mxu1 }
 0x413   :  { %v6866_v31 = vpop.f32.mrb[85].mxu1 }
 0x414   :  { %v6867_v28 = vadd.f32 %v6866_v31, %v6865_v34  ;;  %v6868_v40 = vpop.f32.mrb[86].mxu1 }
 0x415   :  { %v6869_v20 = vpop.f32.mrb[87].mxu1 }
 0x416   :  { %v4939_v21 = vadd.f32 %v6867_v28, %v4769_v8 }
 0x42a   :  { %v6887_v46 = vpop.f32.mrb[88].mxu0 }
 0x42b   :  { %v6888_v33 = vpop.f32.mrb[89].mxu0 }
 0x42c   :  { %v6889_v11 = vadd.f32 %v6888_v33, %v6887_v46  ;;  %v6890_v48 = vpop.f32.mrb[90].mxu0 }
 0x42d   :  { %v6891_v44 = vpop.f32.mrb[91].mxu0 }
 0x42e   :  { %v5109_v18 = vadd.f32 %v6889_v11, %v4939_v21 }
 0x432   :  { %v6909_v23 = vpop.f32.mrb[88].mxu1 }
 0x433   :  { %v6910_v32 = vpop.f32.mrb[89].mxu1 }
 0x434   :  { %v6911_v6 = vadd.f32 %v6910_v32, %v6909_v23  ;;  %v6912_v16 = vpop.f32.mrb[90].mxu1 }
 0x435   :  { %v6913_v7 = vpop.f32.mrb[91].mxu1 }
 0x436   :  { %v5279_v3 = vadd.f32 %v6911_v6, %v5109_v18 }
 0x44a   :  { %v6931_v60 = vpop.f32.mrb[92].mxu0 }
 0x44b   :  { %v6932_v63 = vpop.f32.mrb[93].mxu0 }
 0x44c   :  { %v6933_v37 = vadd.f32 %v6932_v63, %v6931_v60  ;;  %v6934_v39 = vpop.f32.mrb[94].mxu0 }
 0x44d   :  { %v6935_v50 = vpop.f32.mrb[95].mxu0 }
 0x44e   :  { %v5449_v45 = vadd.f32 %v6933_v37, %v5279_v3 }
 0x452   :  { %v6953_v13 = vpop.f32.mrb[92].mxu1 }
 0x453   :  { %v6954_v43 = vpop.f32.mrb[93].mxu1 }
 0x454   :  { %v6955_v49 = vadd.f32 %v6954_v43, %v6953_v13  ;;  %v6956_v10 = vpop.f32.mrb[94].mxu1 }
 0x455   :  { %v6957_v0 = vpop.f32.mrb[95].mxu1 }
 0x456   :  { %v5619_v14 = vadd.f32 %v6955_v49, %v5449_v45 }
 0x46a   :  { %v6975_v25 = vpop.f32.mrb[96].mxu0 }
 0x46b   :  { %v6976_v41 = vpop.f32.mrb[97].mxu0 }
 0x46c   :  { %v6977_v36 = vadd.f32 %v6976_v41, %v6975_v25  ;;  %v6978_v58 = vpop.f32.mrb[98].mxu0 }
 0x46d   :  { %v6979_v15 = vpop.f32.mrb[99].mxu0 }
 0x46e   :  { %v5789_v17 = vadd.f32 %v6977_v36, %v5619_v14 }
 0x470   :  { %5791 = vst.msk [vmem:[%s10217_s7] sm:$0xff] %vm5790_vm3, %v5789_v17 }

</bundles_post_ra>
